<compile_context>
chip_gen: v7x
topology: tpu7x:2x2x1
jax: 0.10.0
libtpu: 0.0.40
codegen_flags: <defaults>
</compile_context>

<pallas_src>
import functools

import jax
import jax.numpy as jnp
from jax.experimental import pallas as pl
from jax.experimental.pallas import tpu as pltpu


# ---------------------------- config ----------------------------
class Cfg:
    image = 16          # image size (HxW)
    patch = 8           # patch size  -> 2x2 = 4 patches, seq = 5 (with CLS)
    channels = 3
    hidden = 32
    heads = 4
    head_dim = 8
    intermediate = 64
    layers = 2
    proj_dim = 16
    eps = 1e-5


# ---------------------------- fused kernel ----------------------------
def _encoder_kernel(
    patches_ref,   # [B, S, CPP]      (row 0 per batch is zeros -> CLS slot)
    patch_w_ref,   # [CPP, hid]
    embed_ref,     # [S, hid]         (pos emb; row 0 already += class_emb)
    gvec_ref,      # [4, hid]         pre_g, pre_b, post_g, post_b
    lvec_ref,      # [L, 6, hid]      ln1_g, ln1_b, ln2_g, ln2_b, bo, fc2_b
    fc1_b_ref,     # [L, 1, inter]
    qkv_b_ref,     # [L*3*H, 1, dh]   (Q biases pre-scaled by 1/sqrt(dh))
    qkv_w_ref,     # [L*3*H, hid, dh] (Q weights pre-scaled by 1/sqrt(dh))
    wo_ref,        # [L*H, dh, hid]
    fc1_w_ref,     # [L, hid, inter]
    fc2_w_ref,     # [L, inter, hid]
    proj_w_ref,    # [hid, proj_dim]
    out_ref,       # [B, proj_dim]
    *, layers, heads, eps,
):
    B, S, _ = patches_ref.shape

    def layer_norm(x, g, b):
        mu = jnp.mean(x, axis=-1, keepdims=True)
        var = jnp.mean(jnp.square(x - mu), axis=-1, keepdims=True)  # biased (torch LN)
        return (x - mu) * jax.lax.rsqrt(var + eps) * g + b

    gv = gvec_ref[...]          # [4, hid]
    patch_w = patch_w_ref[...]
    embed = embed_ref[...]
    proj_w = proj_w_ref[...]

    pooled_rows = []
    for b in range(B):                        # batch folded into one grid step
        # --- patch embedding (Conv2d k=s=P, no bias == unfold + matmul) ---
        # row 0 of patches is zero, so the matmul directly yields the full
        # [S, hid] sequence; embed row 0 already contains the class embedding.
        x = jnp.dot(patches_ref[b], patch_w, preferred_element_type=jnp.float32)
        x = x + embed                                           # [S, hid]

        # --- pre layernorm ---
        hidden = layer_norm(x, gv[0:1], gv[1:2])

        for l in range(layers):                                  # unrolled (L small)
            lv = lvec_ref[l]                                     # [6, hid]

            # ---------- self-attention block ----------
            resid = hidden
            h = layer_norm(hidden, lv[0:1], lv[1:2])
            # accumulate per-head out-projection: attn@Wo == sum_h head_h@Wo[h]
            attn_out = lv[4:5] + resid                           # out-proj bias + residual
            for hh in range(heads):                              # unrolled (4 heads)
                iq = (l * 3 + 0) * heads + hh
                ik = (l * 3 + 1) * heads + hh
                iv = (l * 3 + 2) * heads + hh
                qh = (jnp.dot(h, qkv_w_ref[iq], preferred_element_type=jnp.float32)
                      + qkv_b_ref[iq])                           # scale already folded in
                kh = (jnp.dot(h, qkv_w_ref[ik], preferred_element_type=jnp.float32)
                      + qkv_b_ref[ik])
                vh = (jnp.dot(h, qkv_w_ref[iv], preferred_element_type=jnp.float32)
                      + qkv_b_ref[iv])
                s = jax.lax.dot_general(qh, kh, (((1,), (1,)), ((), ())),
                                        preferred_element_type=jnp.float32)  # [S, S]
                s = s - jnp.max(s, axis=-1, keepdims=True)
                p = jnp.exp(s)
                # approx=True: EUP reciprocal; use approx=False for strict HF parity.
                p = p * pl.reciprocal(jnp.sum(p, axis=-1, keepdims=True), approx=True)
                oh = jnp.dot(p, vh, preferred_element_type=jnp.float32)       # [S, dh]
                attn_out = attn_out + jnp.dot(oh, wo_ref[l * heads + hh],
                                              preferred_element_type=jnp.float32)
            hidden = attn_out

            # ---------- MLP block (quick_gelu) ----------
            resid = hidden
            h = layer_norm(hidden, lv[2:3], lv[3:4])
            h = (jnp.dot(h, fc1_w_ref[l], preferred_element_type=jnp.float32)
                 + fc1_b_ref[l])
            h = h * jax.nn.sigmoid(1.702 * h)
            hidden = (jnp.dot(h, fc2_w_ref[l], preferred_element_type=jnp.float32)
                      + lv[5:6] + resid)

        pooled_rows.append(hidden[0:1, :])                       # CLS token

    # --- post-LN on CLS, visual projection (no bias), single writeback ---
    pooled = jnp.concatenate(pooled_rows, axis=0)                # [B, hid]
    pooled = layer_norm(pooled, gv[2:3], gv[3:4])
    out_ref[...] = jnp.dot(pooled, proj_w,
                           preferred_element_type=jnp.float32).astype(out_ref.dtype)


# ---------------------------- parameters ----------------------------
def init_params(key, cfg):
    hid, inter, L = cfg.hidden, cfg.intermediate, cfg.layers
    H, dh = cfg.heads, cfg.head_dim
    num_pos = (cfg.image // cfg.patch) ** 2 + 1
    keys = iter(jax.random.split(key, 16))

    def w(shape):
        return jax.random.normal(next(keys), shape, jnp.float32) * 0.02

    class_emb = w((hid,))
    pos_emb = w((num_pos, hid))
    embed = pos_emb.at[0].add(class_emb)          # fold class_emb into pos row 0

    ones = jnp.ones((L, hid), jnp.float32)
    zeros = jnp.zeros((L, hid), jnp.float32)
    bo = w((L, hid))
    fc2_b = w((L, hid))
    # packed per-layer vectors: ln1_g, ln1_b, ln2_g, ln2_b, out-proj bias, fc2 bias
    lvec = jnp.stack([ones, zeros, ones, zeros, bo, fc2_b], axis=1)     # [L, 6, hid]

    # packed global LN params: pre_g, pre_b, post_g, post_b
    gvec = jnp.stack([jnp.ones((hid,), jnp.float32), jnp.zeros((hid,), jnp.float32),
                      jnp.ones((hid,), jnp.float32), jnp.zeros((hid,), jnp.float32)],
                     axis=0)                                            # [4, hid]

    # per-head Q/K/V weights/biases; 1/sqrt(dh) folded into the Q third (weights
    # AND bias — HF applies scale after bias, so this is numerically identical).
    # (From a real checkpoint: q/k/v_proj.weight.T reshaped to [hid, H, dh].)
    scale = dh ** -0.5
    qkv_w = w((L, 3, H, hid, dh))
    qkv_b = w((L, 3, H, 1, dh))
    qkv_w = qkv_w.at[:, 0].multiply(scale)
    qkv_b = qkv_b.at[:, 0].multiply(scale)

    return {
        # all weights pre-transposed host-side to [K, N]; per-layer stacks on L
        "patch_w_t": w((cfg.channels * cfg.patch * cfg.patch, hid)),
        "embed": embed,
        "gvec": gvec,
        "lvec": lvec,
        "fc1_b": w((L, 1, inter)),
        "qkv_w": qkv_w.reshape(L * 3 * H, hid, dh),
        "qkv_b": qkv_b.reshape(L * 3 * H, 1, dh),
        "wo": w((L * H, dh, hid)),
        "fc1_w": w((L, hid, inter)),
        "fc2_w": w((L, inter, hid)),
        "proj_w_t": w((hid, cfg.proj_dim)),
    }


# ---------------------------- forward ----------------------------
def _fs(shape):
    n = len(shape)
    return pl.BlockSpec(shape, lambda i, n=n: (0,) * n)


def clip_image_encoder(pixel_values, params, *, cfg):
    B, C, Himg, Wimg = pixel_values.shape
    P, hid = cfg.patch, cfg.hidden
    G = Himg // P
    Np = G * G
    CPP = C * P * P
    S = Np + 1
    L, inter, H, dh = cfg.layers, cfg.intermediate, cfg.heads, cfg.head_dim

    # unfold NCHW into patch rows [B, Np, C*P*P] (Conv2d k=s=P layout: (C,kh,kw))
    patches = (pixel_values.reshape(B, C, G, P, G, P)
               .transpose(0, 2, 4, 1, 3, 5)
               .reshape(B, Np, CPP))
    # prepend a zero row per batch = CLS slot (no in-kernel concat needed)
    patches = jnp.pad(patches, ((0, 0), (1, 0), (0, 0)))

    kern = functools.partial(_encoder_kernel, layers=L, heads=H, eps=cfg.eps)

    shapes = [
        (B, S, CPP),            # patches
        (CPP, hid),             # patch_w_t
        (S, hid),               # embed
        (4, hid),               # gvec
        (L, 6, hid),            # lvec
        (L, 1, inter),          # fc1_b
        (L * 3 * H, 1, dh),     # qkv_b
        (L * 3 * H, hid, dh),   # qkv_w
        (L * H, dh, hid),       # wo
        (L, hid, inter),        # fc1_w
        (L, inter, hid),        # fc2_w
        (hid, cfg.proj_dim),    # proj_w_t
    ]

    out = pl.pallas_call(
        kern,
        out_shape=jax.ShapeDtypeStruct((B, cfg.proj_dim), jnp.float32),
        grid=(1,),                       # batch folded into one step (single-TC friendly)
        in_specs=[_fs(s) for s in shapes],
        out_specs=_fs((B, cfg.proj_dim)),
        compiler_params=pltpu.CompilerParams(dimension_semantics=("arbitrary",)),
    )(patches, params["patch_w_t"], params["embed"], params["gvec"],
      params["lvec"], params["fc1_b"], params["qkv_b"], params["qkv_w"],
      params["wo"], params["fc1_w"], params["fc2_w"], params["proj_w_t"])

    return out


# ---------------------------- main ----------------------------
if __name__ == "__main__":
    cfg = Cfg()
    key = jax.random.PRNGKey(0)
    pkey, xkey = jax.random.split(key)

    params = init_params(pkey, cfg)
    pixel_values = jax.random.normal(
        xkey, (2, cfg.channels, cfg.image, cfg.image), jnp.float32
    )

    forward = jax.jit(functools.partial(clip_image_encoder, cfg=cfg))
    out = forward(pixel_values, params)
    out = jax.block_until_ready(out)
    assert out.shape == (2, cfg.proj_dim), out.shape
    print("KERNEL_OK")
</pallas_src>

<mosaic_0001>
module attributes {stable_mosaic.version = 11 : i64} {
  func.func @_encoder_kernel(%arg0: i32, %arg1: memref<2x5x192xf32, #tpu.memory_space<vmem>>, %arg2: memref<192x32xf32, #tpu.memory_space<vmem>>, %arg3: memref<5x32xf32, #tpu.memory_space<vmem>>, %arg4: memref<4x32xf32, #tpu.memory_space<vmem>>, %arg5: memref<2x6x32xf32, #tpu.memory_space<vmem>>, %arg6: memref<2x1x64xf32, #tpu.memory_space<vmem>>, %arg7: memref<24x1x8xf32, #tpu.memory_space<vmem>>, %arg8: memref<24x32x8xf32, #tpu.memory_space<vmem>>, %arg9: memref<8x8x32xf32, #tpu.memory_space<vmem>>, %arg10: memref<2x32x64xf32, #tpu.memory_space<vmem>>, %arg11: memref<2x64x32xf32, #tpu.memory_space<vmem>>, %arg12: memref<32x16xf32, #tpu.memory_space<vmem>>, %arg13: memref<2x16xf32, #tpu.memory_space<vmem>>) attributes {dimension_semantics = [#tpu.dimension_semantics<arbitrary>], iteration_bounds = array<i64: 1>, scalar_prefetch = 0 : i64, scratch_operands = 0 : i64, tpu.core_type = #tpu.core_type<tc>, window_params = [{pipeline_mode = #tpu.pipeline_mode<synchronous>, transform_indices = @transform_0, window_bounds = array<i64: 2, 5, 192>}, {pipeline_mode = #tpu.pipeline_mode<synchronous>, transform_indices = @transform_1, window_bounds = array<i64: 192, 32>}, {pipeline_mode = #tpu.pipeline_mode<synchronous>, transform_indices = @transform_2, window_bounds = array<i64: 5, 32>}, {pipeline_mode = #tpu.pipeline_mode<synchronous>, transform_indices = @transform_3, window_bounds = array<i64: 4, 32>}, {pipeline_mode = #tpu.pipeline_mode<synchronous>, transform_indices = @transform_4, window_bounds = array<i64: 2, 6, 32>}, {pipeline_mode = #tpu.pipeline_mode<synchronous>, transform_indices = @transform_5, window_bounds = array<i64: 2, 1, 64>}, {pipeline_mode = #tpu.pipeline_mode<synchronous>, transform_indices = @transform_6, window_bounds = array<i64: 24, 1, 8>}, {pipeline_mode = #tpu.pipeline_mode<synchronous>, transform_indices = @transform_7, window_bounds = array<i64: 24, 32, 8>}, {pipeline_mode = #tpu.pipeline_mode<synchronous>, transform_indices = @transform_8, window_bounds = array<i64: 8, 8, 32>}, {pipeline_mode = #tpu.pipeline_mode<synchronous>, transform_indices = @transform_9, window_bounds = array<i64: 2, 32, 64>}, {pipeline_mode = #tpu.pipeline_mode<synchronous>, transform_indices = @transform_10, window_bounds = array<i64: 2, 64, 32>}, {pipeline_mode = #tpu.pipeline_mode<synchronous>, transform_indices = @transform_11, window_bounds = array<i64: 32, 16>}, {pipeline_mode = #tpu.pipeline_mode<synchronous>, transform_indices = @transform_12, window_bounds = array<i64: 2, 16>}]} {
    %c0 = arith.constant 0 : index
    %c0_0 = arith.constant 0 : index
    %0 = vector.load %arg4[%c0, %c0_0] : memref<4x32xf32, #tpu.memory_space<vmem>>, vector<4x32xf32>
    %c0_1 = arith.constant 0 : index
    %c0_2 = arith.constant 0 : index
    %1 = vector.load %arg2[%c0_1, %c0_2] : memref<192x32xf32, #tpu.memory_space<vmem>>, vector<192x32xf32>
    %c0_3 = arith.constant 0 : index
    %c0_4 = arith.constant 0 : index
    %2 = vector.load %arg3[%c0_3, %c0_4] : memref<5x32xf32, #tpu.memory_space<vmem>>, vector<5x32xf32>
    %c0_5 = arith.constant 0 : index
    %c0_6 = arith.constant 0 : index
    %3 = vector.load %arg12[%c0_5, %c0_6] : memref<32x16xf32, #tpu.memory_space<vmem>>, vector<32x16xf32>
    %c0_7 = arith.constant 0 : index
    %c0_8 = arith.constant 0 : index
    %c0_9 = arith.constant 0 : index
    %4 = vector.load %arg1[%c0_7, %c0_8, %c0_9] : memref<2x5x192xf32, #tpu.memory_space<vmem>>, vector<1x5x192xf32>
    %5 = vector.shape_cast %4 : vector<1x5x192xf32> to vector<5x192xf32>
    %cst = arith.constant dense<0.000000e+00> : vector<5x32xf32>
    %6 = tpu.matmul %5, %1, %cst {dimension_numbers = #tpu.dot_dimension_numbers<[1], [0], [0], [1], [0, 0, 1, 1], [], []>} : vector<5x192xf32>, vector<192x32xf32>, vector<5x32xf32> -> vector<5x32xf32>
    %7 = arith.addf %6, %2 : vector<5x32xf32>
    %8 = vector.extract_strided_slice %0 {offsets = [0, 0], sizes = [1, 32], strides = [1, 1]} : vector<4x32xf32> to vector<1x32xf32>
    %9 = vector.extract_strided_slice %0 {offsets = [1, 0], sizes = [1, 32], strides = [1, 1]} : vector<4x32xf32> to vector<1x32xf32>
    %cst_10 = arith.constant dense<0.000000e+00> : vector<5xf32>
    %10 = vector.multi_reduction <add>, %7, %cst_10 [1] : vector<5x32xf32> to vector<5xf32>
    %11 = vector.shape_cast %10 : vector<5xf32> to vector<5x1xf32>
    %cst_11 = arith.constant 3.200000e+01 : f32
    %12 = vector.broadcast %cst_11 : f32 to vector<5x1xf32>
    %13 = arith.divf %11, %12 : vector<5x1xf32>
    %14 = vector.broadcast %13 : vector<5x1xf32> to vector<5x32xf32>
    %15 = arith.subf %7, %14 : vector<5x32xf32>
    %16 = arith.mulf %15, %15 : vector<5x32xf32>
    %cst_12 = arith.constant dense<0.000000e+00> : vector<5xf32>
    %17 = vector.multi_reduction <add>, %16, %cst_12 [1] : vector<5x32xf32> to vector<5xf32>
    %18 = vector.shape_cast %17 : vector<5xf32> to vector<5x1xf32>
    %cst_13 = arith.constant 3.200000e+01 : f32
    %19 = vector.broadcast %cst_13 : f32 to vector<5x1xf32>
    %20 = arith.divf %18, %19 : vector<5x1xf32>
    %21 = vector.broadcast %13 : vector<5x1xf32> to vector<5x32xf32>
    %22 = arith.subf %7, %21 : vector<5x32xf32>
    %cst_14 = arith.constant 9.99999974E-6 : f32
    %23 = vector.broadcast %cst_14 : f32 to vector<5x1xf32>
    %24 = arith.addf %20, %23 : vector<5x1xf32>
    %25 = math.rsqrt %24 : vector<5x1xf32>
    %26 = vector.broadcast %25 : vector<5x1xf32> to vector<5x32xf32>
    %27 = arith.mulf %22, %26 : vector<5x32xf32>
    %28 = vector.broadcast %8 : vector<1x32xf32> to vector<5x32xf32>
    %29 = arith.mulf %27, %28 : vector<5x32xf32>
    %30 = vector.broadcast %9 : vector<1x32xf32> to vector<5x32xf32>
    %31 = arith.addf %29, %30 : vector<5x32xf32>
    %c0_15 = arith.constant 0 : index
    %c0_16 = arith.constant 0 : index
    %c0_17 = arith.constant 0 : index
    %32 = vector.load %arg5[%c0_15, %c0_16, %c0_17] : memref<2x6x32xf32, #tpu.memory_space<vmem>>, vector<1x6x32xf32>
    %33 = vector.shape_cast %32 : vector<1x6x32xf32> to vector<6x32xf32>
    %34 = vector.extract_strided_slice %33 {offsets = [0, 0], sizes = [1, 32], strides = [1, 1]} : vector<6x32xf32> to vector<1x32xf32>
    %35 = vector.extract_strided_slice %33 {offsets = [1, 0], sizes = [1, 32], strides = [1, 1]} : vector<6x32xf32> to vector<1x32xf32>
    %cst_18 = arith.constant dense<0.000000e+00> : vector<5xf32>
    %36 = vector.multi_reduction <add>, %31, %cst_18 [1] : vector<5x32xf32> to vector<5xf32>
    %37 = vector.shape_cast %36 : vector<5xf32> to vector<5x1xf32>
    %cst_19 = arith.constant 3.200000e+01 : f32
    %38 = vector.broadcast %cst_19 : f32 to vector<5x1xf32>
    %39 = arith.divf %37, %38 : vector<5x1xf32>
    %40 = vector.broadcast %39 : vector<5x1xf32> to vector<5x32xf32>
    %41 = arith.subf %31, %40 : vector<5x32xf32>
    %42 = arith.mulf %41, %41 : vector<5x32xf32>
    %cst_20 = arith.constant dense<0.000000e+00> : vector<5xf32>
    %43 = vector.multi_reduction <add>, %42, %cst_20 [1] : vector<5x32xf32> to vector<5xf32>
    %44 = vector.shape_cast %43 : vector<5xf32> to vector<5x1xf32>
    %cst_21 = arith.constant 3.200000e+01 : f32
    %45 = vector.broadcast %cst_21 : f32 to vector<5x1xf32>
    %46 = arith.divf %44, %45 : vector<5x1xf32>
    %47 = vector.broadcast %39 : vector<5x1xf32> to vector<5x32xf32>
    %48 = arith.subf %31, %47 : vector<5x32xf32>
    %cst_22 = arith.constant 9.99999974E-6 : f32
    %49 = vector.broadcast %cst_22 : f32 to vector<5x1xf32>
    %50 = arith.addf %46, %49 : vector<5x1xf32>
    %51 = math.rsqrt %50 : vector<5x1xf32>
    %52 = vector.broadcast %51 : vector<5x1xf32> to vector<5x32xf32>
    %53 = arith.mulf %48, %52 : vector<5x32xf32>
    %54 = vector.broadcast %34 : vector<1x32xf32> to vector<5x32xf32>
    %55 = arith.mulf %53, %54 : vector<5x32xf32>
    %56 = vector.broadcast %35 : vector<1x32xf32> to vector<5x32xf32>
    %57 = arith.addf %55, %56 : vector<5x32xf32>
    %58 = vector.extract_strided_slice %33 {offsets = [4, 0], sizes = [1, 32], strides = [1, 1]} : vector<6x32xf32> to vector<1x32xf32>
    %59 = vector.broadcast %58 : vector<1x32xf32> to vector<5x32xf32>
    %60 = arith.addf %59, %31 : vector<5x32xf32>
    %c0_23 = arith.constant 0 : index
    %c0_24 = arith.constant 0 : index
    %c0_25 = arith.constant 0 : index
    %61 = vector.load %arg8[%c0_23, %c0_24, %c0_25] : memref<24x32x8xf32, #tpu.memory_space<vmem>>, vector<1x32x8xf32>
    %62 = vector.shape_cast %61 : vector<1x32x8xf32> to vector<32x8xf32>
    %cst_26 = arith.constant dense<0.000000e+00> : vector<5x8xf32>
    %63 = tpu.matmul %57, %62, %cst_26 {dimension_numbers = #tpu.dot_dimension_numbers<[1], [0], [0], [1], [0, 0, 1, 1], [], []>} : vector<5x32xf32>, vector<32x8xf32>, vector<5x8xf32> -> vector<5x8xf32>
    %c0_27 = arith.constant 0 : index
    %c0_28 = arith.constant 0 : index
    %c0_29 = arith.constant 0 : index
    %64 = vector.load %arg7[%c0_27, %c0_28, %c0_29] : memref<24x1x8xf32, #tpu.memory_space<vmem>>, vector<1x1x8xf32>
    %65 = vector.shape_cast %64 : vector<1x1x8xf32> to vector<1x8xf32>
    %66 = vector.broadcast %65 : vector<1x8xf32> to vector<5x8xf32>
    %67 = arith.addf %63, %66 : vector<5x8xf32>
    %c4 = arith.constant 4 : index
    %c0_30 = arith.constant 0 : index
    %c0_31 = arith.constant 0 : index
    %68 = vector.load %arg8[%c4, %c0_30, %c0_31] : memref<24x32x8xf32, #tpu.memory_space<vmem>>, vector<1x32x8xf32>
    %69 = vector.shape_cast %68 : vector<1x32x8xf32> to vector<32x8xf32>
    %cst_32 = arith.constant dense<0.000000e+00> : vector<5x8xf32>
    %70 = tpu.matmul %57, %69, %cst_32 {dimension_numbers = #tpu.dot_dimension_numbers<[1], [0], [0], [1], [0, 0, 1, 1], [], []>} : vector<5x32xf32>, vector<32x8xf32>, vector<5x8xf32> -> vector<5x8xf32>
    %c4_33 = arith.constant 4 : index
    %c0_34 = arith.constant 0 : index
    %c0_35 = arith.constant 0 : index
    %71 = vector.load %arg7[%c4_33, %c0_34, %c0_35] : memref<24x1x8xf32, #tpu.memory_space<vmem>>, vector<1x1x8xf32>
    %72 = vector.shape_cast %71 : vector<1x1x8xf32> to vector<1x8xf32>
    %73 = vector.broadcast %72 : vector<1x8xf32> to vector<5x8xf32>
    %74 = arith.addf %70, %73 : vector<5x8xf32>
    %c8 = arith.constant 8 : index
    %c0_36 = arith.constant 0 : index
    %c0_37 = arith.constant 0 : index
    %75 = vector.load %arg8[%c8, %c0_36, %c0_37] : memref<24x32x8xf32, #tpu.memory_space<vmem>>, vector<1x32x8xf32>
    %76 = vector.shape_cast %75 : vector<1x32x8xf32> to vector<32x8xf32>
    %cst_38 = arith.constant dense<0.000000e+00> : vector<5x8xf32>
    %77 = tpu.matmul %57, %76, %cst_38 {dimension_numbers = #tpu.dot_dimension_numbers<[1], [0], [0], [1], [0, 0, 1, 1], [], []>} : vector<5x32xf32>, vector<32x8xf32>, vector<5x8xf32> -> vector<5x8xf32>
    %c8_39 = arith.constant 8 : index
    %c0_40 = arith.constant 0 : index
    %c0_41 = arith.constant 0 : index
    %78 = vector.load %arg7[%c8_39, %c0_40, %c0_41] : memref<24x1x8xf32, #tpu.memory_space<vmem>>, vector<1x1x8xf32>
    %79 = vector.shape_cast %78 : vector<1x1x8xf32> to vector<1x8xf32>
    %80 = vector.broadcast %79 : vector<1x8xf32> to vector<5x8xf32>
    %81 = arith.addf %77, %80 : vector<5x8xf32>
    %cst_42 = arith.constant dense<0.000000e+00> : vector<5x5xf32>
    %82 = tpu.matmul %67, %74, %cst_42 {dimension_numbers = #tpu.dot_dimension_numbers<[1], [1], [0], [0], [0, 0, 1, 0], [], []>} : vector<5x8xf32>, vector<5x8xf32>, vector<5x5xf32> -> vector<5x5xf32>
    %cst_43 = arith.constant dense<0xFF800000> : vector<5xf32>
    %83 = vector.multi_reduction <maximumf>, %82, %cst_43 [1] : vector<5x5xf32> to vector<5xf32>
    %84 = vector.shape_cast %83 : vector<5xf32> to vector<5x1xf32>
    %85 = vector.broadcast %84 : vector<5x1xf32> to vector<5x5xf32>
    %86 = arith.subf %82, %85 : vector<5x5xf32>
    %87 = math.exp %86 : vector<5x5xf32>
    %cst_44 = arith.constant dense<0.000000e+00> : vector<5xf32>
    %88 = vector.multi_reduction <add>, %87, %cst_44 [1] : vector<5x5xf32> to vector<5xf32>
    %89 = vector.shape_cast %88 : vector<5xf32> to vector<5x1xf32>
    %90 = tpu.reciprocal %89 {approx = true} : vector<5x1xf32> -> vector<5x1xf32>
    %91 = vector.broadcast %90 : vector<5x1xf32> to vector<5x5xf32>
    %92 = arith.mulf %87, %91 : vector<5x5xf32>
    %cst_45 = arith.constant dense<0.000000e+00> : vector<5x8xf32>
    %93 = tpu.matmul %92, %81, %cst_45 {dimension_numbers = #tpu.dot_dimension_numbers<[1], [0], [0], [1], [0, 0, 1, 1], [], []>} : vector<5x5xf32>, vector<5x8xf32>, vector<5x8xf32> -> vector<5x8xf32>
    %c0_46 = arith.constant 0 : index
    %c0_47 = arith.constant 0 : index
    %c0_48 = arith.constant 0 : index
    %94 = vector.load %arg9[%c0_46, %c0_47, %c0_48] : memref<8x8x32xf32, #tpu.memory_space<vmem>>, vector<1x8x32xf32>
    %95 = vector.shape_cast %94 : vector<1x8x32xf32> to vector<8x32xf32>
    %cst_49 = arith.constant dense<0.000000e+00> : vector<5x32xf32>
    %96 = tpu.matmul %93, %95, %cst_49 {dimension_numbers = #tpu.dot_dimension_numbers<[1], [0], [0], [1], [0, 0, 1, 1], [], []>} : vector<5x8xf32>, vector<8x32xf32>, vector<5x32xf32> -> vector<5x32xf32>
    %97 = arith.addf %60, %96 : vector<5x32xf32>
    %c1 = arith.constant 1 : index
    %c0_50 = arith.constant 0 : index
    %c0_51 = arith.constant 0 : index
    %98 = vector.load %arg8[%c1, %c0_50, %c0_51] : memref<24x32x8xf32, #tpu.memory_space<vmem>>, vector<1x32x8xf32>
    %99 = vector.shape_cast %98 : vector<1x32x8xf32> to vector<32x8xf32>
    %cst_52 = arith.constant dense<0.000000e+00> : vector<5x8xf32>
    %100 = tpu.matmul %57, %99, %cst_52 {dimension_numbers = #tpu.dot_dimension_numbers<[1], [0], [0], [1], [0, 0, 1, 1], [], []>} : vector<5x32xf32>, vector<32x8xf32>, vector<5x8xf32> -> vector<5x8xf32>
    %c1_53 = arith.constant 1 : index
    %c0_54 = arith.constant 0 : index
    %c0_55 = arith.constant 0 : index
    %101 = vector.load %arg7[%c1_53, %c0_54, %c0_55] : memref<24x1x8xf32, #tpu.memory_space<vmem>>, vector<1x1x8xf32>
    %102 = vector.shape_cast %101 : vector<1x1x8xf32> to vector<1x8xf32>
    %103 = vector.broadcast %102 : vector<1x8xf32> to vector<5x8xf32>
    %104 = arith.addf %100, %103 : vector<5x8xf32>
    %c5 = arith.constant 5 : index
    %c0_56 = arith.constant 0 : index
    %c0_57 = arith.constant 0 : index
    %105 = vector.load %arg8[%c5, %c0_56, %c0_57] : memref<24x32x8xf32, #tpu.memory_space<vmem>>, vector<1x32x8xf32>
    %106 = vector.shape_cast %105 : vector<1x32x8xf32> to vector<32x8xf32>
    %cst_58 = arith.constant dense<0.000000e+00> : vector<5x8xf32>
    %107 = tpu.matmul %57, %106, %cst_58 {dimension_numbers = #tpu.dot_dimension_numbers<[1], [0], [0], [1], [0, 0, 1, 1], [], []>} : vector<5x32xf32>, vector<32x8xf32>, vector<5x8xf32> -> vector<5x8xf32>
    %c5_59 = arith.constant 5 : index
    %c0_60 = arith.constant 0 : index
    %c0_61 = arith.constant 0 : index
    %108 = vector.load %arg7[%c5_59, %c0_60, %c0_61] : memref<24x1x8xf32, #tpu.memory_space<vmem>>, vector<1x1x8xf32>
    %109 = vector.shape_cast %108 : vector<1x1x8xf32> to vector<1x8xf32>
    %110 = vector.broadcast %109 : vector<1x8xf32> to vector<5x8xf32>
    %111 = arith.addf %107, %110 : vector<5x8xf32>
    %c9 = arith.constant 9 : index
    %c0_62 = arith.constant 0 : index
    %c0_63 = arith.constant 0 : index
    %112 = vector.load %arg8[%c9, %c0_62, %c0_63] : memref<24x32x8xf32, #tpu.memory_space<vmem>>, vector<1x32x8xf32>
    %113 = vector.shape_cast %112 : vector<1x32x8xf32> to vector<32x8xf32>
    %cst_64 = arith.constant dense<0.000000e+00> : vector<5x8xf32>
    %114 = tpu.matmul %57, %113, %cst_64 {dimension_numbers = #tpu.dot_dimension_numbers<[1], [0], [0], [1], [0, 0, 1, 1], [], []>} : vector<5x32xf32>, vector<32x8xf32>, vector<5x8xf32> -> vector<5x8xf32>
    %c9_65 = arith.constant 9 : index
    %c0_66 = arith.constant 0 : index
    %c0_67 = arith.constant 0 : index
    %115 = vector.load %arg7[%c9_65, %c0_66, %c0_67] : memref<24x1x8xf32, #tpu.memory_space<vmem>>, vector<1x1x8xf32>
    %116 = vector.shape_cast %115 : vector<1x1x8xf32> to vector<1x8xf32>
    %117 = vector.broadcast %116 : vector<1x8xf32> to vector<5x8xf32>
    %118 = arith.addf %114, %117 : vector<5x8xf32>
    %cst_68 = arith.constant dense<0.000000e+00> : vector<5x5xf32>
    %119 = tpu.matmul %104, %111, %cst_68 {dimension_numbers = #tpu.dot_dimension_numbers<[1], [1], [0], [0], [0, 0, 1, 0], [], []>} : vector<5x8xf32>, vector<5x8xf32>, vector<5x5xf32> -> vector<5x5xf32>
    %cst_69 = arith.constant dense<0xFF800000> : vector<5xf32>
    %120 = vector.multi_reduction <maximumf>, %119, %cst_69 [1] : vector<5x5xf32> to vector<5xf32>
    %121 = vector.shape_cast %120 : vector<5xf32> to vector<5x1xf32>
    %122 = vector.broadcast %121 : vector<5x1xf32> to vector<5x5xf32>
    %123 = arith.subf %119, %122 : vector<5x5xf32>
    %124 = math.exp %123 : vector<5x5xf32>
    %cst_70 = arith.constant dense<0.000000e+00> : vector<5xf32>
    %125 = vector.multi_reduction <add>, %124, %cst_70 [1] : vector<5x5xf32> to vector<5xf32>
    %126 = vector.shape_cast %125 : vector<5xf32> to vector<5x1xf32>
    %127 = tpu.reciprocal %126 {approx = true} : vector<5x1xf32> -> vector<5x1xf32>
    %128 = vector.broadcast %127 : vector<5x1xf32> to vector<5x5xf32>
    %129 = arith.mulf %124, %128 : vector<5x5xf32>
    %cst_71 = arith.constant dense<0.000000e+00> : vector<5x8xf32>
    %130 = tpu.matmul %129, %118, %cst_71 {dimension_numbers = #tpu.dot_dimension_numbers<[1], [0], [0], [1], [0, 0, 1, 1], [], []>} : vector<5x5xf32>, vector<5x8xf32>, vector<5x8xf32> -> vector<5x8xf32>
    %c1_72 = arith.constant 1 : index
    %c0_73 = arith.constant 0 : index
    %c0_74 = arith.constant 0 : index
    %131 = vector.load %arg9[%c1_72, %c0_73, %c0_74] : memref<8x8x32xf32, #tpu.memory_space<vmem>>, vector<1x8x32xf32>
    %132 = vector.shape_cast %131 : vector<1x8x32xf32> to vector<8x32xf32>
    %cst_75 = arith.constant dense<0.000000e+00> : vector<5x32xf32>
    %133 = tpu.matmul %130, %132, %cst_75 {dimension_numbers = #tpu.dot_dimension_numbers<[1], [0], [0], [1], [0, 0, 1, 1], [], []>} : vector<5x8xf32>, vector<8x32xf32>, vector<5x32xf32> -> vector<5x32xf32>
    %134 = arith.addf %97, %133 : vector<5x32xf32>
    %c2 = arith.constant 2 : index
    %c0_76 = arith.constant 0 : index
    %c0_77 = arith.constant 0 : index
    %135 = vector.load %arg8[%c2, %c0_76, %c0_77] : memref<24x32x8xf32, #tpu.memory_space<vmem>>, vector<1x32x8xf32>
    %136 = vector.shape_cast %135 : vector<1x32x8xf32> to vector<32x8xf32>
    %cst_78 = arith.constant dense<0.000000e+00> : vector<5x8xf32>
    %137 = tpu.matmul %57, %136, %cst_78 {dimension_numbers = #tpu.dot_dimension_numbers<[1], [0], [0], [1], [0, 0, 1, 1], [], []>} : vector<5x32xf32>, vector<32x8xf32>, vector<5x8xf32> -> vector<5x8xf32>
    %c2_79 = arith.constant 2 : index
    %c0_80 = arith.constant 0 : index
    %c0_81 = arith.constant 0 : index
    %138 = vector.load %arg7[%c2_79, %c0_80, %c0_81] : memref<24x1x8xf32, #tpu.memory_space<vmem>>, vector<1x1x8xf32>
    %139 = vector.shape_cast %138 : vector<1x1x8xf32> to vector<1x8xf32>
    %140 = vector.broadcast %139 : vector<1x8xf32> to vector<5x8xf32>
    %141 = arith.addf %137, %140 : vector<5x8xf32>
    %c6 = arith.constant 6 : index
    %c0_82 = arith.constant 0 : index
    %c0_83 = arith.constant 0 : index
    %142 = vector.load %arg8[%c6, %c0_82, %c0_83] : memref<24x32x8xf32, #tpu.memory_space<vmem>>, vector<1x32x8xf32>
    %143 = vector.shape_cast %142 : vector<1x32x8xf32> to vector<32x8xf32>
    %cst_84 = arith.constant dense<0.000000e+00> : vector<5x8xf32>
    %144 = tpu.matmul %57, %143, %cst_84 {dimension_numbers = #tpu.dot_dimension_numbers<[1], [0], [0], [1], [0, 0, 1, 1], [], []>} : vector<5x32xf32>, vector<32x8xf32>, vector<5x8xf32> -> vector<5x8xf32>
    %c6_85 = arith.constant 6 : index
    %c0_86 = arith.constant 0 : index
    %c0_87 = arith.constant 0 : index
    %145 = vector.load %arg7[%c6_85, %c0_86, %c0_87] : memref<24x1x8xf32, #tpu.memory_space<vmem>>, vector<1x1x8xf32>
    %146 = vector.shape_cast %145 : vector<1x1x8xf32> to vector<1x8xf32>
    %147 = vector.broadcast %146 : vector<1x8xf32> to vector<5x8xf32>
    %148 = arith.addf %144, %147 : vector<5x8xf32>
    %c10 = arith.constant 10 : index
    %c0_88 = arith.constant 0 : index
    %c0_89 = arith.constant 0 : index
    %149 = vector.load %arg8[%c10, %c0_88, %c0_89] : memref<24x32x8xf32, #tpu.memory_space<vmem>>, vector<1x32x8xf32>
    %150 = vector.shape_cast %149 : vector<1x32x8xf32> to vector<32x8xf32>
    %cst_90 = arith.constant dense<0.000000e+00> : vector<5x8xf32>
    %151 = tpu.matmul %57, %150, %cst_90 {dimension_numbers = #tpu.dot_dimension_numbers<[1], [0], [0], [1], [0, 0, 1, 1], [], []>} : vector<5x32xf32>, vector<32x8xf32>, vector<5x8xf32> -> vector<5x8xf32>
    %c10_91 = arith.constant 10 : index
    %c0_92 = arith.constant 0 : index
    %c0_93 = arith.constant 0 : index
    %152 = vector.load %arg7[%c10_91, %c0_92, %c0_93] : memref<24x1x8xf32, #tpu.memory_space<vmem>>, vector<1x1x8xf32>
    %153 = vector.shape_cast %152 : vector<1x1x8xf32> to vector<1x8xf32>
    %154 = vector.broadcast %153 : vector<1x8xf32> to vector<5x8xf32>
    %155 = arith.addf %151, %154 : vector<5x8xf32>
    %cst_94 = arith.constant dense<0.000000e+00> : vector<5x5xf32>
    %156 = tpu.matmul %141, %148, %cst_94 {dimension_numbers = #tpu.dot_dimension_numbers<[1], [1], [0], [0], [0, 0, 1, 0], [], []>} : vector<5x8xf32>, vector<5x8xf32>, vector<5x5xf32> -> vector<5x5xf32>
    %cst_95 = arith.constant dense<0xFF800000> : vector<5xf32>
    %157 = vector.multi_reduction <maximumf>, %156, %cst_95 [1] : vector<5x5xf32> to vector<5xf32>
    %158 = vector.shape_cast %157 : vector<5xf32> to vector<5x1xf32>
    %159 = vector.broadcast %158 : vector<5x1xf32> to vector<5x5xf32>
    %160 = arith.subf %156, %159 : vector<5x5xf32>
    %161 = math.exp %160 : vector<5x5xf32>
    %cst_96 = arith.constant dense<0.000000e+00> : vector<5xf32>
    %162 = vector.multi_reduction <add>, %161, %cst_96 [1] : vector<5x5xf32> to vector<5xf32>
    %163 = vector.shape_cast %162 : vector<5xf32> to vector<5x1xf32>
    %164 = tpu.reciprocal %163 {approx = true} : vector<5x1xf32> -> vector<5x1xf32>
    %165 = vector.broadcast %164 : vector<5x1xf32> to vector<5x5xf32>
    %166 = arith.mulf %161, %165 : vector<5x5xf32>
    %cst_97 = arith.constant dense<0.000000e+00> : vector<5x8xf32>
    %167 = tpu.matmul %166, %155, %cst_97 {dimension_numbers = #tpu.dot_dimension_numbers<[1], [0], [0], [1], [0, 0, 1, 1], [], []>} : vector<5x5xf32>, vector<5x8xf32>, vector<5x8xf32> -> vector<5x8xf32>
    %c2_98 = arith.constant 2 : index
    %c0_99 = arith.constant 0 : index
    %c0_100 = arith.constant 0 : index
    %168 = vector.load %arg9[%c2_98, %c0_99, %c0_100] : memref<8x8x32xf32, #tpu.memory_space<vmem>>, vector<1x8x32xf32>
    %169 = vector.shape_cast %168 : vector<1x8x32xf32> to vector<8x32xf32>
    %cst_101 = arith.constant dense<0.000000e+00> : vector<5x32xf32>
    %170 = tpu.matmul %167, %169, %cst_101 {dimension_numbers = #tpu.dot_dimension_numbers<[1], [0], [0], [1], [0, 0, 1, 1], [], []>} : vector<5x8xf32>, vector<8x32xf32>, vector<5x32xf32> -> vector<5x32xf32>
    %171 = arith.addf %134, %170 : vector<5x32xf32>
    %c3 = arith.constant 3 : index
    %c0_102 = arith.constant 0 : index
    %c0_103 = arith.constant 0 : index
    %172 = vector.load %arg8[%c3, %c0_102, %c0_103] : memref<24x32x8xf32, #tpu.memory_space<vmem>>, vector<1x32x8xf32>
    %173 = vector.shape_cast %172 : vector<1x32x8xf32> to vector<32x8xf32>
    %cst_104 = arith.constant dense<0.000000e+00> : vector<5x8xf32>
    %174 = tpu.matmul %57, %173, %cst_104 {dimension_numbers = #tpu.dot_dimension_numbers<[1], [0], [0], [1], [0, 0, 1, 1], [], []>} : vector<5x32xf32>, vector<32x8xf32>, vector<5x8xf32> -> vector<5x8xf32>
    %c3_105 = arith.constant 3 : index
    %c0_106 = arith.constant 0 : index
    %c0_107 = arith.constant 0 : index
    %175 = vector.load %arg7[%c3_105, %c0_106, %c0_107] : memref<24x1x8xf32, #tpu.memory_space<vmem>>, vector<1x1x8xf32>
    %176 = vector.shape_cast %175 : vector<1x1x8xf32> to vector<1x8xf32>
    %177 = vector.broadcast %176 : vector<1x8xf32> to vector<5x8xf32>
    %178 = arith.addf %174, %177 : vector<5x8xf32>
    %c7 = arith.constant 7 : index
    %c0_108 = arith.constant 0 : index
    %c0_109 = arith.constant 0 : index
    %179 = vector.load %arg8[%c7, %c0_108, %c0_109] : memref<24x32x8xf32, #tpu.memory_space<vmem>>, vector<1x32x8xf32>
    %180 = vector.shape_cast %179 : vector<1x32x8xf32> to vector<32x8xf32>
    %cst_110 = arith.constant dense<0.000000e+00> : vector<5x8xf32>
    %181 = tpu.matmul %57, %180, %cst_110 {dimension_numbers = #tpu.dot_dimension_numbers<[1], [0], [0], [1], [0, 0, 1, 1], [], []>} : vector<5x32xf32>, vector<32x8xf32>, vector<5x8xf32> -> vector<5x8xf32>
    %c7_111 = arith.constant 7 : index
    %c0_112 = arith.constant 0 : index
    %c0_113 = arith.constant 0 : index
    %182 = vector.load %arg7[%c7_111, %c0_112, %c0_113] : memref<24x1x8xf32, #tpu.memory_space<vmem>>, vector<1x1x8xf32>
    %183 = vector.shape_cast %182 : vector<1x1x8xf32> to vector<1x8xf32>
    %184 = vector.broadcast %183 : vector<1x8xf32> to vector<5x8xf32>
    %185 = arith.addf %181, %184 : vector<5x8xf32>
    %c11 = arith.constant 11 : index
    %c0_114 = arith.constant 0 : index
    %c0_115 = arith.constant 0 : index
    %186 = vector.load %arg8[%c11, %c0_114, %c0_115] : memref<24x32x8xf32, #tpu.memory_space<vmem>>, vector<1x32x8xf32>
    %187 = vector.shape_cast %186 : vector<1x32x8xf32> to vector<32x8xf32>
    %cst_116 = arith.constant dense<0.000000e+00> : vector<5x8xf32>
    %188 = tpu.matmul %57, %187, %cst_116 {dimension_numbers = #tpu.dot_dimension_numbers<[1], [0], [0], [1], [0, 0, 1, 1], [], []>} : vector<5x32xf32>, vector<32x8xf32>, vector<5x8xf32> -> vector<5x8xf32>
    %c11_117 = arith.constant 11 : index
    %c0_118 = arith.constant 0 : index
    %c0_119 = arith.constant 0 : index
    %189 = vector.load %arg7[%c11_117, %c0_118, %c0_119] : memref<24x1x8xf32, #tpu.memory_space<vmem>>, vector<1x1x8xf32>
    %190 = vector.shape_cast %189 : vector<1x1x8xf32> to vector<1x8xf32>
    %191 = vector.broadcast %190 : vector<1x8xf32> to vector<5x8xf32>
    %192 = arith.addf %188, %191 : vector<5x8xf32>
    %cst_120 = arith.constant dense<0.000000e+00> : vector<5x5xf32>
    %193 = tpu.matmul %178, %185, %cst_120 {dimension_numbers = #tpu.dot_dimension_numbers<[1], [1], [0], [0], [0, 0, 1, 0], [], []>} : vector<5x8xf32>, vector<5x8xf32>, vector<5x5xf32> -> vector<5x5xf32>
    %cst_121 = arith.constant dense<0xFF800000> : vector<5xf32>
    %194 = vector.multi_reduction <maximumf>, %193, %cst_121 [1] : vector<5x5xf32> to vector<5xf32>
    %195 = vector.shape_cast %194 : vector<5xf32> to vector<5x1xf32>
    %196 = vector.broadcast %195 : vector<5x1xf32> to vector<5x5xf32>
    %197 = arith.subf %193, %196 : vector<5x5xf32>
    %198 = math.exp %197 : vector<5x5xf32>
    %cst_122 = arith.constant dense<0.000000e+00> : vector<5xf32>
    %199 = vector.multi_reduction <add>, %198, %cst_122 [1] : vector<5x5xf32> to vector<5xf32>
    %200 = vector.shape_cast %199 : vector<5xf32> to vector<5x1xf32>
    %201 = tpu.reciprocal %200 {approx = true} : vector<5x1xf32> -> vector<5x1xf32>
    %202 = vector.broadcast %201 : vector<5x1xf32> to vector<5x5xf32>
    %203 = arith.mulf %198, %202 : vector<5x5xf32>
    %cst_123 = arith.constant dense<0.000000e+00> : vector<5x8xf32>
    %204 = tpu.matmul %203, %192, %cst_123 {dimension_numbers = #tpu.dot_dimension_numbers<[1], [0], [0], [1], [0, 0, 1, 1], [], []>} : vector<5x5xf32>, vector<5x8xf32>, vector<5x8xf32> -> vector<5x8xf32>
    %c3_124 = arith.constant 3 : index
    %c0_125 = arith.constant 0 : index
    %c0_126 = arith.constant 0 : index
    %205 = vector.load %arg9[%c3_124, %c0_125, %c0_126] : memref<8x8x32xf32, #tpu.memory_space<vmem>>, vector<1x8x32xf32>
    %206 = vector.shape_cast %205 : vector<1x8x32xf32> to vector<8x32xf32>
    %cst_127 = arith.constant dense<0.000000e+00> : vector<5x32xf32>
    %207 = tpu.matmul %204, %206, %cst_127 {dimension_numbers = #tpu.dot_dimension_numbers<[1], [0], [0], [1], [0, 0, 1, 1], [], []>} : vector<5x8xf32>, vector<8x32xf32>, vector<5x32xf32> -> vector<5x32xf32>
    %208 = arith.addf %171, %207 : vector<5x32xf32>
    %209 = vector.extract_strided_slice %33 {offsets = [2, 0], sizes = [1, 32], strides = [1, 1]} : vector<6x32xf32> to vector<1x32xf32>
    %210 = vector.extract_strided_slice %33 {offsets = [3, 0], sizes = [1, 32], strides = [1, 1]} : vector<6x32xf32> to vector<1x32xf32>
    %cst_128 = arith.constant dense<0.000000e+00> : vector<5xf32>
    %211 = vector.multi_reduction <add>, %208, %cst_128 [1] : vector<5x32xf32> to vector<5xf32>
    %212 = vector.shape_cast %211 : vector<5xf32> to vector<5x1xf32>
    %cst_129 = arith.constant 3.200000e+01 : f32
    %213 = vector.broadcast %cst_129 : f32 to vector<5x1xf32>
    %214 = arith.divf %212, %213 : vector<5x1xf32>
    %215 = vector.broadcast %214 : vector<5x1xf32> to vector<5x32xf32>
    %216 = arith.subf %208, %215 : vector<5x32xf32>
    %217 = arith.mulf %216, %216 : vector<5x32xf32>
    %cst_130 = arith.constant dense<0.000000e+00> : vector<5xf32>
    %218 = vector.multi_reduction <add>, %217, %cst_130 [1] : vector<5x32xf32> to vector<5xf32>
    %219 = vector.shape_cast %218 : vector<5xf32> to vector<5x1xf32>
    %cst_131 = arith.constant 3.200000e+01 : f32
    %220 = vector.broadcast %cst_131 : f32 to vector<5x1xf32>
    %221 = arith.divf %219, %220 : vector<5x1xf32>
    %222 = vector.broadcast %214 : vector<5x1xf32> to vector<5x32xf32>
    %223 = arith.subf %208, %222 : vector<5x32xf32>
    %cst_132 = arith.constant 9.99999974E-6 : f32
    %224 = vector.broadcast %cst_132 : f32 to vector<5x1xf32>
    %225 = arith.addf %221, %224 : vector<5x1xf32>
    %226 = math.rsqrt %225 : vector<5x1xf32>
    %227 = vector.broadcast %226 : vector<5x1xf32> to vector<5x32xf32>
    %228 = arith.mulf %223, %227 : vector<5x32xf32>
    %229 = vector.broadcast %209 : vector<1x32xf32> to vector<5x32xf32>
    %230 = arith.mulf %228, %229 : vector<5x32xf32>
    %231 = vector.broadcast %210 : vector<1x32xf32> to vector<5x32xf32>
    %232 = arith.addf %230, %231 : vector<5x32xf32>
    %c0_133 = arith.constant 0 : index
    %c0_134 = arith.constant 0 : index
    %c0_135 = arith.constant 0 : index
    %233 = vector.load %arg10[%c0_133, %c0_134, %c0_135] : memref<2x32x64xf32, #tpu.memory_space<vmem>>, vector<1x32x64xf32>
    %234 = vector.shape_cast %233 : vector<1x32x64xf32> to vector<32x64xf32>
    %cst_136 = arith.constant dense<0.000000e+00> : vector<5x64xf32>
    %235 = tpu.matmul %232, %234, %cst_136 {dimension_numbers = #tpu.dot_dimension_numbers<[1], [0], [0], [1], [0, 0, 1, 1], [], []>} : vector<5x32xf32>, vector<32x64xf32>, vector<5x64xf32> -> vector<5x64xf32>
    %c0_137 = arith.constant 0 : index
    %c0_138 = arith.constant 0 : index
    %c0_139 = arith.constant 0 : index
    %236 = vector.load %arg6[%c0_137, %c0_138, %c0_139] : memref<2x1x64xf32, #tpu.memory_space<vmem>>, vector<1x1x64xf32>
    %237 = vector.shape_cast %236 : vector<1x1x64xf32> to vector<1x64xf32>
    %238 = vector.broadcast %237 : vector<1x64xf32> to vector<5x64xf32>
    %239 = arith.addf %235, %238 : vector<5x64xf32>
    %cst_140 = arith.constant 1.702000e+00 : f32
    %240 = vector.broadcast %cst_140 : f32 to vector<5x64xf32>
    %241 = arith.mulf %240, %239 : vector<5x64xf32>
    %242 = arith.negf %241 : vector<5x64xf32>
    %243 = math.exp %242 : vector<5x64xf32>
    %cst_141 = arith.constant 1.000000e+00 : f32
    %244 = vector.broadcast %cst_141 : f32 to vector<5x64xf32>
    %245 = arith.addf %244, %243 : vector<5x64xf32>
    %246 = arith.divf %244, %245 : vector<5x64xf32>
    %247 = arith.mulf %239, %246 : vector<5x64xf32>
    %c0_142 = arith.constant 0 : index
    %c0_143 = arith.constant 0 : index
    %c0_144 = arith.constant 0 : index
    %248 = vector.load %arg11[%c0_142, %c0_143, %c0_144] : memref<2x64x32xf32, #tpu.memory_space<vmem>>, vector<1x64x32xf32>
    %249 = vector.shape_cast %248 : vector<1x64x32xf32> to vector<64x32xf32>
    %cst_145 = arith.constant dense<0.000000e+00> : vector<5x32xf32>
    %250 = tpu.matmul %247, %249, %cst_145 {dimension_numbers = #tpu.dot_dimension_numbers<[1], [0], [0], [1], [0, 0, 1, 1], [], []>} : vector<5x64xf32>, vector<64x32xf32>, vector<5x32xf32> -> vector<5x32xf32>
    %251 = vector.extract_strided_slice %33 {offsets = [5, 0], sizes = [1, 32], strides = [1, 1]} : vector<6x32xf32> to vector<1x32xf32>
    %252 = vector.broadcast %251 : vector<1x32xf32> to vector<5x32xf32>
    %253 = arith.addf %250, %252 : vector<5x32xf32>
    %254 = arith.addf %253, %208 : vector<5x32xf32>
    %c1_146 = arith.constant 1 : index
    %c0_147 = arith.constant 0 : index
    %c0_148 = arith.constant 0 : index
    %255 = vector.load %arg5[%c1_146, %c0_147, %c0_148] : memref<2x6x32xf32, #tpu.memory_space<vmem>>, vector<1x6x32xf32>
    %256 = vector.shape_cast %255 : vector<1x6x32xf32> to vector<6x32xf32>
    %257 = vector.extract_strided_slice %256 {offsets = [0, 0], sizes = [1, 32], strides = [1, 1]} : vector<6x32xf32> to vector<1x32xf32>
    %258 = vector.extract_strided_slice %256 {offsets = [1, 0], sizes = [1, 32], strides = [1, 1]} : vector<6x32xf32> to vector<1x32xf32>
    %cst_149 = arith.constant dense<0.000000e+00> : vector<5xf32>
    %259 = vector.multi_reduction <add>, %254, %cst_149 [1] : vector<5x32xf32> to vector<5xf32>
    %260 = vector.shape_cast %259 : vector<5xf32> to vector<5x1xf32>
    %cst_150 = arith.constant 3.200000e+01 : f32
    %261 = vector.broadcast %cst_150 : f32 to vector<5x1xf32>
    %262 = arith.divf %260, %261 : vector<5x1xf32>
    %263 = vector.broadcast %262 : vector<5x1xf32> to vector<5x32xf32>
    %264 = arith.subf %254, %263 : vector<5x32xf32>
    %265 = arith.mulf %264, %264 : vector<5x32xf32>
    %cst_151 = arith.constant dense<0.000000e+00> : vector<5xf32>
    %266 = vector.multi_reduction <add>, %265, %cst_151 [1] : vector<5x32xf32> to vector<5xf32>
    %267 = vector.shape_cast %266 : vector<5xf32> to vector<5x1xf32>
    %cst_152 = arith.constant 3.200000e+01 : f32
    %268 = vector.broadcast %cst_152 : f32 to vector<5x1xf32>
    %269 = arith.divf %267, %268 : vector<5x1xf32>
    %270 = vector.broadcast %262 : vector<5x1xf32> to vector<5x32xf32>
    %271 = arith.subf %254, %270 : vector<5x32xf32>
    %cst_153 = arith.constant 9.99999974E-6 : f32
    %272 = vector.broadcast %cst_153 : f32 to vector<5x1xf32>
    %273 = arith.addf %269, %272 : vector<5x1xf32>
    %274 = math.rsqrt %273 : vector<5x1xf32>
    %275 = vector.broadcast %274 : vector<5x1xf32> to vector<5x32xf32>
    %276 = arith.mulf %271, %275 : vector<5x32xf32>
    %277 = vector.broadcast %257 : vector<1x32xf32> to vector<5x32xf32>
    %278 = arith.mulf %276, %277 : vector<5x32xf32>
    %279 = vector.broadcast %258 : vector<1x32xf32> to vector<5x32xf32>
    %280 = arith.addf %278, %279 : vector<5x32xf32>
    %281 = vector.extract_strided_slice %256 {offsets = [4, 0], sizes = [1, 32], strides = [1, 1]} : vector<6x32xf32> to vector<1x32xf32>
    %282 = vector.broadcast %281 : vector<1x32xf32> to vector<5x32xf32>
    %283 = arith.addf %282, %254 : vector<5x32xf32>
    %c12 = arith.constant 12 : index
    %c0_154 = arith.constant 0 : index
    %c0_155 = arith.constant 0 : index
    %284 = vector.load %arg8[%c12, %c0_154, %c0_155] : memref<24x32x8xf32, #tpu.memory_space<vmem>>, vector<1x32x8xf32>
    %285 = vector.shape_cast %284 : vector<1x32x8xf32> to vector<32x8xf32>
    %cst_156 = arith.constant dense<0.000000e+00> : vector<5x8xf32>
    %286 = tpu.matmul %280, %285, %cst_156 {dimension_numbers = #tpu.dot_dimension_numbers<[1], [0], [0], [1], [0, 0, 1, 1], [], []>} : vector<5x32xf32>, vector<32x8xf32>, vector<5x8xf32> -> vector<5x8xf32>
    %c12_157 = arith.constant 12 : index
    %c0_158 = arith.constant 0 : index
    %c0_159 = arith.constant 0 : index
    %287 = vector.load %arg7[%c12_157, %c0_158, %c0_159] : memref<24x1x8xf32, #tpu.memory_space<vmem>>, vector<1x1x8xf32>
    %288 = vector.shape_cast %287 : vector<1x1x8xf32> to vector<1x8xf32>
    %289 = vector.broadcast %288 : vector<1x8xf32> to vector<5x8xf32>
    %290 = arith.addf %286, %289 : vector<5x8xf32>
    %c16 = arith.constant 16 : index
    %c0_160 = arith.constant 0 : index
    %c0_161 = arith.constant 0 : index
    %291 = vector.load %arg8[%c16, %c0_160, %c0_161] : memref<24x32x8xf32, #tpu.memory_space<vmem>>, vector<1x32x8xf32>
    %292 = vector.shape_cast %291 : vector<1x32x8xf32> to vector<32x8xf32>
    %cst_162 = arith.constant dense<0.000000e+00> : vector<5x8xf32>
    %293 = tpu.matmul %280, %292, %cst_162 {dimension_numbers = #tpu.dot_dimension_numbers<[1], [0], [0], [1], [0, 0, 1, 1], [], []>} : vector<5x32xf32>, vector<32x8xf32>, vector<5x8xf32> -> vector<5x8xf32>
    %c16_163 = arith.constant 16 : index
    %c0_164 = arith.constant 0 : index
    %c0_165 = arith.constant 0 : index
    %294 = vector.load %arg7[%c16_163, %c0_164, %c0_165] : memref<24x1x8xf32, #tpu.memory_space<vmem>>, vector<1x1x8xf32>
    %295 = vector.shape_cast %294 : vector<1x1x8xf32> to vector<1x8xf32>
    %296 = vector.broadcast %295 : vector<1x8xf32> to vector<5x8xf32>
    %297 = arith.addf %293, %296 : vector<5x8xf32>
    %c20 = arith.constant 20 : index
    %c0_166 = arith.constant 0 : index
    %c0_167 = arith.constant 0 : index
    %298 = vector.load %arg8[%c20, %c0_166, %c0_167] : memref<24x32x8xf32, #tpu.memory_space<vmem>>, vector<1x32x8xf32>
    %299 = vector.shape_cast %298 : vector<1x32x8xf32> to vector<32x8xf32>
    %cst_168 = arith.constant dense<0.000000e+00> : vector<5x8xf32>
    %300 = tpu.matmul %280, %299, %cst_168 {dimension_numbers = #tpu.dot_dimension_numbers<[1], [0], [0], [1], [0, 0, 1, 1], [], []>} : vector<5x32xf32>, vector<32x8xf32>, vector<5x8xf32> -> vector<5x8xf32>
    %c20_169 = arith.constant 20 : index
    %c0_170 = arith.constant 0 : index
    %c0_171 = arith.constant 0 : index
    %301 = vector.load %arg7[%c20_169, %c0_170, %c0_171] : memref<24x1x8xf32, #tpu.memory_space<vmem>>, vector<1x1x8xf32>
    %302 = vector.shape_cast %301 : vector<1x1x8xf32> to vector<1x8xf32>
    %303 = vector.broadcast %302 : vector<1x8xf32> to vector<5x8xf32>
    %304 = arith.addf %300, %303 : vector<5x8xf32>
    %cst_172 = arith.constant dense<0.000000e+00> : vector<5x5xf32>
    %305 = tpu.matmul %290, %297, %cst_172 {dimension_numbers = #tpu.dot_dimension_numbers<[1], [1], [0], [0], [0, 0, 1, 0], [], []>} : vector<5x8xf32>, vector<5x8xf32>, vector<5x5xf32> -> vector<5x5xf32>
    %cst_173 = arith.constant dense<0xFF800000> : vector<5xf32>
    %306 = vector.multi_reduction <maximumf>, %305, %cst_173 [1] : vector<5x5xf32> to vector<5xf32>
    %307 = vector.shape_cast %306 : vector<5xf32> to vector<5x1xf32>
    %308 = vector.broadcast %307 : vector<5x1xf32> to vector<5x5xf32>
    %309 = arith.subf %305, %308 : vector<5x5xf32>
    %310 = math.exp %309 : vector<5x5xf32>
    %cst_174 = arith.constant dense<0.000000e+00> : vector<5xf32>
    %311 = vector.multi_reduction <add>, %310, %cst_174 [1] : vector<5x5xf32> to vector<5xf32>
    %312 = vector.shape_cast %311 : vector<5xf32> to vector<5x1xf32>
    %313 = tpu.reciprocal %312 {approx = true} : vector<5x1xf32> -> vector<5x1xf32>
    %314 = vector.broadcast %313 : vector<5x1xf32> to vector<5x5xf32>
    %315 = arith.mulf %310, %314 : vector<5x5xf32>
    %cst_175 = arith.constant dense<0.000000e+00> : vector<5x8xf32>
    %316 = tpu.matmul %315, %304, %cst_175 {dimension_numbers = #tpu.dot_dimension_numbers<[1], [0], [0], [1], [0, 0, 1, 1], [], []>} : vector<5x5xf32>, vector<5x8xf32>, vector<5x8xf32> -> vector<5x8xf32>
    %c4_176 = arith.constant 4 : index
    %c0_177 = arith.constant 0 : index
    %c0_178 = arith.constant 0 : index
    %317 = vector.load %arg9[%c4_176, %c0_177, %c0_178] : memref<8x8x32xf32, #tpu.memory_space<vmem>>, vector<1x8x32xf32>
    %318 = vector.shape_cast %317 : vector<1x8x32xf32> to vector<8x32xf32>
    %cst_179 = arith.constant dense<0.000000e+00> : vector<5x32xf32>
    %319 = tpu.matmul %316, %318, %cst_179 {dimension_numbers = #tpu.dot_dimension_numbers<[1], [0], [0], [1], [0, 0, 1, 1], [], []>} : vector<5x8xf32>, vector<8x32xf32>, vector<5x32xf32> -> vector<5x32xf32>
    %320 = arith.addf %283, %319 : vector<5x32xf32>
    %c13 = arith.constant 13 : index
    %c0_180 = arith.constant 0 : index
    %c0_181 = arith.constant 0 : index
    %321 = vector.load %arg8[%c13, %c0_180, %c0_181] : memref<24x32x8xf32, #tpu.memory_space<vmem>>, vector<1x32x8xf32>
    %322 = vector.shape_cast %321 : vector<1x32x8xf32> to vector<32x8xf32>
    %cst_182 = arith.constant dense<0.000000e+00> : vector<5x8xf32>
    %323 = tpu.matmul %280, %322, %cst_182 {dimension_numbers = #tpu.dot_dimension_numbers<[1], [0], [0], [1], [0, 0, 1, 1], [], []>} : vector<5x32xf32>, vector<32x8xf32>, vector<5x8xf32> -> vector<5x8xf32>
    %c13_183 = arith.constant 13 : index
    %c0_184 = arith.constant 0 : index
    %c0_185 = arith.constant 0 : index
    %324 = vector.load %arg7[%c13_183, %c0_184, %c0_185] : memref<24x1x8xf32, #tpu.memory_space<vmem>>, vector<1x1x8xf32>
    %325 = vector.shape_cast %324 : vector<1x1x8xf32> to vector<1x8xf32>
    %326 = vector.broadcast %325 : vector<1x8xf32> to vector<5x8xf32>
    %327 = arith.addf %323, %326 : vector<5x8xf32>
    %c17 = arith.constant 17 : index
    %c0_186 = arith.constant 0 : index
    %c0_187 = arith.constant 0 : index
    %328 = vector.load %arg8[%c17, %c0_186, %c0_187] : memref<24x32x8xf32, #tpu.memory_space<vmem>>, vector<1x32x8xf32>
    %329 = vector.shape_cast %328 : vector<1x32x8xf32> to vector<32x8xf32>
    %cst_188 = arith.constant dense<0.000000e+00> : vector<5x8xf32>
    %330 = tpu.matmul %280, %329, %cst_188 {dimension_numbers = #tpu.dot_dimension_numbers<[1], [0], [0], [1], [0, 0, 1, 1], [], []>} : vector<5x32xf32>, vector<32x8xf32>, vector<5x8xf32> -> vector<5x8xf32>
    %c17_189 = arith.constant 17 : index
    %c0_190 = arith.constant 0 : index
    %c0_191 = arith.constant 0 : index
    %331 = vector.load %arg7[%c17_189, %c0_190, %c0_191] : memref<24x1x8xf32, #tpu.memory_space<vmem>>, vector<1x1x8xf32>
    %332 = vector.shape_cast %331 : vector<1x1x8xf32> to vector<1x8xf32>
    %333 = vector.broadcast %332 : vector<1x8xf32> to vector<5x8xf32>
    %334 = arith.addf %330, %333 : vector<5x8xf32>
    %c21 = arith.constant 21 : index
    %c0_192 = arith.constant 0 : index
    %c0_193 = arith.constant 0 : index
    %335 = vector.load %arg8[%c21, %c0_192, %c0_193] : memref<24x32x8xf32, #tpu.memory_space<vmem>>, vector<1x32x8xf32>
    %336 = vector.shape_cast %335 : vector<1x32x8xf32> to vector<32x8xf32>
    %cst_194 = arith.constant dense<0.000000e+00> : vector<5x8xf32>
    %337 = tpu.matmul %280, %336, %cst_194 {dimension_numbers = #tpu.dot_dimension_numbers<[1], [0], [0], [1], [0, 0, 1, 1], [], []>} : vector<5x32xf32>, vector<32x8xf32>, vector<5x8xf32> -> vector<5x8xf32>
    %c21_195 = arith.constant 21 : index
    %c0_196 = arith.constant 0 : index
    %c0_197 = arith.constant 0 : index
    %338 = vector.load %arg7[%c21_195, %c0_196, %c0_197] : memref<24x1x8xf32, #tpu.memory_space<vmem>>, vector<1x1x8xf32>
    %339 = vector.shape_cast %338 : vector<1x1x8xf32> to vector<1x8xf32>
    %340 = vector.broadcast %339 : vector<1x8xf32> to vector<5x8xf32>
    %341 = arith.addf %337, %340 : vector<5x8xf32>
    %cst_198 = arith.constant dense<0.000000e+00> : vector<5x5xf32>
    %342 = tpu.matmul %327, %334, %cst_198 {dimension_numbers = #tpu.dot_dimension_numbers<[1], [1], [0], [0], [0, 0, 1, 0], [], []>} : vector<5x8xf32>, vector<5x8xf32>, vector<5x5xf32> -> vector<5x5xf32>
    %cst_199 = arith.constant dense<0xFF800000> : vector<5xf32>
    %343 = vector.multi_reduction <maximumf>, %342, %cst_199 [1] : vector<5x5xf32> to vector<5xf32>
    %344 = vector.shape_cast %343 : vector<5xf32> to vector<5x1xf32>
    %345 = vector.broadcast %344 : vector<5x1xf32> to vector<5x5xf32>
    %346 = arith.subf %342, %345 : vector<5x5xf32>
    %347 = math.exp %346 : vector<5x5xf32>
    %cst_200 = arith.constant dense<0.000000e+00> : vector<5xf32>
    %348 = vector.multi_reduction <add>, %347, %cst_200 [1] : vector<5x5xf32> to vector<5xf32>
    %349 = vector.shape_cast %348 : vector<5xf32> to vector<5x1xf32>
    %350 = tpu.reciprocal %349 {approx = true} : vector<5x1xf32> -> vector<5x1xf32>
    %351 = vector.broadcast %350 : vector<5x1xf32> to vector<5x5xf32>
    %352 = arith.mulf %347, %351 : vector<5x5xf32>
    %cst_201 = arith.constant dense<0.000000e+00> : vector<5x8xf32>
    %353 = tpu.matmul %352, %341, %cst_201 {dimension_numbers = #tpu.dot_dimension_numbers<[1], [0], [0], [1], [0, 0, 1, 1], [], []>} : vector<5x5xf32>, vector<5x8xf32>, vector<5x8xf32> -> vector<5x8xf32>
    %c5_202 = arith.constant 5 : index
    %c0_203 = arith.constant 0 : index
    %c0_204 = arith.constant 0 : index
    %354 = vector.load %arg9[%c5_202, %c0_203, %c0_204] : memref<8x8x32xf32, #tpu.memory_space<vmem>>, vector<1x8x32xf32>
    %355 = vector.shape_cast %354 : vector<1x8x32xf32> to vector<8x32xf32>
    %cst_205 = arith.constant dense<0.000000e+00> : vector<5x32xf32>
    %356 = tpu.matmul %353, %355, %cst_205 {dimension_numbers = #tpu.dot_dimension_numbers<[1], [0], [0], [1], [0, 0, 1, 1], [], []>} : vector<5x8xf32>, vector<8x32xf32>, vector<5x32xf32> -> vector<5x32xf32>
    %357 = arith.addf %320, %356 : vector<5x32xf32>
    %c14 = arith.constant 14 : index
    %c0_206 = arith.constant 0 : index
    %c0_207 = arith.constant 0 : index
    %358 = vector.load %arg8[%c14, %c0_206, %c0_207] : memref<24x32x8xf32, #tpu.memory_space<vmem>>, vector<1x32x8xf32>
    %359 = vector.shape_cast %358 : vector<1x32x8xf32> to vector<32x8xf32>
    %cst_208 = arith.constant dense<0.000000e+00> : vector<5x8xf32>
    %360 = tpu.matmul %280, %359, %cst_208 {dimension_numbers = #tpu.dot_dimension_numbers<[1], [0], [0], [1], [0, 0, 1, 1], [], []>} : vector<5x32xf32>, vector<32x8xf32>, vector<5x8xf32> -> vector<5x8xf32>
    %c14_209 = arith.constant 14 : index
    %c0_210 = arith.constant 0 : index
    %c0_211 = arith.constant 0 : index
    %361 = vector.load %arg7[%c14_209, %c0_210, %c0_211] : memref<24x1x8xf32, #tpu.memory_space<vmem>>, vector<1x1x8xf32>
    %362 = vector.shape_cast %361 : vector<1x1x8xf32> to vector<1x8xf32>
    %363 = vector.broadcast %362 : vector<1x8xf32> to vector<5x8xf32>
    %364 = arith.addf %360, %363 : vector<5x8xf32>
    %c18 = arith.constant 18 : index
    %c0_212 = arith.constant 0 : index
    %c0_213 = arith.constant 0 : index
    %365 = vector.load %arg8[%c18, %c0_212, %c0_213] : memref<24x32x8xf32, #tpu.memory_space<vmem>>, vector<1x32x8xf32>
    %366 = vector.shape_cast %365 : vector<1x32x8xf32> to vector<32x8xf32>
    %cst_214 = arith.constant dense<0.000000e+00> : vector<5x8xf32>
    %367 = tpu.matmul %280, %366, %cst_214 {dimension_numbers = #tpu.dot_dimension_numbers<[1], [0], [0], [1], [0, 0, 1, 1], [], []>} : vector<5x32xf32>, vector<32x8xf32>, vector<5x8xf32> -> vector<5x8xf32>
    %c18_215 = arith.constant 18 : index
    %c0_216 = arith.constant 0 : index
    %c0_217 = arith.constant 0 : index
    %368 = vector.load %arg7[%c18_215, %c0_216, %c0_217] : memref<24x1x8xf32, #tpu.memory_space<vmem>>, vector<1x1x8xf32>
    %369 = vector.shape_cast %368 : vector<1x1x8xf32> to vector<1x8xf32>
    %370 = vector.broadcast %369 : vector<1x8xf32> to vector<5x8xf32>
    %371 = arith.addf %367, %370 : vector<5x8xf32>
    %c22 = arith.constant 22 : index
    %c0_218 = arith.constant 0 : index
    %c0_219 = arith.constant 0 : index
    %372 = vector.load %arg8[%c22, %c0_218, %c0_219] : memref<24x32x8xf32, #tpu.memory_space<vmem>>, vector<1x32x8xf32>
    %373 = vector.shape_cast %372 : vector<1x32x8xf32> to vector<32x8xf32>
    %cst_220 = arith.constant dense<0.000000e+00> : vector<5x8xf32>
    %374 = tpu.matmul %280, %373, %cst_220 {dimension_numbers = #tpu.dot_dimension_numbers<[1], [0], [0], [1], [0, 0, 1, 1], [], []>} : vector<5x32xf32>, vector<32x8xf32>, vector<5x8xf32> -> vector<5x8xf32>
    %c22_221 = arith.constant 22 : index
    %c0_222 = arith.constant 0 : index
    %c0_223 = arith.constant 0 : index
    %375 = vector.load %arg7[%c22_221, %c0_222, %c0_223] : memref<24x1x8xf32, #tpu.memory_space<vmem>>, vector<1x1x8xf32>
    %376 = vector.shape_cast %375 : vector<1x1x8xf32> to vector<1x8xf32>
    %377 = vector.broadcast %376 : vector<1x8xf32> to vector<5x8xf32>
    %378 = arith.addf %374, %377 : vector<5x8xf32>
    %cst_224 = arith.constant dense<0.000000e+00> : vector<5x5xf32>
    %379 = tpu.matmul %364, %371, %cst_224 {dimension_numbers = #tpu.dot_dimension_numbers<[1], [1], [0], [0], [0, 0, 1, 0], [], []>} : vector<5x8xf32>, vector<5x8xf32>, vector<5x5xf32> -> vector<5x5xf32>
    %cst_225 = arith.constant dense<0xFF800000> : vector<5xf32>
    %380 = vector.multi_reduction <maximumf>, %379, %cst_225 [1] : vector<5x5xf32> to vector<5xf32>
    %381 = vector.shape_cast %380 : vector<5xf32> to vector<5x1xf32>
    %382 = vector.broadcast %381 : vector<5x1xf32> to vector<5x5xf32>
    %383 = arith.subf %379, %382 : vector<5x5xf32>
    %384 = math.exp %383 : vector<5x5xf32>
    %cst_226 = arith.constant dense<0.000000e+00> : vector<5xf32>
    %385 = vector.multi_reduction <add>, %384, %cst_226 [1] : vector<5x5xf32> to vector<5xf32>
    %386 = vector.shape_cast %385 : vector<5xf32> to vector<5x1xf32>
    %387 = tpu.reciprocal %386 {approx = true} : vector<5x1xf32> -> vector<5x1xf32>
    %388 = vector.broadcast %387 : vector<5x1xf32> to vector<5x5xf32>
    %389 = arith.mulf %384, %388 : vector<5x5xf32>
    %cst_227 = arith.constant dense<0.000000e+00> : vector<5x8xf32>
    %390 = tpu.matmul %389, %378, %cst_227 {dimension_numbers = #tpu.dot_dimension_numbers<[1], [0], [0], [1], [0, 0, 1, 1], [], []>} : vector<5x5xf32>, vector<5x8xf32>, vector<5x8xf32> -> vector<5x8xf32>
    %c6_228 = arith.constant 6 : index
    %c0_229 = arith.constant 0 : index
    %c0_230 = arith.constant 0 : index
    %391 = vector.load %arg9[%c6_228, %c0_229, %c0_230] : memref<8x8x32xf32, #tpu.memory_space<vmem>>, vector<1x8x32xf32>
    %392 = vector.shape_cast %391 : vector<1x8x32xf32> to vector<8x32xf32>
    %cst_231 = arith.constant dense<0.000000e+00> : vector<5x32xf32>
    %393 = tpu.matmul %390, %392, %cst_231 {dimension_numbers = #tpu.dot_dimension_numbers<[1], [0], [0], [1], [0, 0, 1, 1], [], []>} : vector<5x8xf32>, vector<8x32xf32>, vector<5x32xf32> -> vector<5x32xf32>
    %394 = arith.addf %357, %393 : vector<5x32xf32>
    %c15 = arith.constant 15 : index
    %c0_232 = arith.constant 0 : index
    %c0_233 = arith.constant 0 : index
    %395 = vector.load %arg8[%c15, %c0_232, %c0_233] : memref<24x32x8xf32, #tpu.memory_space<vmem>>, vector<1x32x8xf32>
    %396 = vector.shape_cast %395 : vector<1x32x8xf32> to vector<32x8xf32>
    %cst_234 = arith.constant dense<0.000000e+00> : vector<5x8xf32>
    %397 = tpu.matmul %280, %396, %cst_234 {dimension_numbers = #tpu.dot_dimension_numbers<[1], [0], [0], [1], [0, 0, 1, 1], [], []>} : vector<5x32xf32>, vector<32x8xf32>, vector<5x8xf32> -> vector<5x8xf32>
    %c15_235 = arith.constant 15 : index
    %c0_236 = arith.constant 0 : index
    %c0_237 = arith.constant 0 : index
    %398 = vector.load %arg7[%c15_235, %c0_236, %c0_237] : memref<24x1x8xf32, #tpu.memory_space<vmem>>, vector<1x1x8xf32>
    %399 = vector.shape_cast %398 : vector<1x1x8xf32> to vector<1x8xf32>
    %400 = vector.broadcast %399 : vector<1x8xf32> to vector<5x8xf32>
    %401 = arith.addf %397, %400 : vector<5x8xf32>
    %c19 = arith.constant 19 : index
    %c0_238 = arith.constant 0 : index
    %c0_239 = arith.constant 0 : index
    %402 = vector.load %arg8[%c19, %c0_238, %c0_239] : memref<24x32x8xf32, #tpu.memory_space<vmem>>, vector<1x32x8xf32>
    %403 = vector.shape_cast %402 : vector<1x32x8xf32> to vector<32x8xf32>
    %cst_240 = arith.constant dense<0.000000e+00> : vector<5x8xf32>
    %404 = tpu.matmul %280, %403, %cst_240 {dimension_numbers = #tpu.dot_dimension_numbers<[1], [0], [0], [1], [0, 0, 1, 1], [], []>} : vector<5x32xf32>, vector<32x8xf32>, vector<5x8xf32> -> vector<5x8xf32>
    %c19_241 = arith.constant 19 : index
    %c0_242 = arith.constant 0 : index
    %c0_243 = arith.constant 0 : index
    %405 = vector.load %arg7[%c19_241, %c0_242, %c0_243] : memref<24x1x8xf32, #tpu.memory_space<vmem>>, vector<1x1x8xf32>
    %406 = vector.shape_cast %405 : vector<1x1x8xf32> to vector<1x8xf32>
    %407 = vector.broadcast %406 : vector<1x8xf32> to vector<5x8xf32>
    %408 = arith.addf %404, %407 : vector<5x8xf32>
    %c23 = arith.constant 23 : index
    %c0_244 = arith.constant 0 : index
    %c0_245 = arith.constant 0 : index
    %409 = vector.load %arg8[%c23, %c0_244, %c0_245] : memref<24x32x8xf32, #tpu.memory_space<vmem>>, vector<1x32x8xf32>
    %410 = vector.shape_cast %409 : vector<1x32x8xf32> to vector<32x8xf32>
    %cst_246 = arith.constant dense<0.000000e+00> : vector<5x8xf32>
    %411 = tpu.matmul %280, %410, %cst_246 {dimension_numbers = #tpu.dot_dimension_numbers<[1], [0], [0], [1], [0, 0, 1, 1], [], []>} : vector<5x32xf32>, vector<32x8xf32>, vector<5x8xf32> -> vector<5x8xf32>
    %c23_247 = arith.constant 23 : index
    %c0_248 = arith.constant 0 : index
    %c0_249 = arith.constant 0 : index
    %412 = vector.load %arg7[%c23_247, %c0_248, %c0_249] : memref<24x1x8xf32, #tpu.memory_space<vmem>>, vector<1x1x8xf32>
    %413 = vector.shape_cast %412 : vector<1x1x8xf32> to vector<1x8xf32>
    %414 = vector.broadcast %413 : vector<1x8xf32> to vector<5x8xf32>
    %415 = arith.addf %411, %414 : vector<5x8xf32>
    %cst_250 = arith.constant dense<0.000000e+00> : vector<5x5xf32>
    %416 = tpu.matmul %401, %408, %cst_250 {dimension_numbers = #tpu.dot_dimension_numbers<[1], [1], [0], [0], [0, 0, 1, 0], [], []>} : vector<5x8xf32>, vector<5x8xf32>, vector<5x5xf32> -> vector<5x5xf32>
    %cst_251 = arith.constant dense<0xFF800000> : vector<5xf32>
    %417 = vector.multi_reduction <maximumf>, %416, %cst_251 [1] : vector<5x5xf32> to vector<5xf32>
    %418 = vector.shape_cast %417 : vector<5xf32> to vector<5x1xf32>
    %419 = vector.broadcast %418 : vector<5x1xf32> to vector<5x5xf32>
    %420 = arith.subf %416, %419 : vector<5x5xf32>
    %421 = math.exp %420 : vector<5x5xf32>
    %cst_252 = arith.constant dense<0.000000e+00> : vector<5xf32>
    %422 = vector.multi_reduction <add>, %421, %cst_252 [1] : vector<5x5xf32> to vector<5xf32>
    %423 = vector.shape_cast %422 : vector<5xf32> to vector<5x1xf32>
    %424 = tpu.reciprocal %423 {approx = true} : vector<5x1xf32> -> vector<5x1xf32>
    %425 = vector.broadcast %424 : vector<5x1xf32> to vector<5x5xf32>
    %426 = arith.mulf %421, %425 : vector<5x5xf32>
    %cst_253 = arith.constant dense<0.000000e+00> : vector<5x8xf32>
    %427 = tpu.matmul %426, %415, %cst_253 {dimension_numbers = #tpu.dot_dimension_numbers<[1], [0], [0], [1], [0, 0, 1, 1], [], []>} : vector<5x5xf32>, vector<5x8xf32>, vector<5x8xf32> -> vector<5x8xf32>
    %c7_254 = arith.constant 7 : index
    %c0_255 = arith.constant 0 : index
    %c0_256 = arith.constant 0 : index
    %428 = vector.load %arg9[%c7_254, %c0_255, %c0_256] : memref<8x8x32xf32, #tpu.memory_space<vmem>>, vector<1x8x32xf32>
    %429 = vector.shape_cast %428 : vector<1x8x32xf32> to vector<8x32xf32>
    %cst_257 = arith.constant dense<0.000000e+00> : vector<5x32xf32>
    %430 = tpu.matmul %427, %429, %cst_257 {dimension_numbers = #tpu.dot_dimension_numbers<[1], [0], [0], [1], [0, 0, 1, 1], [], []>} : vector<5x8xf32>, vector<8x32xf32>, vector<5x32xf32> -> vector<5x32xf32>
    %431 = arith.addf %394, %430 : vector<5x32xf32>
    %432 = vector.extract_strided_slice %256 {offsets = [2, 0], sizes = [1, 32], strides = [1, 1]} : vector<6x32xf32> to vector<1x32xf32>
    %433 = vector.extract_strided_slice %256 {offsets = [3, 0], sizes = [1, 32], strides = [1, 1]} : vector<6x32xf32> to vector<1x32xf32>
    %cst_258 = arith.constant dense<0.000000e+00> : vector<5xf32>
    %434 = vector.multi_reduction <add>, %431, %cst_258 [1] : vector<5x32xf32> to vector<5xf32>
    %435 = vector.shape_cast %434 : vector<5xf32> to vector<5x1xf32>
    %cst_259 = arith.constant 3.200000e+01 : f32
    %436 = vector.broadcast %cst_259 : f32 to vector<5x1xf32>
    %437 = arith.divf %435, %436 : vector<5x1xf32>
    %438 = vector.broadcast %437 : vector<5x1xf32> to vector<5x32xf32>
    %439 = arith.subf %431, %438 : vector<5x32xf32>
    %440 = arith.mulf %439, %439 : vector<5x32xf32>
    %cst_260 = arith.constant dense<0.000000e+00> : vector<5xf32>
    %441 = vector.multi_reduction <add>, %440, %cst_260 [1] : vector<5x32xf32> to vector<5xf32>
    %442 = vector.shape_cast %441 : vector<5xf32> to vector<5x1xf32>
    %cst_261 = arith.constant 3.200000e+01 : f32
    %443 = vector.broadcast %cst_261 : f32 to vector<5x1xf32>
    %444 = arith.divf %442, %443 : vector<5x1xf32>
    %445 = vector.broadcast %437 : vector<5x1xf32> to vector<5x32xf32>
    %446 = arith.subf %431, %445 : vector<5x32xf32>
    %cst_262 = arith.constant 9.99999974E-6 : f32
    %447 = vector.broadcast %cst_262 : f32 to vector<5x1xf32>
    %448 = arith.addf %444, %447 : vector<5x1xf32>
    %449 = math.rsqrt %448 : vector<5x1xf32>
    %450 = vector.broadcast %449 : vector<5x1xf32> to vector<5x32xf32>
    %451 = arith.mulf %446, %450 : vector<5x32xf32>
    %452 = vector.broadcast %432 : vector<1x32xf32> to vector<5x32xf32>
    %453 = arith.mulf %451, %452 : vector<5x32xf32>
    %454 = vector.broadcast %433 : vector<1x32xf32> to vector<5x32xf32>
    %455 = arith.addf %453, %454 : vector<5x32xf32>
    %c1_263 = arith.constant 1 : index
    %c0_264 = arith.constant 0 : index
    %c0_265 = arith.constant 0 : index
    %456 = vector.load %arg10[%c1_263, %c0_264, %c0_265] : memref<2x32x64xf32, #tpu.memory_space<vmem>>, vector<1x32x64xf32>
    %457 = vector.shape_cast %456 : vector<1x32x64xf32> to vector<32x64xf32>
    %cst_266 = arith.constant dense<0.000000e+00> : vector<5x64xf32>
    %458 = tpu.matmul %455, %457, %cst_266 {dimension_numbers = #tpu.dot_dimension_numbers<[1], [0], [0], [1], [0, 0, 1, 1], [], []>} : vector<5x32xf32>, vector<32x64xf32>, vector<5x64xf32> -> vector<5x64xf32>
    %c1_267 = arith.constant 1 : index
    %c0_268 = arith.constant 0 : index
    %c0_269 = arith.constant 0 : index
    %459 = vector.load %arg6[%c1_267, %c0_268, %c0_269] : memref<2x1x64xf32, #tpu.memory_space<vmem>>, vector<1x1x64xf32>
    %460 = vector.shape_cast %459 : vector<1x1x64xf32> to vector<1x64xf32>
    %461 = vector.broadcast %460 : vector<1x64xf32> to vector<5x64xf32>
    %462 = arith.addf %458, %461 : vector<5x64xf32>
    %cst_270 = arith.constant 1.702000e+00 : f32
    %463 = vector.broadcast %cst_270 : f32 to vector<5x64xf32>
    %464 = arith.mulf %463, %462 : vector<5x64xf32>
    %465 = arith.negf %464 : vector<5x64xf32>
    %466 = math.exp %465 : vector<5x64xf32>
    %cst_271 = arith.constant 1.000000e+00 : f32
    %467 = vector.broadcast %cst_271 : f32 to vector<5x64xf32>
    %468 = arith.addf %467, %466 : vector<5x64xf32>
    %469 = arith.divf %467, %468 : vector<5x64xf32>
    %470 = arith.mulf %462, %469 : vector<5x64xf32>
    %c1_272 = arith.constant 1 : index
    %c0_273 = arith.constant 0 : index
    %c0_274 = arith.constant 0 : index
    %471 = vector.load %arg11[%c1_272, %c0_273, %c0_274] : memref<2x64x32xf32, #tpu.memory_space<vmem>>, vector<1x64x32xf32>
    %472 = vector.shape_cast %471 : vector<1x64x32xf32> to vector<64x32xf32>
    %cst_275 = arith.constant dense<0.000000e+00> : vector<5x32xf32>
    %473 = tpu.matmul %470, %472, %cst_275 {dimension_numbers = #tpu.dot_dimension_numbers<[1], [0], [0], [1], [0, 0, 1, 1], [], []>} : vector<5x64xf32>, vector<64x32xf32>, vector<5x32xf32> -> vector<5x32xf32>
    %474 = vector.extract_strided_slice %256 {offsets = [5, 0], sizes = [1, 32], strides = [1, 1]} : vector<6x32xf32> to vector<1x32xf32>
    %475 = vector.broadcast %474 : vector<1x32xf32> to vector<5x32xf32>
    %476 = arith.addf %473, %475 : vector<5x32xf32>
    %477 = arith.addf %476, %431 : vector<5x32xf32>
    %478 = vector.extract_strided_slice %477 {offsets = [0, 0], sizes = [1, 32], strides = [1, 1]} : vector<5x32xf32> to vector<1x32xf32>
    %c1_276 = arith.constant 1 : index
    %c0_277 = arith.constant 0 : index
    %c0_278 = arith.constant 0 : index
    %479 = vector.load %arg1[%c1_276, %c0_277, %c0_278] : memref<2x5x192xf32, #tpu.memory_space<vmem>>, vector<1x5x192xf32>
    %480 = vector.shape_cast %479 : vector<1x5x192xf32> to vector<5x192xf32>
    %cst_279 = arith.constant dense<0.000000e+00> : vector<5x32xf32>
    %481 = tpu.matmul %480, %1, %cst_279 {dimension_numbers = #tpu.dot_dimension_numbers<[1], [0], [0], [1], [0, 0, 1, 1], [], []>} : vector<5x192xf32>, vector<192x32xf32>, vector<5x32xf32> -> vector<5x32xf32>
    %482 = arith.addf %481, %2 : vector<5x32xf32>
    %483 = vector.extract_strided_slice %0 {offsets = [0, 0], sizes = [1, 32], strides = [1, 1]} : vector<4x32xf32> to vector<1x32xf32>
    %484 = vector.extract_strided_slice %0 {offsets = [1, 0], sizes = [1, 32], strides = [1, 1]} : vector<4x32xf32> to vector<1x32xf32>
    %cst_280 = arith.constant dense<0.000000e+00> : vector<5xf32>
    %485 = vector.multi_reduction <add>, %482, %cst_280 [1] : vector<5x32xf32> to vector<5xf32>
    %486 = vector.shape_cast %485 : vector<5xf32> to vector<5x1xf32>
    %cst_281 = arith.constant 3.200000e+01 : f32
    %487 = vector.broadcast %cst_281 : f32 to vector<5x1xf32>
    %488 = arith.divf %486, %487 : vector<5x1xf32>
    %489 = vector.broadcast %488 : vector<5x1xf32> to vector<5x32xf32>
    %490 = arith.subf %482, %489 : vector<5x32xf32>
    %491 = arith.mulf %490, %490 : vector<5x32xf32>
    %cst_282 = arith.constant dense<0.000000e+00> : vector<5xf32>
    %492 = vector.multi_reduction <add>, %491, %cst_282 [1] : vector<5x32xf32> to vector<5xf32>
    %493 = vector.shape_cast %492 : vector<5xf32> to vector<5x1xf32>
    %cst_283 = arith.constant 3.200000e+01 : f32
    %494 = vector.broadcast %cst_283 : f32 to vector<5x1xf32>
    %495 = arith.divf %493, %494 : vector<5x1xf32>
    %496 = vector.broadcast %488 : vector<5x1xf32> to vector<5x32xf32>
    %497 = arith.subf %482, %496 : vector<5x32xf32>
    %cst_284 = arith.constant 9.99999974E-6 : f32
    %498 = vector.broadcast %cst_284 : f32 to vector<5x1xf32>
    %499 = arith.addf %495, %498 : vector<5x1xf32>
    %500 = math.rsqrt %499 : vector<5x1xf32>
    %501 = vector.broadcast %500 : vector<5x1xf32> to vector<5x32xf32>
    %502 = arith.mulf %497, %501 : vector<5x32xf32>
    %503 = vector.broadcast %483 : vector<1x32xf32> to vector<5x32xf32>
    %504 = arith.mulf %502, %503 : vector<5x32xf32>
    %505 = vector.broadcast %484 : vector<1x32xf32> to vector<5x32xf32>
    %506 = arith.addf %504, %505 : vector<5x32xf32>
    %c0_285 = arith.constant 0 : index
    %c0_286 = arith.constant 0 : index
    %c0_287 = arith.constant 0 : index
    %507 = vector.load %arg5[%c0_285, %c0_286, %c0_287] : memref<2x6x32xf32, #tpu.memory_space<vmem>>, vector<1x6x32xf32>
    %508 = vector.shape_cast %507 : vector<1x6x32xf32> to vector<6x32xf32>
    %509 = vector.extract_strided_slice %508 {offsets = [0, 0], sizes = [1, 32], strides = [1, 1]} : vector<6x32xf32> to vector<1x32xf32>
    %510 = vector.extract_strided_slice %508 {offsets = [1, 0], sizes = [1, 32], strides = [1, 1]} : vector<6x32xf32> to vector<1x32xf32>
    %cst_288 = arith.constant dense<0.000000e+00> : vector<5xf32>
    %511 = vector.multi_reduction <add>, %506, %cst_288 [1] : vector<5x32xf32> to vector<5xf32>
    %512 = vector.shape_cast %511 : vector<5xf32> to vector<5x1xf32>
    %cst_289 = arith.constant 3.200000e+01 : f32
    %513 = vector.broadcast %cst_289 : f32 to vector<5x1xf32>
    %514 = arith.divf %512, %513 : vector<5x1xf32>
    %515 = vector.broadcast %514 : vector<5x1xf32> to vector<5x32xf32>
    %516 = arith.subf %506, %515 : vector<5x32xf32>
    %517 = arith.mulf %516, %516 : vector<5x32xf32>
    %cst_290 = arith.constant dense<0.000000e+00> : vector<5xf32>
    %518 = vector.multi_reduction <add>, %517, %cst_290 [1] : vector<5x32xf32> to vector<5xf32>
    %519 = vector.shape_cast %518 : vector<5xf32> to vector<5x1xf32>
    %cst_291 = arith.constant 3.200000e+01 : f32
    %520 = vector.broadcast %cst_291 : f32 to vector<5x1xf32>
    %521 = arith.divf %519, %520 : vector<5x1xf32>
    %522 = vector.broadcast %514 : vector<5x1xf32> to vector<5x32xf32>
    %523 = arith.subf %506, %522 : vector<5x32xf32>
    %cst_292 = arith.constant 9.99999974E-6 : f32
    %524 = vector.broadcast %cst_292 : f32 to vector<5x1xf32>
    %525 = arith.addf %521, %524 : vector<5x1xf32>
    %526 = math.rsqrt %525 : vector<5x1xf32>
    %527 = vector.broadcast %526 : vector<5x1xf32> to vector<5x32xf32>
    %528 = arith.mulf %523, %527 : vector<5x32xf32>
    %529 = vector.broadcast %509 : vector<1x32xf32> to vector<5x32xf32>
    %530 = arith.mulf %528, %529 : vector<5x32xf32>
    %531 = vector.broadcast %510 : vector<1x32xf32> to vector<5x32xf32>
    %532 = arith.addf %530, %531 : vector<5x32xf32>
    %533 = vector.extract_strided_slice %508 {offsets = [4, 0], sizes = [1, 32], strides = [1, 1]} : vector<6x32xf32> to vector<1x32xf32>
    %534 = vector.broadcast %533 : vector<1x32xf32> to vector<5x32xf32>
    %535 = arith.addf %534, %506 : vector<5x32xf32>
    %c0_293 = arith.constant 0 : index
    %c0_294 = arith.constant 0 : index
    %c0_295 = arith.constant 0 : index
    %536 = vector.load %arg8[%c0_293, %c0_294, %c0_295] : memref<24x32x8xf32, #tpu.memory_space<vmem>>, vector<1x32x8xf32>
    %537 = vector.shape_cast %536 : vector<1x32x8xf32> to vector<32x8xf32>
    %cst_296 = arith.constant dense<0.000000e+00> : vector<5x8xf32>
    %538 = tpu.matmul %532, %537, %cst_296 {dimension_numbers = #tpu.dot_dimension_numbers<[1], [0], [0], [1], [0, 0, 1, 1], [], []>} : vector<5x32xf32>, vector<32x8xf32>, vector<5x8xf32> -> vector<5x8xf32>
    %c0_297 = arith.constant 0 : index
    %c0_298 = arith.constant 0 : index
    %c0_299 = arith.constant 0 : index
    %539 = vector.load %arg7[%c0_297, %c0_298, %c0_299] : memref<24x1x8xf32, #tpu.memory_space<vmem>>, vector<1x1x8xf32>
    %540 = vector.shape_cast %539 : vector<1x1x8xf32> to vector<1x8xf32>
    %541 = vector.broadcast %540 : vector<1x8xf32> to vector<5x8xf32>
    %542 = arith.addf %538, %541 : vector<5x8xf32>
    %c4_300 = arith.constant 4 : index
    %c0_301 = arith.constant 0 : index
    %c0_302 = arith.constant 0 : index
    %543 = vector.load %arg8[%c4_300, %c0_301, %c0_302] : memref<24x32x8xf32, #tpu.memory_space<vmem>>, vector<1x32x8xf32>
    %544 = vector.shape_cast %543 : vector<1x32x8xf32> to vector<32x8xf32>
    %cst_303 = arith.constant dense<0.000000e+00> : vector<5x8xf32>
    %545 = tpu.matmul %532, %544, %cst_303 {dimension_numbers = #tpu.dot_dimension_numbers<[1], [0], [0], [1], [0, 0, 1, 1], [], []>} : vector<5x32xf32>, vector<32x8xf32>, vector<5x8xf32> -> vector<5x8xf32>
    %c4_304 = arith.constant 4 : index
    %c0_305 = arith.constant 0 : index
    %c0_306 = arith.constant 0 : index
    %546 = vector.load %arg7[%c4_304, %c0_305, %c0_306] : memref<24x1x8xf32, #tpu.memory_space<vmem>>, vector<1x1x8xf32>
    %547 = vector.shape_cast %546 : vector<1x1x8xf32> to vector<1x8xf32>
    %548 = vector.broadcast %547 : vector<1x8xf32> to vector<5x8xf32>
    %549 = arith.addf %545, %548 : vector<5x8xf32>
    %c8_307 = arith.constant 8 : index
    %c0_308 = arith.constant 0 : index
    %c0_309 = arith.constant 0 : index
    %550 = vector.load %arg8[%c8_307, %c0_308, %c0_309] : memref<24x32x8xf32, #tpu.memory_space<vmem>>, vector<1x32x8xf32>
    %551 = vector.shape_cast %550 : vector<1x32x8xf32> to vector<32x8xf32>
    %cst_310 = arith.constant dense<0.000000e+00> : vector<5x8xf32>
    %552 = tpu.matmul %532, %551, %cst_310 {dimension_numbers = #tpu.dot_dimension_numbers<[1], [0], [0], [1], [0, 0, 1, 1], [], []>} : vector<5x32xf32>, vector<32x8xf32>, vector<5x8xf32> -> vector<5x8xf32>
    %c8_311 = arith.constant 8 : index
    %c0_312 = arith.constant 0 : index
    %c0_313 = arith.constant 0 : index
    %553 = vector.load %arg7[%c8_311, %c0_312, %c0_313] : memref<24x1x8xf32, #tpu.memory_space<vmem>>, vector<1x1x8xf32>
    %554 = vector.shape_cast %553 : vector<1x1x8xf32> to vector<1x8xf32>
    %555 = vector.broadcast %554 : vector<1x8xf32> to vector<5x8xf32>
    %556 = arith.addf %552, %555 : vector<5x8xf32>
    %cst_314 = arith.constant dense<0.000000e+00> : vector<5x5xf32>
    %557 = tpu.matmul %542, %549, %cst_314 {dimension_numbers = #tpu.dot_dimension_numbers<[1], [1], [0], [0], [0, 0, 1, 0], [], []>} : vector<5x8xf32>, vector<5x8xf32>, vector<5x5xf32> -> vector<5x5xf32>
    %cst_315 = arith.constant dense<0xFF800000> : vector<5xf32>
    %558 = vector.multi_reduction <maximumf>, %557, %cst_315 [1] : vector<5x5xf32> to vector<5xf32>
    %559 = vector.shape_cast %558 : vector<5xf32> to vector<5x1xf32>
    %560 = vector.broadcast %559 : vector<5x1xf32> to vector<5x5xf32>
    %561 = arith.subf %557, %560 : vector<5x5xf32>
    %562 = math.exp %561 : vector<5x5xf32>
    %cst_316 = arith.constant dense<0.000000e+00> : vector<5xf32>
    %563 = vector.multi_reduction <add>, %562, %cst_316 [1] : vector<5x5xf32> to vector<5xf32>
    %564 = vector.shape_cast %563 : vector<5xf32> to vector<5x1xf32>
    %565 = tpu.reciprocal %564 {approx = true} : vector<5x1xf32> -> vector<5x1xf32>
    %566 = vector.broadcast %565 : vector<5x1xf32> to vector<5x5xf32>
    %567 = arith.mulf %562, %566 : vector<5x5xf32>
    %cst_317 = arith.constant dense<0.000000e+00> : vector<5x8xf32>
    %568 = tpu.matmul %567, %556, %cst_317 {dimension_numbers = #tpu.dot_dimension_numbers<[1], [0], [0], [1], [0, 0, 1, 1], [], []>} : vector<5x5xf32>, vector<5x8xf32>, vector<5x8xf32> -> vector<5x8xf32>
    %c0_318 = arith.constant 0 : index
    %c0_319 = arith.constant 0 : index
    %c0_320 = arith.constant 0 : index
    %569 = vector.load %arg9[%c0_318, %c0_319, %c0_320] : memref<8x8x32xf32, #tpu.memory_space<vmem>>, vector<1x8x32xf32>
    %570 = vector.shape_cast %569 : vector<1x8x32xf32> to vector<8x32xf32>
    %cst_321 = arith.constant dense<0.000000e+00> : vector<5x32xf32>
    %571 = tpu.matmul %568, %570, %cst_321 {dimension_numbers = #tpu.dot_dimension_numbers<[1], [0], [0], [1], [0, 0, 1, 1], [], []>} : vector<5x8xf32>, vector<8x32xf32>, vector<5x32xf32> -> vector<5x32xf32>
    %572 = arith.addf %535, %571 : vector<5x32xf32>
    %c1_322 = arith.constant 1 : index
    %c0_323 = arith.constant 0 : index
    %c0_324 = arith.constant 0 : index
    %573 = vector.load %arg8[%c1_322, %c0_323, %c0_324] : memref<24x32x8xf32, #tpu.memory_space<vmem>>, vector<1x32x8xf32>
    %574 = vector.shape_cast %573 : vector<1x32x8xf32> to vector<32x8xf32>
    %cst_325 = arith.constant dense<0.000000e+00> : vector<5x8xf32>
    %575 = tpu.matmul %532, %574, %cst_325 {dimension_numbers = #tpu.dot_dimension_numbers<[1], [0], [0], [1], [0, 0, 1, 1], [], []>} : vector<5x32xf32>, vector<32x8xf32>, vector<5x8xf32> -> vector<5x8xf32>
    %c1_326 = arith.constant 1 : index
    %c0_327 = arith.constant 0 : index
    %c0_328 = arith.constant 0 : index
    %576 = vector.load %arg7[%c1_326, %c0_327, %c0_328] : memref<24x1x8xf32, #tpu.memory_space<vmem>>, vector<1x1x8xf32>
    %577 = vector.shape_cast %576 : vector<1x1x8xf32> to vector<1x8xf32>
    %578 = vector.broadcast %577 : vector<1x8xf32> to vector<5x8xf32>
    %579 = arith.addf %575, %578 : vector<5x8xf32>
    %c5_329 = arith.constant 5 : index
    %c0_330 = arith.constant 0 : index
    %c0_331 = arith.constant 0 : index
    %580 = vector.load %arg8[%c5_329, %c0_330, %c0_331] : memref<24x32x8xf32, #tpu.memory_space<vmem>>, vector<1x32x8xf32>
    %581 = vector.shape_cast %580 : vector<1x32x8xf32> to vector<32x8xf32>
    %cst_332 = arith.constant dense<0.000000e+00> : vector<5x8xf32>
    %582 = tpu.matmul %532, %581, %cst_332 {dimension_numbers = #tpu.dot_dimension_numbers<[1], [0], [0], [1], [0, 0, 1, 1], [], []>} : vector<5x32xf32>, vector<32x8xf32>, vector<5x8xf32> -> vector<5x8xf32>
    %c5_333 = arith.constant 5 : index
    %c0_334 = arith.constant 0 : index
    %c0_335 = arith.constant 0 : index
    %583 = vector.load %arg7[%c5_333, %c0_334, %c0_335] : memref<24x1x8xf32, #tpu.memory_space<vmem>>, vector<1x1x8xf32>
    %584 = vector.shape_cast %583 : vector<1x1x8xf32> to vector<1x8xf32>
    %585 = vector.broadcast %584 : vector<1x8xf32> to vector<5x8xf32>
    %586 = arith.addf %582, %585 : vector<5x8xf32>
    %c9_336 = arith.constant 9 : index
    %c0_337 = arith.constant 0 : index
    %c0_338 = arith.constant 0 : index
    %587 = vector.load %arg8[%c9_336, %c0_337, %c0_338] : memref<24x32x8xf32, #tpu.memory_space<vmem>>, vector<1x32x8xf32>
    %588 = vector.shape_cast %587 : vector<1x32x8xf32> to vector<32x8xf32>
    %cst_339 = arith.constant dense<0.000000e+00> : vector<5x8xf32>
    %589 = tpu.matmul %532, %588, %cst_339 {dimension_numbers = #tpu.dot_dimension_numbers<[1], [0], [0], [1], [0, 0, 1, 1], [], []>} : vector<5x32xf32>, vector<32x8xf32>, vector<5x8xf32> -> vector<5x8xf32>
    %c9_340 = arith.constant 9 : index
    %c0_341 = arith.constant 0 : index
    %c0_342 = arith.constant 0 : index
    %590 = vector.load %arg7[%c9_340, %c0_341, %c0_342] : memref<24x1x8xf32, #tpu.memory_space<vmem>>, vector<1x1x8xf32>
    %591 = vector.shape_cast %590 : vector<1x1x8xf32> to vector<1x8xf32>
    %592 = vector.broadcast %591 : vector<1x8xf32> to vector<5x8xf32>
    %593 = arith.addf %589, %592 : vector<5x8xf32>
    %cst_343 = arith.constant dense<0.000000e+00> : vector<5x5xf32>
    %594 = tpu.matmul %579, %586, %cst_343 {dimension_numbers = #tpu.dot_dimension_numbers<[1], [1], [0], [0], [0, 0, 1, 0], [], []>} : vector<5x8xf32>, vector<5x8xf32>, vector<5x5xf32> -> vector<5x5xf32>
    %cst_344 = arith.constant dense<0xFF800000> : vector<5xf32>
    %595 = vector.multi_reduction <maximumf>, %594, %cst_344 [1] : vector<5x5xf32> to vector<5xf32>
    %596 = vector.shape_cast %595 : vector<5xf32> to vector<5x1xf32>
    %597 = vector.broadcast %596 : vector<5x1xf32> to vector<5x5xf32>
    %598 = arith.subf %594, %597 : vector<5x5xf32>
    %599 = math.exp %598 : vector<5x5xf32>
    %cst_345 = arith.constant dense<0.000000e+00> : vector<5xf32>
    %600 = vector.multi_reduction <add>, %599, %cst_345 [1] : vector<5x5xf32> to vector<5xf32>
    %601 = vector.shape_cast %600 : vector<5xf32> to vector<5x1xf32>
    %602 = tpu.reciprocal %601 {approx = true} : vector<5x1xf32> -> vector<5x1xf32>
    %603 = vector.broadcast %602 : vector<5x1xf32> to vector<5x5xf32>
    %604 = arith.mulf %599, %603 : vector<5x5xf32>
    %cst_346 = arith.constant dense<0.000000e+00> : vector<5x8xf32>
    %605 = tpu.matmul %604, %593, %cst_346 {dimension_numbers = #tpu.dot_dimension_numbers<[1], [0], [0], [1], [0, 0, 1, 1], [], []>} : vector<5x5xf32>, vector<5x8xf32>, vector<5x8xf32> -> vector<5x8xf32>
    %c1_347 = arith.constant 1 : index
    %c0_348 = arith.constant 0 : index
    %c0_349 = arith.constant 0 : index
    %606 = vector.load %arg9[%c1_347, %c0_348, %c0_349] : memref<8x8x32xf32, #tpu.memory_space<vmem>>, vector<1x8x32xf32>
    %607 = vector.shape_cast %606 : vector<1x8x32xf32> to vector<8x32xf32>
    %cst_350 = arith.constant dense<0.000000e+00> : vector<5x32xf32>
    %608 = tpu.matmul %605, %607, %cst_350 {dimension_numbers = #tpu.dot_dimension_numbers<[1], [0], [0], [1], [0, 0, 1, 1], [], []>} : vector<5x8xf32>, vector<8x32xf32>, vector<5x32xf32> -> vector<5x32xf32>
    %609 = arith.addf %572, %608 : vector<5x32xf32>
    %c2_351 = arith.constant 2 : index
    %c0_352 = arith.constant 0 : index
    %c0_353 = arith.constant 0 : index
    %610 = vector.load %arg8[%c2_351, %c0_352, %c0_353] : memref<24x32x8xf32, #tpu.memory_space<vmem>>, vector<1x32x8xf32>
    %611 = vector.shape_cast %610 : vector<1x32x8xf32> to vector<32x8xf32>
    %cst_354 = arith.constant dense<0.000000e+00> : vector<5x8xf32>
    %612 = tpu.matmul %532, %611, %cst_354 {dimension_numbers = #tpu.dot_dimension_numbers<[1], [0], [0], [1], [0, 0, 1, 1], [], []>} : vector<5x32xf32>, vector<32x8xf32>, vector<5x8xf32> -> vector<5x8xf32>
    %c2_355 = arith.constant 2 : index
    %c0_356 = arith.constant 0 : index
    %c0_357 = arith.constant 0 : index
    %613 = vector.load %arg7[%c2_355, %c0_356, %c0_357] : memref<24x1x8xf32, #tpu.memory_space<vmem>>, vector<1x1x8xf32>
    %614 = vector.shape_cast %613 : vector<1x1x8xf32> to vector<1x8xf32>
    %615 = vector.broadcast %614 : vector<1x8xf32> to vector<5x8xf32>
    %616 = arith.addf %612, %615 : vector<5x8xf32>
    %c6_358 = arith.constant 6 : index
    %c0_359 = arith.constant 0 : index
    %c0_360 = arith.constant 0 : index
    %617 = vector.load %arg8[%c6_358, %c0_359, %c0_360] : memref<24x32x8xf32, #tpu.memory_space<vmem>>, vector<1x32x8xf32>
    %618 = vector.shape_cast %617 : vector<1x32x8xf32> to vector<32x8xf32>
    %cst_361 = arith.constant dense<0.000000e+00> : vector<5x8xf32>
    %619 = tpu.matmul %532, %618, %cst_361 {dimension_numbers = #tpu.dot_dimension_numbers<[1], [0], [0], [1], [0, 0, 1, 1], [], []>} : vector<5x32xf32>, vector<32x8xf32>, vector<5x8xf32> -> vector<5x8xf32>
    %c6_362 = arith.constant 6 : index
    %c0_363 = arith.constant 0 : index
    %c0_364 = arith.constant 0 : index
    %620 = vector.load %arg7[%c6_362, %c0_363, %c0_364] : memref<24x1x8xf32, #tpu.memory_space<vmem>>, vector<1x1x8xf32>
    %621 = vector.shape_cast %620 : vector<1x1x8xf32> to vector<1x8xf32>
    %622 = vector.broadcast %621 : vector<1x8xf32> to vector<5x8xf32>
    %623 = arith.addf %619, %622 : vector<5x8xf32>
    %c10_365 = arith.constant 10 : index
    %c0_366 = arith.constant 0 : index
    %c0_367 = arith.constant 0 : index
    %624 = vector.load %arg8[%c10_365, %c0_366, %c0_367] : memref<24x32x8xf32, #tpu.memory_space<vmem>>, vector<1x32x8xf32>
    %625 = vector.shape_cast %624 : vector<1x32x8xf32> to vector<32x8xf32>
    %cst_368 = arith.constant dense<0.000000e+00> : vector<5x8xf32>
    %626 = tpu.matmul %532, %625, %cst_368 {dimension_numbers = #tpu.dot_dimension_numbers<[1], [0], [0], [1], [0, 0, 1, 1], [], []>} : vector<5x32xf32>, vector<32x8xf32>, vector<5x8xf32> -> vector<5x8xf32>
    %c10_369 = arith.constant 10 : index
    %c0_370 = arith.constant 0 : index
    %c0_371 = arith.constant 0 : index
    %627 = vector.load %arg7[%c10_369, %c0_370, %c0_371] : memref<24x1x8xf32, #tpu.memory_space<vmem>>, vector<1x1x8xf32>
    %628 = vector.shape_cast %627 : vector<1x1x8xf32> to vector<1x8xf32>
    %629 = vector.broadcast %628 : vector<1x8xf32> to vector<5x8xf32>
    %630 = arith.addf %626, %629 : vector<5x8xf32>
    %cst_372 = arith.constant dense<0.000000e+00> : vector<5x5xf32>
    %631 = tpu.matmul %616, %623, %cst_372 {dimension_numbers = #tpu.dot_dimension_numbers<[1], [1], [0], [0], [0, 0, 1, 0], [], []>} : vector<5x8xf32>, vector<5x8xf32>, vector<5x5xf32> -> vector<5x5xf32>
    %cst_373 = arith.constant dense<0xFF800000> : vector<5xf32>
    %632 = vector.multi_reduction <maximumf>, %631, %cst_373 [1] : vector<5x5xf32> to vector<5xf32>
    %633 = vector.shape_cast %632 : vector<5xf32> to vector<5x1xf32>
    %634 = vector.broadcast %633 : vector<5x1xf32> to vector<5x5xf32>
    %635 = arith.subf %631, %634 : vector<5x5xf32>
    %636 = math.exp %635 : vector<5x5xf32>
    %cst_374 = arith.constant dense<0.000000e+00> : vector<5xf32>
    %637 = vector.multi_reduction <add>, %636, %cst_374 [1] : vector<5x5xf32> to vector<5xf32>
    %638 = vector.shape_cast %637 : vector<5xf32> to vector<5x1xf32>
    %639 = tpu.reciprocal %638 {approx = true} : vector<5x1xf32> -> vector<5x1xf32>
    %640 = vector.broadcast %639 : vector<5x1xf32> to vector<5x5xf32>
    %641 = arith.mulf %636, %640 : vector<5x5xf32>
    %cst_375 = arith.constant dense<0.000000e+00> : vector<5x8xf32>
    %642 = tpu.matmul %641, %630, %cst_375 {dimension_numbers = #tpu.dot_dimension_numbers<[1], [0], [0], [1], [0, 0, 1, 1], [], []>} : vector<5x5xf32>, vector<5x8xf32>, vector<5x8xf32> -> vector<5x8xf32>
    %c2_376 = arith.constant 2 : index
    %c0_377 = arith.constant 0 : index
    %c0_378 = arith.constant 0 : index
    %643 = vector.load %arg9[%c2_376, %c0_377, %c0_378] : memref<8x8x32xf32, #tpu.memory_space<vmem>>, vector<1x8x32xf32>
    %644 = vector.shape_cast %643 : vector<1x8x32xf32> to vector<8x32xf32>
    %cst_379 = arith.constant dense<0.000000e+00> : vector<5x32xf32>
    %645 = tpu.matmul %642, %644, %cst_379 {dimension_numbers = #tpu.dot_dimension_numbers<[1], [0], [0], [1], [0, 0, 1, 1], [], []>} : vector<5x8xf32>, vector<8x32xf32>, vector<5x32xf32> -> vector<5x32xf32>
    %646 = arith.addf %609, %645 : vector<5x32xf32>
    %c3_380 = arith.constant 3 : index
    %c0_381 = arith.constant 0 : index
    %c0_382 = arith.constant 0 : index
    %647 = vector.load %arg8[%c3_380, %c0_381, %c0_382] : memref<24x32x8xf32, #tpu.memory_space<vmem>>, vector<1x32x8xf32>
    %648 = vector.shape_cast %647 : vector<1x32x8xf32> to vector<32x8xf32>
    %cst_383 = arith.constant dense<0.000000e+00> : vector<5x8xf32>
    %649 = tpu.matmul %532, %648, %cst_383 {dimension_numbers = #tpu.dot_dimension_numbers<[1], [0], [0], [1], [0, 0, 1, 1], [], []>} : vector<5x32xf32>, vector<32x8xf32>, vector<5x8xf32> -> vector<5x8xf32>
    %c3_384 = arith.constant 3 : index
    %c0_385 = arith.constant 0 : index
    %c0_386 = arith.constant 0 : index
    %650 = vector.load %arg7[%c3_384, %c0_385, %c0_386] : memref<24x1x8xf32, #tpu.memory_space<vmem>>, vector<1x1x8xf32>
    %651 = vector.shape_cast %650 : vector<1x1x8xf32> to vector<1x8xf32>
    %652 = vector.broadcast %651 : vector<1x8xf32> to vector<5x8xf32>
    %653 = arith.addf %649, %652 : vector<5x8xf32>
    %c7_387 = arith.constant 7 : index
    %c0_388 = arith.constant 0 : index
    %c0_389 = arith.constant 0 : index
    %654 = vector.load %arg8[%c7_387, %c0_388, %c0_389] : memref<24x32x8xf32, #tpu.memory_space<vmem>>, vector<1x32x8xf32>
    %655 = vector.shape_cast %654 : vector<1x32x8xf32> to vector<32x8xf32>
    %cst_390 = arith.constant dense<0.000000e+00> : vector<5x8xf32>
    %656 = tpu.matmul %532, %655, %cst_390 {dimension_numbers = #tpu.dot_dimension_numbers<[1], [0], [0], [1], [0, 0, 1, 1], [], []>} : vector<5x32xf32>, vector<32x8xf32>, vector<5x8xf32> -> vector<5x8xf32>
    %c7_391 = arith.constant 7 : index
    %c0_392 = arith.constant 0 : index
    %c0_393 = arith.constant 0 : index
    %657 = vector.load %arg7[%c7_391, %c0_392, %c0_393] : memref<24x1x8xf32, #tpu.memory_space<vmem>>, vector<1x1x8xf32>
    %658 = vector.shape_cast %657 : vector<1x1x8xf32> to vector<1x8xf32>
    %659 = vector.broadcast %658 : vector<1x8xf32> to vector<5x8xf32>
    %660 = arith.addf %656, %659 : vector<5x8xf32>
    %c11_394 = arith.constant 11 : index
    %c0_395 = arith.constant 0 : index
    %c0_396 = arith.constant 0 : index
    %661 = vector.load %arg8[%c11_394, %c0_395, %c0_396] : memref<24x32x8xf32, #tpu.memory_space<vmem>>, vector<1x32x8xf32>
    %662 = vector.shape_cast %661 : vector<1x32x8xf32> to vector<32x8xf32>
    %cst_397 = arith.constant dense<0.000000e+00> : vector<5x8xf32>
    %663 = tpu.matmul %532, %662, %cst_397 {dimension_numbers = #tpu.dot_dimension_numbers<[1], [0], [0], [1], [0, 0, 1, 1], [], []>} : vector<5x32xf32>, vector<32x8xf32>, vector<5x8xf32> -> vector<5x8xf32>
    %c11_398 = arith.constant 11 : index
    %c0_399 = arith.constant 0 : index
    %c0_400 = arith.constant 0 : index
    %664 = vector.load %arg7[%c11_398, %c0_399, %c0_400] : memref<24x1x8xf32, #tpu.memory_space<vmem>>, vector<1x1x8xf32>
    %665 = vector.shape_cast %664 : vector<1x1x8xf32> to vector<1x8xf32>
    %666 = vector.broadcast %665 : vector<1x8xf32> to vector<5x8xf32>
    %667 = arith.addf %663, %666 : vector<5x8xf32>
    %cst_401 = arith.constant dense<0.000000e+00> : vector<5x5xf32>
    %668 = tpu.matmul %653, %660, %cst_401 {dimension_numbers = #tpu.dot_dimension_numbers<[1], [1], [0], [0], [0, 0, 1, 0], [], []>} : vector<5x8xf32>, vector<5x8xf32>, vector<5x5xf32> -> vector<5x5xf32>
    %cst_402 = arith.constant dense<0xFF800000> : vector<5xf32>
    %669 = vector.multi_reduction <maximumf>, %668, %cst_402 [1] : vector<5x5xf32> to vector<5xf32>
    %670 = vector.shape_cast %669 : vector<5xf32> to vector<5x1xf32>
    %671 = vector.broadcast %670 : vector<5x1xf32> to vector<5x5xf32>
    %672 = arith.subf %668, %671 : vector<5x5xf32>
    %673 = math.exp %672 : vector<5x5xf32>
    %cst_403 = arith.constant dense<0.000000e+00> : vector<5xf32>
    %674 = vector.multi_reduction <add>, %673, %cst_403 [1] : vector<5x5xf32> to vector<5xf32>
    %675 = vector.shape_cast %674 : vector<5xf32> to vector<5x1xf32>
    %676 = tpu.reciprocal %675 {approx = true} : vector<5x1xf32> -> vector<5x1xf32>
    %677 = vector.broadcast %676 : vector<5x1xf32> to vector<5x5xf32>
    %678 = arith.mulf %673, %677 : vector<5x5xf32>
    %cst_404 = arith.constant dense<0.000000e+00> : vector<5x8xf32>
    %679 = tpu.matmul %678, %667, %cst_404 {dimension_numbers = #tpu.dot_dimension_numbers<[1], [0], [0], [1], [0, 0, 1, 1], [], []>} : vector<5x5xf32>, vector<5x8xf32>, vector<5x8xf32> -> vector<5x8xf32>
    %c3_405 = arith.constant 3 : index
    %c0_406 = arith.constant 0 : index
    %c0_407 = arith.constant 0 : index
    %680 = vector.load %arg9[%c3_405, %c0_406, %c0_407] : memref<8x8x32xf32, #tpu.memory_space<vmem>>, vector<1x8x32xf32>
    %681 = vector.shape_cast %680 : vector<1x8x32xf32> to vector<8x32xf32>
    %cst_408 = arith.constant dense<0.000000e+00> : vector<5x32xf32>
    %682 = tpu.matmul %679, %681, %cst_408 {dimension_numbers = #tpu.dot_dimension_numbers<[1], [0], [0], [1], [0, 0, 1, 1], [], []>} : vector<5x8xf32>, vector<8x32xf32>, vector<5x32xf32> -> vector<5x32xf32>
    %683 = arith.addf %646, %682 : vector<5x32xf32>
    %684 = vector.extract_strided_slice %508 {offsets = [2, 0], sizes = [1, 32], strides = [1, 1]} : vector<6x32xf32> to vector<1x32xf32>
    %685 = vector.extract_strided_slice %508 {offsets = [3, 0], sizes = [1, 32], strides = [1, 1]} : vector<6x32xf32> to vector<1x32xf32>
    %cst_409 = arith.constant dense<0.000000e+00> : vector<5xf32>
    %686 = vector.multi_reduction <add>, %683, %cst_409 [1] : vector<5x32xf32> to vector<5xf32>
    %687 = vector.shape_cast %686 : vector<5xf32> to vector<5x1xf32>
    %cst_410 = arith.constant 3.200000e+01 : f32
    %688 = vector.broadcast %cst_410 : f32 to vector<5x1xf32>
    %689 = arith.divf %687, %688 : vector<5x1xf32>
    %690 = vector.broadcast %689 : vector<5x1xf32> to vector<5x32xf32>
    %691 = arith.subf %683, %690 : vector<5x32xf32>
    %692 = arith.mulf %691, %691 : vector<5x32xf32>
    %cst_411 = arith.constant dense<0.000000e+00> : vector<5xf32>
    %693 = vector.multi_reduction <add>, %692, %cst_411 [1] : vector<5x32xf32> to vector<5xf32>
    %694 = vector.shape_cast %693 : vector<5xf32> to vector<5x1xf32>
    %cst_412 = arith.constant 3.200000e+01 : f32
    %695 = vector.broadcast %cst_412 : f32 to vector<5x1xf32>
    %696 = arith.divf %694, %695 : vector<5x1xf32>
    %697 = vector.broadcast %689 : vector<5x1xf32> to vector<5x32xf32>
    %698 = arith.subf %683, %697 : vector<5x32xf32>
    %cst_413 = arith.constant 9.99999974E-6 : f32
    %699 = vector.broadcast %cst_413 : f32 to vector<5x1xf32>
    %700 = arith.addf %696, %699 : vector<5x1xf32>
    %701 = math.rsqrt %700 : vector<5x1xf32>
    %702 = vector.broadcast %701 : vector<5x1xf32> to vector<5x32xf32>
    %703 = arith.mulf %698, %702 : vector<5x32xf32>
    %704 = vector.broadcast %684 : vector<1x32xf32> to vector<5x32xf32>
    %705 = arith.mulf %703, %704 : vector<5x32xf32>
    %706 = vector.broadcast %685 : vector<1x32xf32> to vector<5x32xf32>
    %707 = arith.addf %705, %706 : vector<5x32xf32>
    %c0_414 = arith.constant 0 : index
    %c0_415 = arith.constant 0 : index
    %c0_416 = arith.constant 0 : index
    %708 = vector.load %arg10[%c0_414, %c0_415, %c0_416] : memref<2x32x64xf32, #tpu.memory_space<vmem>>, vector<1x32x64xf32>
    %709 = vector.shape_cast %708 : vector<1x32x64xf32> to vector<32x64xf32>
    %cst_417 = arith.constant dense<0.000000e+00> : vector<5x64xf32>
    %710 = tpu.matmul %707, %709, %cst_417 {dimension_numbers = #tpu.dot_dimension_numbers<[1], [0], [0], [1], [0, 0, 1, 1], [], []>} : vector<5x32xf32>, vector<32x64xf32>, vector<5x64xf32> -> vector<5x64xf32>
    %c0_418 = arith.constant 0 : index
    %c0_419 = arith.constant 0 : index
    %c0_420 = arith.constant 0 : index
    %711 = vector.load %arg6[%c0_418, %c0_419, %c0_420] : memref<2x1x64xf32, #tpu.memory_space<vmem>>, vector<1x1x64xf32>
    %712 = vector.shape_cast %711 : vector<1x1x64xf32> to vector<1x64xf32>
    %713 = vector.broadcast %712 : vector<1x64xf32> to vector<5x64xf32>
    %714 = arith.addf %710, %713 : vector<5x64xf32>
    %cst_421 = arith.constant 1.702000e+00 : f32
    %715 = vector.broadcast %cst_421 : f32 to vector<5x64xf32>
    %716 = arith.mulf %715, %714 : vector<5x64xf32>
    %717 = arith.negf %716 : vector<5x64xf32>
    %718 = math.exp %717 : vector<5x64xf32>
    %cst_422 = arith.constant 1.000000e+00 : f32
    %719 = vector.broadcast %cst_422 : f32 to vector<5x64xf32>
    %720 = arith.addf %719, %718 : vector<5x64xf32>
    %721 = arith.divf %719, %720 : vector<5x64xf32>
    %722 = arith.mulf %714, %721 : vector<5x64xf32>
    %c0_423 = arith.constant 0 : index
    %c0_424 = arith.constant 0 : index
    %c0_425 = arith.constant 0 : index
    %723 = vector.load %arg11[%c0_423, %c0_424, %c0_425] : memref<2x64x32xf32, #tpu.memory_space<vmem>>, vector<1x64x32xf32>
    %724 = vector.shape_cast %723 : vector<1x64x32xf32> to vector<64x32xf32>
    %cst_426 = arith.constant dense<0.000000e+00> : vector<5x32xf32>
    %725 = tpu.matmul %722, %724, %cst_426 {dimension_numbers = #tpu.dot_dimension_numbers<[1], [0], [0], [1], [0, 0, 1, 1], [], []>} : vector<5x64xf32>, vector<64x32xf32>, vector<5x32xf32> -> vector<5x32xf32>
    %726 = vector.extract_strided_slice %508 {offsets = [5, 0], sizes = [1, 32], strides = [1, 1]} : vector<6x32xf32> to vector<1x32xf32>
    %727 = vector.broadcast %726 : vector<1x32xf32> to vector<5x32xf32>
    %728 = arith.addf %725, %727 : vector<5x32xf32>
    %729 = arith.addf %728, %683 : vector<5x32xf32>
    %c1_427 = arith.constant 1 : index
    %c0_428 = arith.constant 0 : index
    %c0_429 = arith.constant 0 : index
    %730 = vector.load %arg5[%c1_427, %c0_428, %c0_429] : memref<2x6x32xf32, #tpu.memory_space<vmem>>, vector<1x6x32xf32>
    %731 = vector.shape_cast %730 : vector<1x6x32xf32> to vector<6x32xf32>
    %732 = vector.extract_strided_slice %731 {offsets = [0, 0], sizes = [1, 32], strides = [1, 1]} : vector<6x32xf32> to vector<1x32xf32>
    %733 = vector.extract_strided_slice %731 {offsets = [1, 0], sizes = [1, 32], strides = [1, 1]} : vector<6x32xf32> to vector<1x32xf32>
    %cst_430 = arith.constant dense<0.000000e+00> : vector<5xf32>
    %734 = vector.multi_reduction <add>, %729, %cst_430 [1] : vector<5x32xf32> to vector<5xf32>
    %735 = vector.shape_cast %734 : vector<5xf32> to vector<5x1xf32>
    %cst_431 = arith.constant 3.200000e+01 : f32
    %736 = vector.broadcast %cst_431 : f32 to vector<5x1xf32>
    %737 = arith.divf %735, %736 : vector<5x1xf32>
    %738 = vector.broadcast %737 : vector<5x1xf32> to vector<5x32xf32>
    %739 = arith.subf %729, %738 : vector<5x32xf32>
    %740 = arith.mulf %739, %739 : vector<5x32xf32>
    %cst_432 = arith.constant dense<0.000000e+00> : vector<5xf32>
    %741 = vector.multi_reduction <add>, %740, %cst_432 [1] : vector<5x32xf32> to vector<5xf32>
    %742 = vector.shape_cast %741 : vector<5xf32> to vector<5x1xf32>
    %cst_433 = arith.constant 3.200000e+01 : f32
    %743 = vector.broadcast %cst_433 : f32 to vector<5x1xf32>
    %744 = arith.divf %742, %743 : vector<5x1xf32>
    %745 = vector.broadcast %737 : vector<5x1xf32> to vector<5x32xf32>
    %746 = arith.subf %729, %745 : vector<5x32xf32>
    %cst_434 = arith.constant 9.99999974E-6 : f32
    %747 = vector.broadcast %cst_434 : f32 to vector<5x1xf32>
    %748 = arith.addf %744, %747 : vector<5x1xf32>
    %749 = math.rsqrt %748 : vector<5x1xf32>
    %750 = vector.broadcast %749 : vector<5x1xf32> to vector<5x32xf32>
    %751 = arith.mulf %746, %750 : vector<5x32xf32>
    %752 = vector.broadcast %732 : vector<1x32xf32> to vector<5x32xf32>
    %753 = arith.mulf %751, %752 : vector<5x32xf32>
    %754 = vector.broadcast %733 : vector<1x32xf32> to vector<5x32xf32>
    %755 = arith.addf %753, %754 : vector<5x32xf32>
    %756 = vector.extract_strided_slice %731 {offsets = [4, 0], sizes = [1, 32], strides = [1, 1]} : vector<6x32xf32> to vector<1x32xf32>
    %757 = vector.broadcast %756 : vector<1x32xf32> to vector<5x32xf32>
    %758 = arith.addf %757, %729 : vector<5x32xf32>
    %c12_435 = arith.constant 12 : index
    %c0_436 = arith.constant 0 : index
    %c0_437 = arith.constant 0 : index
    %759 = vector.load %arg8[%c12_435, %c0_436, %c0_437] : memref<24x32x8xf32, #tpu.memory_space<vmem>>, vector<1x32x8xf32>
    %760 = vector.shape_cast %759 : vector<1x32x8xf32> to vector<32x8xf32>
    %cst_438 = arith.constant dense<0.000000e+00> : vector<5x8xf32>
    %761 = tpu.matmul %755, %760, %cst_438 {dimension_numbers = #tpu.dot_dimension_numbers<[1], [0], [0], [1], [0, 0, 1, 1], [], []>} : vector<5x32xf32>, vector<32x8xf32>, vector<5x8xf32> -> vector<5x8xf32>
    %c12_439 = arith.constant 12 : index
    %c0_440 = arith.constant 0 : index
    %c0_441 = arith.constant 0 : index
    %762 = vector.load %arg7[%c12_439, %c0_440, %c0_441] : memref<24x1x8xf32, #tpu.memory_space<vmem>>, vector<1x1x8xf32>
    %763 = vector.shape_cast %762 : vector<1x1x8xf32> to vector<1x8xf32>
    %764 = vector.broadcast %763 : vector<1x8xf32> to vector<5x8xf32>
    %765 = arith.addf %761, %764 : vector<5x8xf32>
    %c16_442 = arith.constant 16 : index
    %c0_443 = arith.constant 0 : index
    %c0_444 = arith.constant 0 : index
    %766 = vector.load %arg8[%c16_442, %c0_443, %c0_444] : memref<24x32x8xf32, #tpu.memory_space<vmem>>, vector<1x32x8xf32>
    %767 = vector.shape_cast %766 : vector<1x32x8xf32> to vector<32x8xf32>
    %cst_445 = arith.constant dense<0.000000e+00> : vector<5x8xf32>
    %768 = tpu.matmul %755, %767, %cst_445 {dimension_numbers = #tpu.dot_dimension_numbers<[1], [0], [0], [1], [0, 0, 1, 1], [], []>} : vector<5x32xf32>, vector<32x8xf32>, vector<5x8xf32> -> vector<5x8xf32>
    %c16_446 = arith.constant 16 : index
    %c0_447 = arith.constant 0 : index
    %c0_448 = arith.constant 0 : index
    %769 = vector.load %arg7[%c16_446, %c0_447, %c0_448] : memref<24x1x8xf32, #tpu.memory_space<vmem>>, vector<1x1x8xf32>
    %770 = vector.shape_cast %769 : vector<1x1x8xf32> to vector<1x8xf32>
    %771 = vector.broadcast %770 : vector<1x8xf32> to vector<5x8xf32>
    %772 = arith.addf %768, %771 : vector<5x8xf32>
    %c20_449 = arith.constant 20 : index
    %c0_450 = arith.constant 0 : index
    %c0_451 = arith.constant 0 : index
    %773 = vector.load %arg8[%c20_449, %c0_450, %c0_451] : memref<24x32x8xf32, #tpu.memory_space<vmem>>, vector<1x32x8xf32>
    %774 = vector.shape_cast %773 : vector<1x32x8xf32> to vector<32x8xf32>
    %cst_452 = arith.constant dense<0.000000e+00> : vector<5x8xf32>
    %775 = tpu.matmul %755, %774, %cst_452 {dimension_numbers = #tpu.dot_dimension_numbers<[1], [0], [0], [1], [0, 0, 1, 1], [], []>} : vector<5x32xf32>, vector<32x8xf32>, vector<5x8xf32> -> vector<5x8xf32>
    %c20_453 = arith.constant 20 : index
    %c0_454 = arith.constant 0 : index
    %c0_455 = arith.constant 0 : index
    %776 = vector.load %arg7[%c20_453, %c0_454, %c0_455] : memref<24x1x8xf32, #tpu.memory_space<vmem>>, vector<1x1x8xf32>
    %777 = vector.shape_cast %776 : vector<1x1x8xf32> to vector<1x8xf32>
    %778 = vector.broadcast %777 : vector<1x8xf32> to vector<5x8xf32>
    %779 = arith.addf %775, %778 : vector<5x8xf32>
    %cst_456 = arith.constant dense<0.000000e+00> : vector<5x5xf32>
    %780 = tpu.matmul %765, %772, %cst_456 {dimension_numbers = #tpu.dot_dimension_numbers<[1], [1], [0], [0], [0, 0, 1, 0], [], []>} : vector<5x8xf32>, vector<5x8xf32>, vector<5x5xf32> -> vector<5x5xf32>
    %cst_457 = arith.constant dense<0xFF800000> : vector<5xf32>
    %781 = vector.multi_reduction <maximumf>, %780, %cst_457 [1] : vector<5x5xf32> to vector<5xf32>
    %782 = vector.shape_cast %781 : vector<5xf32> to vector<5x1xf32>
    %783 = vector.broadcast %782 : vector<5x1xf32> to vector<5x5xf32>
    %784 = arith.subf %780, %783 : vector<5x5xf32>
    %785 = math.exp %784 : vector<5x5xf32>
    %cst_458 = arith.constant dense<0.000000e+00> : vector<5xf32>
    %786 = vector.multi_reduction <add>, %785, %cst_458 [1] : vector<5x5xf32> to vector<5xf32>
    %787 = vector.shape_cast %786 : vector<5xf32> to vector<5x1xf32>
    %788 = tpu.reciprocal %787 {approx = true} : vector<5x1xf32> -> vector<5x1xf32>
    %789 = vector.broadcast %788 : vector<5x1xf32> to vector<5x5xf32>
    %790 = arith.mulf %785, %789 : vector<5x5xf32>
    %cst_459 = arith.constant dense<0.000000e+00> : vector<5x8xf32>
    %791 = tpu.matmul %790, %779, %cst_459 {dimension_numbers = #tpu.dot_dimension_numbers<[1], [0], [0], [1], [0, 0, 1, 1], [], []>} : vector<5x5xf32>, vector<5x8xf32>, vector<5x8xf32> -> vector<5x8xf32>
    %c4_460 = arith.constant 4 : index
    %c0_461 = arith.constant 0 : index
    %c0_462 = arith.constant 0 : index
    %792 = vector.load %arg9[%c4_460, %c0_461, %c0_462] : memref<8x8x32xf32, #tpu.memory_space<vmem>>, vector<1x8x32xf32>
    %793 = vector.shape_cast %792 : vector<1x8x32xf32> to vector<8x32xf32>
    %cst_463 = arith.constant dense<0.000000e+00> : vector<5x32xf32>
    %794 = tpu.matmul %791, %793, %cst_463 {dimension_numbers = #tpu.dot_dimension_numbers<[1], [0], [0], [1], [0, 0, 1, 1], [], []>} : vector<5x8xf32>, vector<8x32xf32>, vector<5x32xf32> -> vector<5x32xf32>
    %795 = arith.addf %758, %794 : vector<5x32xf32>
    %c13_464 = arith.constant 13 : index
    %c0_465 = arith.constant 0 : index
    %c0_466 = arith.constant 0 : index
    %796 = vector.load %arg8[%c13_464, %c0_465, %c0_466] : memref<24x32x8xf32, #tpu.memory_space<vmem>>, vector<1x32x8xf32>
    %797 = vector.shape_cast %796 : vector<1x32x8xf32> to vector<32x8xf32>
    %cst_467 = arith.constant dense<0.000000e+00> : vector<5x8xf32>
    %798 = tpu.matmul %755, %797, %cst_467 {dimension_numbers = #tpu.dot_dimension_numbers<[1], [0], [0], [1], [0, 0, 1, 1], [], []>} : vector<5x32xf32>, vector<32x8xf32>, vector<5x8xf32> -> vector<5x8xf32>
    %c13_468 = arith.constant 13 : index
    %c0_469 = arith.constant 0 : index
    %c0_470 = arith.constant 0 : index
    %799 = vector.load %arg7[%c13_468, %c0_469, %c0_470] : memref<24x1x8xf32, #tpu.memory_space<vmem>>, vector<1x1x8xf32>
    %800 = vector.shape_cast %799 : vector<1x1x8xf32> to vector<1x8xf32>
    %801 = vector.broadcast %800 : vector<1x8xf32> to vector<5x8xf32>
    %802 = arith.addf %798, %801 : vector<5x8xf32>
    %c17_471 = arith.constant 17 : index
    %c0_472 = arith.constant 0 : index
    %c0_473 = arith.constant 0 : index
    %803 = vector.load %arg8[%c17_471, %c0_472, %c0_473] : memref<24x32x8xf32, #tpu.memory_space<vmem>>, vector<1x32x8xf32>
    %804 = vector.shape_cast %803 : vector<1x32x8xf32> to vector<32x8xf32>
    %cst_474 = arith.constant dense<0.000000e+00> : vector<5x8xf32>
    %805 = tpu.matmul %755, %804, %cst_474 {dimension_numbers = #tpu.dot_dimension_numbers<[1], [0], [0], [1], [0, 0, 1, 1], [], []>} : vector<5x32xf32>, vector<32x8xf32>, vector<5x8xf32> -> vector<5x8xf32>
    %c17_475 = arith.constant 17 : index
    %c0_476 = arith.constant 0 : index
    %c0_477 = arith.constant 0 : index
    %806 = vector.load %arg7[%c17_475, %c0_476, %c0_477] : memref<24x1x8xf32, #tpu.memory_space<vmem>>, vector<1x1x8xf32>
    %807 = vector.shape_cast %806 : vector<1x1x8xf32> to vector<1x8xf32>
    %808 = vector.broadcast %807 : vector<1x8xf32> to vector<5x8xf32>
    %809 = arith.addf %805, %808 : vector<5x8xf32>
    %c21_478 = arith.constant 21 : index
    %c0_479 = arith.constant 0 : index
    %c0_480 = arith.constant 0 : index
    %810 = vector.load %arg8[%c21_478, %c0_479, %c0_480] : memref<24x32x8xf32, #tpu.memory_space<vmem>>, vector<1x32x8xf32>
    %811 = vector.shape_cast %810 : vector<1x32x8xf32> to vector<32x8xf32>
    %cst_481 = arith.constant dense<0.000000e+00> : vector<5x8xf32>
    %812 = tpu.matmul %755, %811, %cst_481 {dimension_numbers = #tpu.dot_dimension_numbers<[1], [0], [0], [1], [0, 0, 1, 1], [], []>} : vector<5x32xf32>, vector<32x8xf32>, vector<5x8xf32> -> vector<5x8xf32>
    %c21_482 = arith.constant 21 : index
    %c0_483 = arith.constant 0 : index
    %c0_484 = arith.constant 0 : index
    %813 = vector.load %arg7[%c21_482, %c0_483, %c0_484] : memref<24x1x8xf32, #tpu.memory_space<vmem>>, vector<1x1x8xf32>
    %814 = vector.shape_cast %813 : vector<1x1x8xf32> to vector<1x8xf32>
    %815 = vector.broadcast %814 : vector<1x8xf32> to vector<5x8xf32>
    %816 = arith.addf %812, %815 : vector<5x8xf32>
    %cst_485 = arith.constant dense<0.000000e+00> : vector<5x5xf32>
    %817 = tpu.matmul %802, %809, %cst_485 {dimension_numbers = #tpu.dot_dimension_numbers<[1], [1], [0], [0], [0, 0, 1, 0], [], []>} : vector<5x8xf32>, vector<5x8xf32>, vector<5x5xf32> -> vector<5x5xf32>
    %cst_486 = arith.constant dense<0xFF800000> : vector<5xf32>
    %818 = vector.multi_reduction <maximumf>, %817, %cst_486 [1] : vector<5x5xf32> to vector<5xf32>
    %819 = vector.shape_cast %818 : vector<5xf32> to vector<5x1xf32>
    %820 = vector.broadcast %819 : vector<5x1xf32> to vector<5x5xf32>
    %821 = arith.subf %817, %820 : vector<5x5xf32>
    %822 = math.exp %821 : vector<5x5xf32>
    %cst_487 = arith.constant dense<0.000000e+00> : vector<5xf32>
    %823 = vector.multi_reduction <add>, %822, %cst_487 [1] : vector<5x5xf32> to vector<5xf32>
    %824 = vector.shape_cast %823 : vector<5xf32> to vector<5x1xf32>
    %825 = tpu.reciprocal %824 {approx = true} : vector<5x1xf32> -> vector<5x1xf32>
    %826 = vector.broadcast %825 : vector<5x1xf32> to vector<5x5xf32>
    %827 = arith.mulf %822, %826 : vector<5x5xf32>
    %cst_488 = arith.constant dense<0.000000e+00> : vector<5x8xf32>
    %828 = tpu.matmul %827, %816, %cst_488 {dimension_numbers = #tpu.dot_dimension_numbers<[1], [0], [0], [1], [0, 0, 1, 1], [], []>} : vector<5x5xf32>, vector<5x8xf32>, vector<5x8xf32> -> vector<5x8xf32>
    %c5_489 = arith.constant 5 : index
    %c0_490 = arith.constant 0 : index
    %c0_491 = arith.constant 0 : index
    %829 = vector.load %arg9[%c5_489, %c0_490, %c0_491] : memref<8x8x32xf32, #tpu.memory_space<vmem>>, vector<1x8x32xf32>
    %830 = vector.shape_cast %829 : vector<1x8x32xf32> to vector<8x32xf32>
    %cst_492 = arith.constant dense<0.000000e+00> : vector<5x32xf32>
    %831 = tpu.matmul %828, %830, %cst_492 {dimension_numbers = #tpu.dot_dimension_numbers<[1], [0], [0], [1], [0, 0, 1, 1], [], []>} : vector<5x8xf32>, vector<8x32xf32>, vector<5x32xf32> -> vector<5x32xf32>
    %832 = arith.addf %795, %831 : vector<5x32xf32>
    %c14_493 = arith.constant 14 : index
    %c0_494 = arith.constant 0 : index
    %c0_495 = arith.constant 0 : index
    %833 = vector.load %arg8[%c14_493, %c0_494, %c0_495] : memref<24x32x8xf32, #tpu.memory_space<vmem>>, vector<1x32x8xf32>
    %834 = vector.shape_cast %833 : vector<1x32x8xf32> to vector<32x8xf32>
    %cst_496 = arith.constant dense<0.000000e+00> : vector<5x8xf32>
    %835 = tpu.matmul %755, %834, %cst_496 {dimension_numbers = #tpu.dot_dimension_numbers<[1], [0], [0], [1], [0, 0, 1, 1], [], []>} : vector<5x32xf32>, vector<32x8xf32>, vector<5x8xf32> -> vector<5x8xf32>
    %c14_497 = arith.constant 14 : index
    %c0_498 = arith.constant 0 : index
    %c0_499 = arith.constant 0 : index
    %836 = vector.load %arg7[%c14_497, %c0_498, %c0_499] : memref<24x1x8xf32, #tpu.memory_space<vmem>>, vector<1x1x8xf32>
    %837 = vector.shape_cast %836 : vector<1x1x8xf32> to vector<1x8xf32>
    %838 = vector.broadcast %837 : vector<1x8xf32> to vector<5x8xf32>
    %839 = arith.addf %835, %838 : vector<5x8xf32>
    %c18_500 = arith.constant 18 : index
    %c0_501 = arith.constant 0 : index
    %c0_502 = arith.constant 0 : index
    %840 = vector.load %arg8[%c18_500, %c0_501, %c0_502] : memref<24x32x8xf32, #tpu.memory_space<vmem>>, vector<1x32x8xf32>
    %841 = vector.shape_cast %840 : vector<1x32x8xf32> to vector<32x8xf32>
    %cst_503 = arith.constant dense<0.000000e+00> : vector<5x8xf32>
    %842 = tpu.matmul %755, %841, %cst_503 {dimension_numbers = #tpu.dot_dimension_numbers<[1], [0], [0], [1], [0, 0, 1, 1], [], []>} : vector<5x32xf32>, vector<32x8xf32>, vector<5x8xf32> -> vector<5x8xf32>
    %c18_504 = arith.constant 18 : index
    %c0_505 = arith.constant 0 : index
    %c0_506 = arith.constant 0 : index
    %843 = vector.load %arg7[%c18_504, %c0_505, %c0_506] : memref<24x1x8xf32, #tpu.memory_space<vmem>>, vector<1x1x8xf32>
    %844 = vector.shape_cast %843 : vector<1x1x8xf32> to vector<1x8xf32>
    %845 = vector.broadcast %844 : vector<1x8xf32> to vector<5x8xf32>
    %846 = arith.addf %842, %845 : vector<5x8xf32>
    %c22_507 = arith.constant 22 : index
    %c0_508 = arith.constant 0 : index
    %c0_509 = arith.constant 0 : index
    %847 = vector.load %arg8[%c22_507, %c0_508, %c0_509] : memref<24x32x8xf32, #tpu.memory_space<vmem>>, vector<1x32x8xf32>
    %848 = vector.shape_cast %847 : vector<1x32x8xf32> to vector<32x8xf32>
    %cst_510 = arith.constant dense<0.000000e+00> : vector<5x8xf32>
    %849 = tpu.matmul %755, %848, %cst_510 {dimension_numbers = #tpu.dot_dimension_numbers<[1], [0], [0], [1], [0, 0, 1, 1], [], []>} : vector<5x32xf32>, vector<32x8xf32>, vector<5x8xf32> -> vector<5x8xf32>
    %c22_511 = arith.constant 22 : index
    %c0_512 = arith.constant 0 : index
    %c0_513 = arith.constant 0 : index
    %850 = vector.load %arg7[%c22_511, %c0_512, %c0_513] : memref<24x1x8xf32, #tpu.memory_space<vmem>>, vector<1x1x8xf32>
    %851 = vector.shape_cast %850 : vector<1x1x8xf32> to vector<1x8xf32>
    %852 = vector.broadcast %851 : vector<1x8xf32> to vector<5x8xf32>
    %853 = arith.addf %849, %852 : vector<5x8xf32>
    %cst_514 = arith.constant dense<0.000000e+00> : vector<5x5xf32>
    %854 = tpu.matmul %839, %846, %cst_514 {dimension_numbers = #tpu.dot_dimension_numbers<[1], [1], [0], [0], [0, 0, 1, 0], [], []>} : vector<5x8xf32>, vector<5x8xf32>, vector<5x5xf32> -> vector<5x5xf32>
    %cst_515 = arith.constant dense<0xFF800000> : vector<5xf32>
    %855 = vector.multi_reduction <maximumf>, %854, %cst_515 [1] : vector<5x5xf32> to vector<5xf32>
    %856 = vector.shape_cast %855 : vector<5xf32> to vector<5x1xf32>
    %857 = vector.broadcast %856 : vector<5x1xf32> to vector<5x5xf32>
    %858 = arith.subf %854, %857 : vector<5x5xf32>
    %859 = math.exp %858 : vector<5x5xf32>
    %cst_516 = arith.constant dense<0.000000e+00> : vector<5xf32>
    %860 = vector.multi_reduction <add>, %859, %cst_516 [1] : vector<5x5xf32> to vector<5xf32>
    %861 = vector.shape_cast %860 : vector<5xf32> to vector<5x1xf32>
    %862 = tpu.reciprocal %861 {approx = true} : vector<5x1xf32> -> vector<5x1xf32>
    %863 = vector.broadcast %862 : vector<5x1xf32> to vector<5x5xf32>
    %864 = arith.mulf %859, %863 : vector<5x5xf32>
    %cst_517 = arith.constant dense<0.000000e+00> : vector<5x8xf32>
    %865 = tpu.matmul %864, %853, %cst_517 {dimension_numbers = #tpu.dot_dimension_numbers<[1], [0], [0], [1], [0, 0, 1, 1], [], []>} : vector<5x5xf32>, vector<5x8xf32>, vector<5x8xf32> -> vector<5x8xf32>
    %c6_518 = arith.constant 6 : index
    %c0_519 = arith.constant 0 : index
    %c0_520 = arith.constant 0 : index
    %866 = vector.load %arg9[%c6_518, %c0_519, %c0_520] : memref<8x8x32xf32, #tpu.memory_space<vmem>>, vector<1x8x32xf32>
    %867 = vector.shape_cast %866 : vector<1x8x32xf32> to vector<8x32xf32>
    %cst_521 = arith.constant dense<0.000000e+00> : vector<5x32xf32>
    %868 = tpu.matmul %865, %867, %cst_521 {dimension_numbers = #tpu.dot_dimension_numbers<[1], [0], [0], [1], [0, 0, 1, 1], [], []>} : vector<5x8xf32>, vector<8x32xf32>, vector<5x32xf32> -> vector<5x32xf32>
    %869 = arith.addf %832, %868 : vector<5x32xf32>
    %c15_522 = arith.constant 15 : index
    %c0_523 = arith.constant 0 : index
    %c0_524 = arith.constant 0 : index
    %870 = vector.load %arg8[%c15_522, %c0_523, %c0_524] : memref<24x32x8xf32, #tpu.memory_space<vmem>>, vector<1x32x8xf32>
    %871 = vector.shape_cast %870 : vector<1x32x8xf32> to vector<32x8xf32>
    %cst_525 = arith.constant dense<0.000000e+00> : vector<5x8xf32>
    %872 = tpu.matmul %755, %871, %cst_525 {dimension_numbers = #tpu.dot_dimension_numbers<[1], [0], [0], [1], [0, 0, 1, 1], [], []>} : vector<5x32xf32>, vector<32x8xf32>, vector<5x8xf32> -> vector<5x8xf32>
    %c15_526 = arith.constant 15 : index
    %c0_527 = arith.constant 0 : index
    %c0_528 = arith.constant 0 : index
    %873 = vector.load %arg7[%c15_526, %c0_527, %c0_528] : memref<24x1x8xf32, #tpu.memory_space<vmem>>, vector<1x1x8xf32>
    %874 = vector.shape_cast %873 : vector<1x1x8xf32> to vector<1x8xf32>
    %875 = vector.broadcast %874 : vector<1x8xf32> to vector<5x8xf32>
    %876 = arith.addf %872, %875 : vector<5x8xf32>
    %c19_529 = arith.constant 19 : index
    %c0_530 = arith.constant 0 : index
    %c0_531 = arith.constant 0 : index
    %877 = vector.load %arg8[%c19_529, %c0_530, %c0_531] : memref<24x32x8xf32, #tpu.memory_space<vmem>>, vector<1x32x8xf32>
    %878 = vector.shape_cast %877 : vector<1x32x8xf32> to vector<32x8xf32>
    %cst_532 = arith.constant dense<0.000000e+00> : vector<5x8xf32>
    %879 = tpu.matmul %755, %878, %cst_532 {dimension_numbers = #tpu.dot_dimension_numbers<[1], [0], [0], [1], [0, 0, 1, 1], [], []>} : vector<5x32xf32>, vector<32x8xf32>, vector<5x8xf32> -> vector<5x8xf32>
    %c19_533 = arith.constant 19 : index
    %c0_534 = arith.constant 0 : index
    %c0_535 = arith.constant 0 : index
    %880 = vector.load %arg7[%c19_533, %c0_534, %c0_535] : memref<24x1x8xf32, #tpu.memory_space<vmem>>, vector<1x1x8xf32>
    %881 = vector.shape_cast %880 : vector<1x1x8xf32> to vector<1x8xf32>
    %882 = vector.broadcast %881 : vector<1x8xf32> to vector<5x8xf32>
    %883 = arith.addf %879, %882 : vector<5x8xf32>
    %c23_536 = arith.constant 23 : index
    %c0_537 = arith.constant 0 : index
    %c0_538 = arith.constant 0 : index
    %884 = vector.load %arg8[%c23_536, %c0_537, %c0_538] : memref<24x32x8xf32, #tpu.memory_space<vmem>>, vector<1x32x8xf32>
    %885 = vector.shape_cast %884 : vector<1x32x8xf32> to vector<32x8xf32>
    %cst_539 = arith.constant dense<0.000000e+00> : vector<5x8xf32>
    %886 = tpu.matmul %755, %885, %cst_539 {dimension_numbers = #tpu.dot_dimension_numbers<[1], [0], [0], [1], [0, 0, 1, 1], [], []>} : vector<5x32xf32>, vector<32x8xf32>, vector<5x8xf32> -> vector<5x8xf32>
    %c23_540 = arith.constant 23 : index
    %c0_541 = arith.constant 0 : index
    %c0_542 = arith.constant 0 : index
    %887 = vector.load %arg7[%c23_540, %c0_541, %c0_542] : memref<24x1x8xf32, #tpu.memory_space<vmem>>, vector<1x1x8xf32>
    %888 = vector.shape_cast %887 : vector<1x1x8xf32> to vector<1x8xf32>
    %889 = vector.broadcast %888 : vector<1x8xf32> to vector<5x8xf32>
    %890 = arith.addf %886, %889 : vector<5x8xf32>
    %cst_543 = arith.constant dense<0.000000e+00> : vector<5x5xf32>
    %891 = tpu.matmul %876, %883, %cst_543 {dimension_numbers = #tpu.dot_dimension_numbers<[1], [1], [0], [0], [0, 0, 1, 0], [], []>} : vector<5x8xf32>, vector<5x8xf32>, vector<5x5xf32> -> vector<5x5xf32>
    %cst_544 = arith.constant dense<0xFF800000> : vector<5xf32>
    %892 = vector.multi_reduction <maximumf>, %891, %cst_544 [1] : vector<5x5xf32> to vector<5xf32>
    %893 = vector.shape_cast %892 : vector<5xf32> to vector<5x1xf32>
    %894 = vector.broadcast %893 : vector<5x1xf32> to vector<5x5xf32>
    %895 = arith.subf %891, %894 : vector<5x5xf32>
    %896 = math.exp %895 : vector<5x5xf32>
    %cst_545 = arith.constant dense<0.000000e+00> : vector<5xf32>
    %897 = vector.multi_reduction <add>, %896, %cst_545 [1] : vector<5x5xf32> to vector<5xf32>
    %898 = vector.shape_cast %897 : vector<5xf32> to vector<5x1xf32>
    %899 = tpu.reciprocal %898 {approx = true} : vector<5x1xf32> -> vector<5x1xf32>
    %900 = vector.broadcast %899 : vector<5x1xf32> to vector<5x5xf32>
    %901 = arith.mulf %896, %900 : vector<5x5xf32>
    %cst_546 = arith.constant dense<0.000000e+00> : vector<5x8xf32>
    %902 = tpu.matmul %901, %890, %cst_546 {dimension_numbers = #tpu.dot_dimension_numbers<[1], [0], [0], [1], [0, 0, 1, 1], [], []>} : vector<5x5xf32>, vector<5x8xf32>, vector<5x8xf32> -> vector<5x8xf32>
    %c7_547 = arith.constant 7 : index
    %c0_548 = arith.constant 0 : index
    %c0_549 = arith.constant 0 : index
    %903 = vector.load %arg9[%c7_547, %c0_548, %c0_549] : memref<8x8x32xf32, #tpu.memory_space<vmem>>, vector<1x8x32xf32>
    %904 = vector.shape_cast %903 : vector<1x8x32xf32> to vector<8x32xf32>
    %cst_550 = arith.constant dense<0.000000e+00> : vector<5x32xf32>
    %905 = tpu.matmul %902, %904, %cst_550 {dimension_numbers = #tpu.dot_dimension_numbers<[1], [0], [0], [1], [0, 0, 1, 1], [], []>} : vector<5x8xf32>, vector<8x32xf32>, vector<5x32xf32> -> vector<5x32xf32>
    %906 = arith.addf %869, %905 : vector<5x32xf32>
    %907 = vector.extract_strided_slice %731 {offsets = [2, 0], sizes = [1, 32], strides = [1, 1]} : vector<6x32xf32> to vector<1x32xf32>
    %908 = vector.extract_strided_slice %731 {offsets = [3, 0], sizes = [1, 32], strides = [1, 1]} : vector<6x32xf32> to vector<1x32xf32>
    %cst_551 = arith.constant dense<0.000000e+00> : vector<5xf32>
    %909 = vector.multi_reduction <add>, %906, %cst_551 [1] : vector<5x32xf32> to vector<5xf32>
    %910 = vector.shape_cast %909 : vector<5xf32> to vector<5x1xf32>
    %cst_552 = arith.constant 3.200000e+01 : f32
    %911 = vector.broadcast %cst_552 : f32 to vector<5x1xf32>
    %912 = arith.divf %910, %911 : vector<5x1xf32>
    %913 = vector.broadcast %912 : vector<5x1xf32> to vector<5x32xf32>
    %914 = arith.subf %906, %913 : vector<5x32xf32>
    %915 = arith.mulf %914, %914 : vector<5x32xf32>
    %cst_553 = arith.constant dense<0.000000e+00> : vector<5xf32>
    %916 = vector.multi_reduction <add>, %915, %cst_553 [1] : vector<5x32xf32> to vector<5xf32>
    %917 = vector.shape_cast %916 : vector<5xf32> to vector<5x1xf32>
    %cst_554 = arith.constant 3.200000e+01 : f32
    %918 = vector.broadcast %cst_554 : f32 to vector<5x1xf32>
    %919 = arith.divf %917, %918 : vector<5x1xf32>
    %920 = vector.broadcast %912 : vector<5x1xf32> to vector<5x32xf32>
    %921 = arith.subf %906, %920 : vector<5x32xf32>
    %cst_555 = arith.constant 9.99999974E-6 : f32
    %922 = vector.broadcast %cst_555 : f32 to vector<5x1xf32>
    %923 = arith.addf %919, %922 : vector<5x1xf32>
    %924 = math.rsqrt %923 : vector<5x1xf32>
    %925 = vector.broadcast %924 : vector<5x1xf32> to vector<5x32xf32>
    %926 = arith.mulf %921, %925 : vector<5x32xf32>
    %927 = vector.broadcast %907 : vector<1x32xf32> to vector<5x32xf32>
    %928 = arith.mulf %926, %927 : vector<5x32xf32>
    %929 = vector.broadcast %908 : vector<1x32xf32> to vector<5x32xf32>
    %930 = arith.addf %928, %929 : vector<5x32xf32>
    %c1_556 = arith.constant 1 : index
    %c0_557 = arith.constant 0 : index
    %c0_558 = arith.constant 0 : index
    %931 = vector.load %arg10[%c1_556, %c0_557, %c0_558] : memref<2x32x64xf32, #tpu.memory_space<vmem>>, vector<1x32x64xf32>
    %932 = vector.shape_cast %931 : vector<1x32x64xf32> to vector<32x64xf32>
    %cst_559 = arith.constant dense<0.000000e+00> : vector<5x64xf32>
    %933 = tpu.matmul %930, %932, %cst_559 {dimension_numbers = #tpu.dot_dimension_numbers<[1], [0], [0], [1], [0, 0, 1, 1], [], []>} : vector<5x32xf32>, vector<32x64xf32>, vector<5x64xf32> -> vector<5x64xf32>
    %c1_560 = arith.constant 1 : index
    %c0_561 = arith.constant 0 : index
    %c0_562 = arith.constant 0 : index
    %934 = vector.load %arg6[%c1_560, %c0_561, %c0_562] : memref<2x1x64xf32, #tpu.memory_space<vmem>>, vector<1x1x64xf32>
    %935 = vector.shape_cast %934 : vector<1x1x64xf32> to vector<1x64xf32>
    %936 = vector.broadcast %935 : vector<1x64xf32> to vector<5x64xf32>
    %937 = arith.addf %933, %936 : vector<5x64xf32>
    %cst_563 = arith.constant 1.702000e+00 : f32
    %938 = vector.broadcast %cst_563 : f32 to vector<5x64xf32>
    %939 = arith.mulf %938, %937 : vector<5x64xf32>
    %940 = arith.negf %939 : vector<5x64xf32>
    %941 = math.exp %940 : vector<5x64xf32>
    %cst_564 = arith.constant 1.000000e+00 : f32
    %942 = vector.broadcast %cst_564 : f32 to vector<5x64xf32>
    %943 = arith.addf %942, %941 : vector<5x64xf32>
    %944 = arith.divf %942, %943 : vector<5x64xf32>
    %945 = arith.mulf %937, %944 : vector<5x64xf32>
    %c1_565 = arith.constant 1 : index
    %c0_566 = arith.constant 0 : index
    %c0_567 = arith.constant 0 : index
    %946 = vector.load %arg11[%c1_565, %c0_566, %c0_567] : memref<2x64x32xf32, #tpu.memory_space<vmem>>, vector<1x64x32xf32>
    %947 = vector.shape_cast %946 : vector<1x64x32xf32> to vector<64x32xf32>
    %cst_568 = arith.constant dense<0.000000e+00> : vector<5x32xf32>
    %948 = tpu.matmul %945, %947, %cst_568 {dimension_numbers = #tpu.dot_dimension_numbers<[1], [0], [0], [1], [0, 0, 1, 1], [], []>} : vector<5x64xf32>, vector<64x32xf32>, vector<5x32xf32> -> vector<5x32xf32>
    %949 = vector.extract_strided_slice %731 {offsets = [5, 0], sizes = [1, 32], strides = [1, 1]} : vector<6x32xf32> to vector<1x32xf32>
    %950 = vector.broadcast %949 : vector<1x32xf32> to vector<5x32xf32>
    %951 = arith.addf %948, %950 : vector<5x32xf32>
    %952 = arith.addf %951, %906 : vector<5x32xf32>
    %953 = vector.extract_strided_slice %952 {offsets = [0, 0], sizes = [1, 32], strides = [1, 1]} : vector<5x32xf32> to vector<1x32xf32>
    %954 = tpu.concatenate %478, %953 in 0 : vector<1x32xf32>, vector<1x32xf32> -> vector<2x32xf32>
    %955 = vector.extract_strided_slice %0 {offsets = [2, 0], sizes = [1, 32], strides = [1, 1]} : vector<4x32xf32> to vector<1x32xf32>
    %956 = vector.extract_strided_slice %0 {offsets = [3, 0], sizes = [1, 32], strides = [1, 1]} : vector<4x32xf32> to vector<1x32xf32>
    %cst_569 = arith.constant dense<0.000000e+00> : vector<2xf32>
    %957 = vector.multi_reduction <add>, %954, %cst_569 [1] : vector<2x32xf32> to vector<2xf32>
    %958 = vector.shape_cast %957 : vector<2xf32> to vector<2x1xf32>
    %cst_570 = arith.constant 3.200000e+01 : f32
    %959 = vector.broadcast %cst_570 : f32 to vector<2x1xf32>
    %960 = arith.divf %958, %959 : vector<2x1xf32>
    %961 = vector.broadcast %960 : vector<2x1xf32> to vector<2x32xf32>
    %962 = arith.subf %954, %961 : vector<2x32xf32>
    %963 = arith.mulf %962, %962 : vector<2x32xf32>
    %cst_571 = arith.constant dense<0.000000e+00> : vector<2xf32>
    %964 = vector.multi_reduction <add>, %963, %cst_571 [1] : vector<2x32xf32> to vector<2xf32>
    %965 = vector.shape_cast %964 : vector<2xf32> to vector<2x1xf32>
    %cst_572 = arith.constant 3.200000e+01 : f32
    %966 = vector.broadcast %cst_572 : f32 to vector<2x1xf32>
    %967 = arith.divf %965, %966 : vector<2x1xf32>
    %968 = vector.broadcast %960 : vector<2x1xf32> to vector<2x32xf32>
    %969 = arith.subf %954, %968 : vector<2x32xf32>
    %cst_573 = arith.constant 9.99999974E-6 : f32
    %970 = vector.broadcast %cst_573 : f32 to vector<2x1xf32>
    %971 = arith.addf %967, %970 : vector<2x1xf32>
    %972 = math.rsqrt %971 : vector<2x1xf32>
    %973 = vector.broadcast %972 : vector<2x1xf32> to vector<2x32xf32>
    %974 = arith.mulf %969, %973 : vector<2x32xf32>
    %975 = vector.broadcast %955 : vector<1x32xf32> to vector<2x32xf32>
    %976 = arith.mulf %974, %975 : vector<2x32xf32>
    %977 = vector.broadcast %956 : vector<1x32xf32> to vector<2x32xf32>
    %978 = arith.addf %976, %977 : vector<2x32xf32>
    %cst_574 = arith.constant dense<0.000000e+00> : vector<2x16xf32>
    %979 = tpu.matmul %978, %3, %cst_574 {dimension_numbers = #tpu.dot_dimension_numbers<[1], [0], [0], [1], [0, 0, 1, 1], [], []>} : vector<2x32xf32>, vector<32x16xf32>, vector<2x16xf32> -> vector<2x16xf32>
    %c0_575 = arith.constant 0 : index
    %c0_576 = arith.constant 0 : index
    %980 = vector.load %arg13[%c0_575, %c0_576] : memref<2x16xf32, #tpu.memory_space<vmem>>, vector<2x16xf32>
    tpu.vector_store %arg13[%c0_575, %c0_576], %979 {strides = array<i32>} : memref<2x16xf32, #tpu.memory_space<vmem>>, vector<2x16xf32>,
    return
  }
  func.func @transform_0(%arg0: i32) -> (i32, i32, i32) {
    %c0_i32 = arith.constant 0 : i32
    %c0_i32_0 = arith.constant 0 : i32
    %c0_i32_1 = arith.constant 0 : i32
    %c0_i32_2 = arith.constant 0 : i32
    return %c0_i32, %c0_i32_0, %c0_i32_1 : i32, i32, i32
  }
  func.func @transform_1(%arg0: i32) -> (i32, i32) {
    %c0_i32 = arith.constant 0 : i32
    %c0_i32_0 = arith.constant 0 : i32
    %c0_i32_1 = arith.constant 0 : i32
    return %c0_i32, %c0_i32_0 : i32, i32
  }
  func.func @transform_2(%arg0: i32) -> (i32, i32) {
    %c0_i32 = arith.constant 0 : i32
    %c0_i32_0 = arith.constant 0 : i32
    %c0_i32_1 = arith.constant 0 : i32
    return %c0_i32, %c0_i32_0 : i32, i32
  }
  func.func @transform_3(%arg0: i32) -> (i32, i32) {
    %c0_i32 = arith.constant 0 : i32
    %c0_i32_0 = arith.constant 0 : i32
    %c0_i32_1 = arith.constant 0 : i32
    return %c0_i32, %c0_i32_0 : i32, i32
  }
  func.func @transform_4(%arg0: i32) -> (i32, i32, i32) {
    %c0_i32 = arith.constant 0 : i32
    %c0_i32_0 = arith.constant 0 : i32
    %c0_i32_1 = arith.constant 0 : i32
    %c0_i32_2 = arith.constant 0 : i32
    return %c0_i32, %c0_i32_0, %c0_i32_1 : i32, i32, i32
  }
  func.func @transform_5(%arg0: i32) -> (i32, i32, i32) {
    %c0_i32 = arith.constant 0 : i32
    %c0_i32_0 = arith.constant 0 : i32
    %c0_i32_1 = arith.constant 0 : i32
    %c0_i32_2 = arith.constant 0 : i32
    return %c0_i32, %c0_i32_0, %c0_i32_1 : i32, i32, i32
  }
  func.func @transform_6(%arg0: i32) -> (i32, i32, i32) {
    %c0_i32 = arith.constant 0 : i32
    %c0_i32_0 = arith.constant 0 : i32
    %c0_i32_1 = arith.constant 0 : i32
    %c0_i32_2 = arith.constant 0 : i32
    return %c0_i32, %c0_i32_0, %c0_i32_1 : i32, i32, i32
  }
  func.func @transform_7(%arg0: i32) -> (i32, i32, i32) {
    %c0_i32 = arith.constant 0 : i32
    %c0_i32_0 = arith.constant 0 : i32
    %c0_i32_1 = arith.constant 0 : i32
    %c0_i32_2 = arith.constant 0 : i32
    return %c0_i32, %c0_i32_0, %c0_i32_1 : i32, i32, i32
  }
  func.func @transform_8(%arg0: i32) -> (i32, i32, i32) {
    %c0_i32 = arith.constant 0 : i32
    %c0_i32_0 = arith.constant 0 : i32
    %c0_i32_1 = arith.constant 0 : i32
    %c0_i32_2 = arith.constant 0 : i32
    return %c0_i32, %c0_i32_0, %c0_i32_1 : i32, i32, i32
  }
  func.func @transform_9(%arg0: i32) -> (i32, i32, i32) {
    %c0_i32 = arith.constant 0 : i32
    %c0_i32_0 = arith.constant 0 : i32
    %c0_i32_1 = arith.constant 0 : i32
    %c0_i32_2 = arith.constant 0 : i32
    return %c0_i32, %c0_i32_0, %c0_i32_1 : i32, i32, i32
  }
  func.func @transform_10(%arg0: i32) -> (i32, i32, i32) {
    %c0_i32 = arith.constant 0 : i32
    %c0_i32_0 = arith.constant 0 : i32
    %c0_i32_1 = arith.constant 0 : i32
    %c0_i32_2 = arith.constant 0 : i32
    return %c0_i32, %c0_i32_0, %c0_i32_1 : i32, i32, i32
  }
  func.func @transform_11(%arg0: i32) -> (i32, i32) {
    %c0_i32 = arith.constant 0 : i32
    %c0_i32_0 = arith.constant 0 : i32
    %c0_i32_1 = arith.constant 0 : i32
    return %c0_i32, %c0_i32_0 : i32, i32
  }
  func.func @transform_12(%arg0: i32) -> (i32, i32) {
    %c0_i32 = arith.constant 0 : i32
    %c0_i32_0 = arith.constant 0 : i32
    %c0_i32_1 = arith.constant 0 : i32
    return %c0_i32, %c0_i32_0 : i32, i32
  }
}

</mosaic_0001>

<bundles_post_ra>
// kernel: clip_image_encoder.1
= control target key start
LH: loop header
LB: loop body
LE: loop exit
PB: predicated region body
PF: predicated region fallthrough
CT: control target
= control target key end

     0   :  { %v12829_v3 = vmov 0.0|0.0   ;;  %vm74_vm0 = vcmask 523264   ;;  %s12809_s0 = inlined_call_operand.vmem [shape: f32[2,5,192], index: 0, kind: input, shape index: {}]   ;;  %s12810_s1 = inlined_call_operand.vmem [shape: f32[192,32], index: 1, kind: input, shape index: {}]   ;;  %s12811_s2 = inlined_call_operand.vmem [shape: f32[5,32], index: 2, kind: input, shape index: {}]   ;;  %s12812_s3 = inlined_call_operand.vmem [shape: f32[4,32], index: 3, kind: input, shape index: {}]   ;;  %s12813_s4 = inlined_call_operand.vmem [shape: f32[2,6,32], index: 4, kind: input, shape index: {}]   ;;  %s12814_s5 = inlined_call_operand.vmem [shape: f32[2,1,64], index: 5, kind: input, shape index: {}]   ;;  %s12815_s6 = inlined_call_operand.vmem [shape: f32[24,1,8], index: 6, kind: input, shape index: {}]   ;;  %s12816_s7 = inlined_call_operand.vmem [shape: f32[24,32,8], index: 7, kind: input, shape index: {}]   ;;  %s12817_s8 = inlined_call_operand.vmem [shape: f32[8,8,32], index: 8, kind: input, shape index: {}]   ;;  %s12818_s9 = inlined_call_operand.vmem [shape: f32[2,32,64], index: 9, kind: input, shape index: {}]   ;;  %s12819_s10 = inlined_call_operand.vmem [shape: f32[2,64,32], index: 10, kind: input, shape index: {}]   ;;  %s12820_s11 = inlined_call_operand.vmem [shape: f32[32,16], index: 11, kind: input, shape index: {}]   ;;  %s12821_s12 = inlined_call_operand.hbm [shape: f32[2,16], index: 12, kind: output, shape index: {}]  }
   0x1   :  { %v43_v0 = vld [vmem:[%s12810_s1] sm:$0xff]  ;;  %v44_v1 = vld [vmem:[%s12810_s1 + $0x8] sm:$0xff]  ;;  %v45_v2 = vld [vmem:[%s12810_s1 + $0x10] sm:$0xff]  ;;  %10315 = vmatprep.subr.bf16.mxu0 %v12829_v3  ;;  %10351 = vmatprep.subr.bf16.mxu1 %v12829_v3 }
   0x2   :  { %v11027_v4 = vpack.c.bf16 %v44_v1, %v43_v0  ;;  %v46_v5 = vld [vmem:[%s12810_s1 + $0x18] sm:$0xff]  ;;  %v47_v7 = vld [vmem:[%s12810_s1 + $0x20] sm:$0xff]  ;;  %v48_v8 = vld [vmem:[%s12810_s1 + $0x28] sm:$0xff] }
   0x3   :  { %v11034_v6 = vpack.c.bf16 %v46_v5, %v45_v2  ;;  %v11044_v9 = vpack.c.bf16 %v48_v8, %v47_v7  ;;  %v49_v10 = vld [vmem:[%s12810_s1 + $0x30] sm:$0xff]  ;;  %v50_v11 = vld [vmem:[%s12810_s1 + $0x38] sm:$0xff]  ;;  %v73_v12 = vld [vmem:[%s12809_s0 + $0x8] sm:$0x1f] }
   0x4   :  { %10317 = vmatpush1.bf16.msra.mxu0 %v11027_v4  ;;  %8712 = vmatprep.mubr.msk.f32.mxu0 %vm74_vm0, %v73_v12 }
   0x5   :  { %10318 = vmatprep.subr.bf16.mxu0 %v12829_v3 }
   0x8   :  { %10320 = vmatpush1.bf16.msra.mxu0 %v11034_v6 }
   0x9   :  { %10321 = vmatprep.subr.bf16.mxu0 %v12829_v3 }
   0xa   :  { %17 = vsyncpa [#allocation3], 0  ;;  %v11058_v13 = vpack.c.bf16 %v50_v11, %v49_v10  ;;  %v51_v14 = vld [vmem:[%s12810_s1 + $0x40] sm:$0xff]  ;;  %v52_v15 = vld [vmem:[%s12810_s1 + $0x48] sm:$0xff]  ;;  %vm148_vm1 = vcmask 258048   ;;  %v163_v51 = vlaneseq  ;;  %vm10949_vm2 = vmmov 0  }
   0xb   :  { %v11068_v16 = vpack.c.bf16 %v52_v15, %v51_v14  ;;  %v53_v17 = vld [vmem:[%s12810_s1 + $0x50] sm:$0xff]  ;;  %v54_v18 = vld [vmem:[%s12810_s1 + $0x58] sm:$0xff]  ;;  %v55_v20 = vld [vmem:[%s12810_s1 + $0x60] sm:$0xff]  ;;  %vm213_vm3 = vcmask 261120   ;;  %vm453_vm4 = vcmask 64512   ;;  %vm546_vm5 = vcmask 1044480  }
   0xc   :  { %10323 = vmatpush1.bf16.msra.mxu0 %v11044_v9  ;;  %v11078_v19 = vpack.c.bf16 %v54_v18, %v53_v17  ;;  %v56_v21 = vld [vmem:[%s12810_s1 + $0x68] sm:$0xff]  ;;  %v57_v23 = vld [vmem:[%s12810_s1 + $0x70] sm:$0xff]  ;;  %v58_v24 = vld [vmem:[%s12810_s1 + $0x78] sm:$0xff]  ;;  %v11151_v53 = vshrl.u32 %v163_v51, 7  ;;  %vm530_vm6 = vcmask 36864   ;;  %vm542_vm7 = vcmask 39936  }
   0xd   :  { %10324 = vmatprep.subr.bf16.mxu0 %v12829_v3  ;;  %v11088_v22 = vpack.c.bf16 %v56_v21, %v55_v20  ;;  %v11098_v25 = vpack.c.bf16 %v58_v24, %v57_v23  ;;  %v59_v26 = vld [vmem:[%s12810_s1 + $0x80] sm:$0xff]  ;;  %v60_v27 = vld [vmem:[%s12810_s1 + $0x88] sm:$0xff]  ;;  %v61_v29 = vld [vmem:[%s12810_s1 + $0x90] sm:$0xff]  ;;  %vm8597_vm8 = vcmask 1040384   ;;  %vm8599_vm9 = vcmask 254976  }
   0xe   :  { %v11108_v28 = vpack.c.bf16 %v60_v27, %v59_v26  ;;  %v62_v30 = vld [vmem:[%s12810_s1 + $0x98] sm:$0xff]  ;;  %v63_v32 = vld [vmem:[%s12810_s1 + $0xa0] sm:$0xff]  ;;  %v64_v33 = vld [vmem:[%s12810_s1 + $0xa8] sm:$0xff]  ;;  %v11154_v54 = vsub.s32 0, %v11151_v53  ;;  %v11160_v56 = vsub.s32 1, %v11151_v53  ;;  %v12823_v26 = vmov 0.0  }
   0xf   :  { %v11118_v31 = vpack.c.bf16 %v62_v30, %v61_v29  ;;  %v11128_v34 = vpack.c.bf16 %v64_v33, %v63_v32  ;;  %v65_v35 = vld [vmem:[%s12810_s1 + $0xb0] sm:$0xff]  ;;  %v66_v36 = vld [vmem:[%s12810_s1 + $0xb8] sm:$0xff]  ;;  %v72_v38 = vld [vmem:[%s12809_s0] sm:$0x1f]  ;;  %9424 = vmatprep.mubr.msk.f32.mxu1 %vm10949_vm2, %v12823_v26  ;;  %vm8696_vm10 = vcmask 123904  }
  0x10   :  { %10326 = vmatpush1.bf16.msra.mxu0 %v11058_v13  ;;  %v11138_v37 = vpack.c.bf16 %v66_v36, %v65_v35  ;;  %v67_v39 = vld [vmem:[%s12811_s2] sm:$0x1f]  ;;  %v203_v10 = vld [vmem:[%s12816_s7 + $0x8] sm:$0xff]  ;;  %v204_v17 = vld [vmem:[%s12816_s7 + $0x10] sm:$0xff] }
  0x11   :  { %10327 = vmatprep.subr.bf16.mxu0 %v12829_v3  ;;  %v42_v55 = vld [vmem:[%s12812_s3] sm:$0xf]  ;;  %v8749_v14 = vld [vmem:[%s12816_s7 + $0x128] sm:$0xff]  ;;  %v205_v18 = vld [vmem:[%s12816_s7 + $0x18] sm:$0xff] }
  0x12   :  { %v11163_v57 = vrot.slane %v42_v55, %v11154_v54  ;;  %v11166_v60 = vrot.slane %v42_v55, %v11160_v56  ;;  %v202_v8 = vld [vmem:[%s12816_s7] sm:$0xff]  ;;  %v8750_v20 = vld [vmem:[%s12816_s7 + $0x130] sm:$0xff]  ;;  %v11205_v21 = vpack.c.bf16 %v205_v18, %v204_v17  ;;  %v8751_v23 = vld [vmem:[%s12816_s7 + $0x138] sm:$0xff] }
  0x13   :  { %v8748_v11 = vld [vmem:[%s12816_s7 + $0x120] sm:$0xff]  ;;  %v11185_v12 = vpack.c.bf16 %v203_v10, %v202_v8  ;;  %v11210_v24 = vpack.c.bf16 %v8751_v23, %v8750_v20  ;;  %v8790_v18 = vld [vmem:[%s12816_s7 + $0x70] sm:$0xff]  ;;  %v8791_v20 = vld [vmem:[%s12816_s7 + $0x78] sm:$0xff] }
  0x14   :  { %10329 = vmatpush1.bf16.msra.mxu0 %v11068_v16  ;;  %v11190_v15 = vpack.c.bf16 %v8749_v14, %v8748_v11  ;;  %v11223_v32 = vld [vmem:[%s12813_s4] sm:$0x3f]  ;;  %v8789_v14 = vld [vmem:[%s12816_s7 + $0x68] sm:$0xff]  ;;  %v11352_v23 = vpack.c.bf16 %v8791_v20, %v8790_v18 }
  0x15   :  { %10330 = vmatprep.subr.bf16.mxu0 %v12829_v3  ;;  %10353 = vmatpush3.bf16.msra.mxu1 %v11185_v12  ;;  %v11227_v33 = vrot.slane %v11223_v32, %v11154_v54  ;;  %v8715_v36 = vld [vmem:[%s12816_s7 + $0x80] sm:$0xff] }
  0x16   :  { %10354 = vmatprep.subr.bf16.mxu1 %v12829_v3  ;;  %v8722_v55 = vld [vmem:[%s12816_s7 + $0x100] sm:$0xff] }
  0x17   :  { %v8788_v11 = vld [vmem:[%s12816_s7 + $0x60] sm:$0xff] }
  0x18   :  { %10332 = vmatpush1.bf16.msra.mxu0 %v11078_v19  ;;  %v11337_v17 = vpack.c.bf16 %v8789_v14, %v8788_v11 }
  0x19   :  { %10333 = vmatprep.subr.bf16.mxu0 %v12829_v3  ;;  %10356 = vmatpush3.bf16.msra.mxu1 %v11205_v21 }
  0x1a   :  { %10357 = vmatprep.subr.bf16.mxu1 %v12829_v3 }
  0x1c   :  { %10335 = vmatpush1.bf16.msra.mxu0 %v11088_v22 }
  0x1d   :  { %10336 = vmatprep.subr.bf16.mxu0 %v12829_v3 }
  0x20   :  { %10338 = vmatpush1.bf16.msra.mxu0 %v11098_v25 }
  0x21   :  { %10339 = vmatprep.subr.bf16.mxu0 %v12829_v3 }
  0x24   :  { %10341 = vmatpush1.bf16.msra.mxu0 %v11108_v28 }
  0x25   :  { %10342 = vmatprep.subr.bf16.mxu0 %v12829_v3 }
  0x28   :  { %10344 = vmatpush1.bf16.msra.mxu0 %v11118_v31 }
  0x29   :  { %10345 = vmatprep.subr.bf16.mxu0 %v12829_v3 }
  0x2c   :  { %10347 = vmatpush1.bf16.msra.mxu0 %v11128_v34 }
  0x2d   :  { %10348 = vmatprep.subr.bf16.mxu0 %v12829_v3 }
  0x30   :  { %10350 = vmatpush1.bf16.msra.mxu0 %v11138_v37 }
  0x31   :  { %10381 = vmatprep.subr.bf16.mxu0 %v12829_v3 }
  0x33   :  { %143 = vmatmul.mubr.f32.vlgmr.msra.gmra.mrb[0].mxu0 %v72_v38  ;;  %v11234_v38 = vrot.slane %v11223_v32, %v11160_v56 }
  0x34   :  { %10383 = vmatpush3.bf16.msra.mxu0 %v11190_v15  ;;  %9494 = vmatprep.mubr.msk.f32.mxu0 %vm10949_vm2, %v12823_v26 }
  0x35   :  { %10384 = vmatprep.subr.bf16.mxu0 %v12829_v3 }
  0x38   :  { %10386 = vmatpush3.bf16.msra.mxu0 %v11210_v24 }
  0x39   :  { %10387 = vmatprep.subr.bf16.mxu0 %v12829_v3 }
 0x106   :  { %v144_v40 = vpop.f32.mrb[0].mxu0 }
 0x107   :  { %v145_v41 = vadd.f32 %v144_v40, %v67_v39  ;;  %v146_v42 = vpop.f32.mrb[1].mxu0  ;;  %v8716_v40 = vld [vmem:[%s12816_s7 + $0x88] sm:$0xff] }
 0x108   :  { %v8762_v42 = vld [vmem:[%s12816_s7 + $0x48] sm:$0xff] }
 0x109   :  { %v149_v43 = vsel %vm148_vm1, %v145_v41, 0.0 }
 0x10a   :  { %150 = vadd.xlane.f32.xlu0 %v149_v43 }
 0x197   :  { %v151_v44 = vpop.xlane.xlu0 %150 }
 0x198   :  { %v153_v45 = vmul.f32 0.03125, %v151_v44  ;;  %v11246_v44 = vpack.c.bf16 %v8716_v40, %v8715_v36  ;;  %v8805_v36 = vld [vmem:[%s12816_s7 + $0x178] sm:$0xff] }
 0x19a   :  { %v154_v46 = vsub.f32 %v145_v41, %v153_v45  ;;  %v8761_v41 = vld [vmem:[%s12816_s7 + $0x40] sm:$0xff] }
 0x19b   :  { %v11248_v45 = vpack.c.bf16 %v8762_v42, %v8761_v41 }
 0x19c   :  { %v155_v47 = vmul.f32 %v154_v46, %v154_v46 }
 0x19e   :  { %v156_v48 = vsel %vm148_vm1, %v155_v47, 0.0 }
 0x19f   :  { %157 = vadd.xlane.f32.xlu0 %v156_v48  ;;  %v8718_v48 = vld [vmem:[%s12816_s7 + $0x98] sm:$0xff] }
 0x22c   :  { %v158_v49 = vpop.xlane.xlu0 %157 }
 0x22d   :  { %v159_v50 = vmul.f32 0.03125, %v158_v49  ;;  %v8763_v49 = vld [vmem:[%s12816_s7 + $0x50] sm:$0xff] }
 0x22f   :  { %v160_v52 = vadd.f32 1e-05, %v159_v50  ;;  %v8764_v50 = vld [vmem:[%s12816_s7 + $0x58] sm:$0xff] }
 0x231   :  { %10785 = vrsqrt.f32 %v160_v52  ;;  %v11273_v52 = vpack.c.bf16 %v8764_v50, %v8763_v49  ;;  %v8713_v50 = vld [vmem:[%s12815_s6] ss:$0 sm:$0xff] }
 0x23b   :  { %v10786_v58 = vpop.eup %10785 }
 0x23c   :  { %v162_v59 = vmul.f32 %v10786_v58, %v154_v46  ;;  %v8717_v46 = vld [vmem:[%s12816_s7 + $0x90] sm:$0xff]  ;;  %v8723_v58 = vld [vmem:[%s12816_s7 + $0x108] sm:$0xff] }
 0x23d   :  { %v11271_v51 = vpack.c.bf16 %v8718_v48, %v8717_v46  ;;  %v8720_v46 = vld [vmem:[%s12815_s6 + $0x4] ss:$0 sm:$0xff] }
 0x23e   :  { %v167_v61 = vmul.f32 %v11163_v57, %v162_v59  ;;  %v8775_v59 = vld [vmem:[%s12816_s7 + $0x140] sm:$0xff] }
 0x240   :  { %v11170_v62 = vadd.f32 %v11166_v60, %v167_v61  ;;  %v8776_v61 = vld [vmem:[%s12816_s7 + $0x148] sm:$0xff] }
 0x242   :  { %v174_v63 = vsel %vm148_vm1, %v11170_v62, 0.0 }
 0x243   :  { %175 = vadd.xlane.f32.xlu1 %v174_v63  ;;  %v11295_v63 = vpack.c.bf16 %v8723_v58, %v8722_v55 }
 0x2d0   :  { %v176_v0 = vpop.xlane.xlu1 %175 }
 0x2d1   :  { %v177_v1 = vmul.f32 0.03125, %v176_v0  ;;  %v11297_v0 = vpack.c.bf16 %v8776_v61, %v8775_v59 }
 0x2d3   :  { %v178_v2 = vsub.f32 %v11170_v62, %v177_v1  ;;  %v8724_v1 = vld [vmem:[%s12816_s7 + $0x110] sm:$0xff] }
 0x2d5   :  { %v179_v5 = vmul.f32 %v178_v2, %v178_v2 }
 0x2d7   :  { %v180_v7 = vsel %vm148_vm1, %v179_v5, 0.0  ;;  %v8777_v5 = vld [vmem:[%s12816_s7 + $0x150] sm:$0xff] }
 0x2d8   :  { %181 = vadd.xlane.f32.xlu1 %v180_v7  ;;  %v8778_v7 = vld [vmem:[%s12816_s7 + $0x158] sm:$0xff] }
 0x2d9   :  { %v11321_v10 = vpack.c.bf16 %v8778_v7, %v8777_v5 }
 0x365   :  { %v182_v27 = vpop.xlane.xlu1 %181 }
 0x366   :  { %v183_v29 = vmul.f32 0.03125, %v182_v27  ;;  %v8802_v27 = vld [vmem:[%s12816_s7 + $0x160] sm:$0xff] }
 0x368   :  { %v184_v30 = vadd.f32 1e-05, %v183_v29  ;;  %v8803_v29 = vld [vmem:[%s12816_s7 + $0x168] sm:$0xff] }
 0x36a   :  { %10787 = vrsqrt.f32 %v184_v30  ;;  %v11366_v30 = vpack.c.bf16 %v8803_v29, %v8802_v27  ;;  %v8807_v27 = vld [vmem:[%s12815_s6 + $0xb] ss:$0 sm:$0xff] }
 0x374   :  { %v10788_v35 = vpop.eup %10787 }
 0x375   :  { %v186_v39 = vmul.f32 %v10788_v35, %v178_v2  ;;  %v8725_v2 = vld [vmem:[%s12816_s7 + $0x118] sm:$0xff]  ;;  %v8804_v35 = vld [vmem:[%s12816_s7 + $0x170] sm:$0xff] }
 0x376   :  { %v11319_v8 = vpack.c.bf16 %v8725_v2, %v8724_v1  ;;  %v8727_v1 = vld [vmem:[%s12815_s6 + $0x8] ss:$0 sm:$0xff] }
 0x377   :  { %v191_v43 = vmul.f32 %v11227_v33, %v186_v39  ;;  %v11378_v39 = vpack.c.bf16 %v8805_v36, %v8804_v35 }
 0x379   :  { %v11254_v47 = vadd.f32 %v11234_v38, %v191_v43 }
 0x37b   :  { %9425 = vmatmul.mubr.msk.f32.vlgmr.msra.gmra.mrb[0].mxu1 %vm213_vm3, %v11254_v47  ;;  %9495 = vmatmul.mubr.msk.f32.vlgmr.msra.gmra.mrb[2].mxu0 %vm213_vm3, %v11254_v47 }
 0x37c   :  { %10359 = vmatpush3.bf16.msra.mxu1 %v11246_v44  ;;  %10389 = vmatpush3.bf16.msra.mxu0 %v11248_v45 }
 0x37d   :  { %10360 = vmatprep.subr.bf16.mxu1 %v12829_v3  ;;  %10390 = vmatprep.subr.bf16.mxu0 %v12829_v3 }
 0x37e   :  { %9435 = vmatprep.mubr.msk.f32.mxu1 %vm10949_vm2, %v12823_v26  ;;  %9520 = vmatprep.mubr.msk.f32.mxu0 %vm10949_vm2, %v12823_v26 }
 0x380   :  { %10362 = vmatpush3.bf16.msra.mxu1 %v11271_v51  ;;  %10392 = vmatpush3.bf16.msra.mxu0 %v11273_v52 }
 0x381   :  { %10363 = vmatprep.subr.bf16.mxu1 %v12829_v3  ;;  %10399 = vmatprep.subr.bf16.mxu0 %v12829_v3 }
 0x383   :  { %9436 = vmatmul.mubr.msk.f32.vlgmr.msra.gmra.mrb[2].mxu1 %vm213_vm3, %v11254_v47  ;;  %9521 = vmatmul.mubr.msk.f32.vlgmr.msra.gmra.mrb[4].mxu0 %vm213_vm3, %v11254_v47 }
 0x384   :  { %10365 = vmatpush3.bf16.msra.mxu1 %v11295_v63  ;;  %10401 = vmatpush3.bf16.msra.mxu0 %v11297_v0 }
 0x385   :  { %10366 = vmatprep.subr.bf16.mxu1 %v12829_v3  ;;  %10402 = vmatprep.subr.bf16.mxu0 %v12829_v3 }
 0x386   :  { %9446 = vmatprep.mubr.msk.f32.mxu1 %vm10949_vm2, %v12823_v26  ;;  %9542 = vmatprep.mubr.msk.f32.mxu0 %vm10949_vm2, %v12823_v26 }
 0x388   :  { %10368 = vmatpush3.bf16.msra.mxu1 %v11319_v8  ;;  %10404 = vmatpush3.bf16.msra.mxu0 %v11321_v10 }
 0x389   :  { %10405 = vmatprep.subr.bf16.mxu0 %v12829_v3  ;;  %9449 = vmatprep.subr.mxu1 %v12823_v26 }
 0x38b   :  { %9447 = vmatmul.mubr.msk.f32.vlgmr.msra.gmra.mrb[4].mxu1 %vm213_vm3, %v11254_v47  ;;  %9543 = vmatmul.mubr.msk.f32.vlgmr.msra.gmra.mrb[6].mxu0 %vm213_vm3, %v11254_v47 }
 0x38c   :  { %10407 = vmatpush3.bf16.msra.mxu0 %v11337_v17  ;;  %9568 = vmatprep.mubr.msk.f32.mxu0 %vm10949_vm2, %v12823_v26 }
 0x38d   :  { %10408 = vmatprep.subr.bf16.mxu0 %v12829_v3  ;;  %9451 = vmatprep.mubr.msk.f32.mxu1 %vm10949_vm2, %v12823_v26 }
 0x390   :  { %10410 = vmatpush3.bf16.msra.mxu0 %v11352_v23 }
 0x391   :  { %10417 = vmatprep.subr.bf16.mxu0 %v12829_v3 }
 0x393   :  { %9569 = vmatmul.mubr.msk.f32.vlgmr.msra.gmra.mrb[8].mxu0 %vm213_vm3, %v11254_v47 }
 0x394   :  { %10419 = vmatpush3.bf16.msra.mxu0 %v11366_v30  ;;  %9590 = vmatprep.mubr.msk.f32.mxu0 %vm10949_vm2, %v12823_v26 }
 0x395   :  { %10420 = vmatprep.subr.bf16.mxu0 %v12829_v3 }
 0x398   :  { %10422 = vmatpush3.bf16.msra.mxu0 %v11378_v39 }
 0x399   :  { %9598 = vmatprep.subr.mxu0 %v12823_v26 }
 0x39b   :  { %9591 = vmatmul.mubr.msk.f32.vlgmr.msra.gmra.mrb[10].mxu0 %vm213_vm3, %v11254_v47 }
 0x39c   :  { %9600 = vmatprep.mubr.msk.f32.mxu0 %vm10949_vm2, %v12823_v26 }
 0x44e   :  { %v283_v40 = vpop.f32.mrb[0].mxu1  ;;  %v11389_v41 = vpop.f32.mrb[2].mxu0 }
 0x44f   :  { %v9426_v42 = vpop.f32.mrb[1].mxu1  ;;  %v9496_v43 = vpop.f32.mrb[3].mxu0  ;;  %v284_v61 = vadd.f32 %v8713_v50, %v283_v40 }
 0x456   :  { %v366_v48 = vpop.f32.mrb[2].mxu1  ;;  %v11394_v49 = vpop.f32.mrb[4].mxu0 }
 0x457   :  { %v367_v55 = vadd.f32 %v8720_v46, %v366_v48  ;;  %v9437_v58 = vpop.f32.mrb[3].mxu1  ;;  %v9522_v59 = vpop.f32.mrb[5].mxu0 }
 0x459   :  { %9450 = vmatpush3.xpose.msk.msra.mxu1 %vm453_vm4, %v367_v55 }
 0x45a   :  { %9454 = vmatprep.subr.mxu1 %v12823_v26 }
 0x45c   :  { %9452 = vmatmul.mubr.msk.f32.vlgmr.msra.gmra.mrb[6].mxu1 %vm453_vm4, %v284_v61 }
 0x45d   :  { %9456 = vmatprep.mubr.msk.f32.mxu1 %vm10949_vm2, %v12823_v26 }
 0x45e   :  { %v449_v2 = vpop.f32.mrb[4].mxu1  ;;  %v11407_v5 = vpop.f32.mrb[6].mxu0 }
 0x45f   :  { %v450_v7 = vadd.f32 %v8727_v1, %v449_v2  ;;  %v9448_v11 = vpop.f32.mrb[5].mxu1  ;;  %v9544_v14 = vpop.f32.mrb[7].mxu0  ;;  %v620_v2 = vld [vmem:[%s12817_s8] sm:$0xff] }
 0x460   :  { %v8735_v11 = vld [vmem:[%s12816_s7 + $0x28] sm:$0xff] }
 0x461   :  { %9455 = vmatpush3.msk.msra.mxu1 %vm546_vm5, %v450_v7  ;;  %v8734_v7 = vld [vmem:[%s12816_s7 + $0x20] sm:$0xff] }
 0x462   :  { %9459 = vmatprep.subr.mxu1 %v12823_v26  ;;  %v11433_v14 = vpack.c.bf16 %v8735_v11, %v8734_v7  ;;  %v8753_v11 = vld [vmem:[%s12815_s6 + $0x9] ss:$0 sm:$0xff] }
 0x466   :  { %v11411_v18 = vpop.f32.mrb[8].mxu0 }
 0x467   :  { %v9570_v20 = vpop.f32.mrb[9].mxu0 }
 0x468   :  { %v8736_v20 = vld [vmem:[%s12816_s7 + $0x30] sm:$0xff] }
 0x46e   :  { %v1916_v29 = vpop.f32.mrb[10].mxu0 }
 0x46f   :  { %v1917_v35 = vadd.f32 %v8807_v27, %v1916_v29  ;;  %v9592_v36 = vpop.f32.mrb[11].mxu0  ;;  %v8737_v27 = vld [vmem:[%s12816_s7 + $0x38] sm:$0xff] }
 0x470   :  { %v11443_v36 = vpack.c.bf16 %v8737_v27, %v8736_v20  ;;  %v941_v27 = vadd.f32 %v8753_v11, %v11389_v41 }
 0x471   :  { %9599 = vmatpush3.msk.msra.mxu0 %vm546_vm5, %v1917_v35 }
 0x472   :  { %10423 = vmatprep.subr.bf16.mxu0 %v12829_v3 }
 0x52f   :  { %v526_v40 = vpop.f32.mrb[6].mxu1 }
 0x530   :  { %v9453_v42 = vpop.f32.mrb[7].mxu1  ;;  %v531_v43 = vsel %vm530_vm6, %v526_v40, -inf }
 0x531   :  { %532 = vmax.xlane.f32.xlu0 %v531_v43  ;;  %v8742_v42 = vld [vmem:[%s12816_s7 + $0xa8] sm:$0xff] }
 0x5be   :  { %v533_v46 = vpop.xlane.xlu0 %532 }
 0x5bf   :  { %v534_v48 = vsub.f32 %v526_v40, %v533_v46  ;;  %v8741_v40 = vld [vmem:[%s12816_s7 + $0xa0] sm:$0xff]  ;;  %v8743_v46 = vld [vmem:[%s12816_s7 + $0xb0] sm:$0xff] }
 0x5c0   :  { %v11455_v43 = vpack.c.bf16 %v8742_v42, %v8741_v40 }
 0x5c1   :  { %v535_v50 = vmul.f32 1.442695, %v534_v48  ;;  %v8744_v48 = vld [vmem:[%s12816_s7 + $0xb8] sm:$0xff] }
 0x5c3   :  { %10789 = vpow2.f32 %v535_v50  ;;  %v11467_v50 = vpack.c.bf16 %v8744_v48, %v8743_v46 }
 0x5cd   :  { %v10790_v55 = vpop.eup %10789 }
 0x5ce   :  { %v537_v58 = vsel %vm530_vm6, %v10790_v55, 0.0 }
 0x5cf   :  { %538 = vadd.xlane.f32.xlu1 %v537_v58 }
 0x65c   :  { %v539_v59 = vpop.xlane.xlu1 %538 }
 0x65d   :  { %10791 = vrcp.f32 %v539_v59  ;;  %v8746_v59 = vld [vmem:[%s12815_s6 + $0x5] ss:$0 sm:$0xff] }
 0x667   :  { %v10792_v61 = vpop.eup %10791 }
 0x668   :  { %v541_v1 = vmul.f32 %v10792_v61, %v10790_v55 }
 0x66a   :  { %9457 = vmatmul.mubr.msk.f32.vlgmr.msra.gmra.mrb[8].mxu1 %vm542_vm7, %v541_v1  ;;  %v8739_v1 = vld [vmem:[%s12815_s6 + $0x1] ss:$0 sm:$0xff] }
 0x66b   :  { %9460 = vmatpush3.msra.mxu1 %v620_v2  ;;  %9461 = vmatprep.mubr.msk.f32.mxu1 %vm10949_vm2, %v12823_v26 }
 0x66c   :  { %10369 = vmatprep.subr.bf16.mxu1 %v12829_v3 }
 0x73d   :  { %v616_v29 = vpop.f32.mrb[8].mxu1 }
 0x73e   :  { %v9458_v35 = vpop.f32.mrb[9].mxu1  ;;  %9462 = vmatmul.mubr.msk.f32.vlgmr.msra.gmra.mrb[10].mxu1 %vm453_vm4, %v616_v29 }
 0x73f   :  { %10371 = vmatpush3.bf16.msra.mxu1 %v11433_v14  ;;  %9472 = vmatprep.mubr.msk.f32.mxu1 %vm10949_vm2, %v12823_v26 }
 0x740   :  { %10372 = vmatprep.subr.bf16.mxu1 %v12829_v3 }
 0x743   :  { %10374 = vmatpush3.bf16.msra.mxu1 %v11443_v36 }
 0x744   :  { %10375 = vmatprep.subr.bf16.mxu1 %v12829_v3 }
 0x746   :  { %9473 = vmatmul.mubr.msk.f32.vlgmr.msra.gmra.mrb[12].mxu1 %vm213_vm3, %v11254_v47 }
 0x747   :  { %10377 = vmatpush3.bf16.msra.mxu1 %v11455_v43  ;;  %9483 = vmatprep.mubr.msk.f32.mxu1 %vm10949_vm2, %v12823_v26 }
 0x748   :  { %10378 = vmatprep.subr.bf16.mxu1 %v12829_v3 }
 0x74b   :  { %10380 = vmatpush3.bf16.msra.mxu1 %v11467_v50 }
 0x74c   :  { %9497 = vmatprep.subr.mxu1 %v12823_v26 }
 0x74e   :  { %9484 = vmatmul.mubr.msk.f32.vlgmr.msra.gmra.mrb[14].mxu1 %vm213_vm3, %v11254_v47 }
 0x74f   :  { %9499 = vmatprep.mubr.msk.f32.mxu1 %vm10949_vm2, %v12823_v26 }
 0x819   :  { %v774_v55 = vpop.f32.mrb[12].mxu1 }
 0x81a   :  { %v9474_v58 = vpop.f32.mrb[13].mxu1  ;;  %v775_v20 = vadd.f32 %v8739_v1, %v774_v55  ;;  %v8759_v1 = vld [vmem:[%s12817_s8 + $0x8] sm:$0xff] }
 0x821   :  { %v857_v61 = vpop.f32.mrb[14].mxu1 }
 0x822   :  { %v858_v2 = vadd.f32 %v8746_v59, %v857_v61  ;;  %v9485_v7 = vpop.f32.mrb[15].mxu1 }
 0x823   :  { %v8769_v7 = vld [vmem:[%s12816_s7 + $0xc8] sm:$0xff] }
 0x824   :  { %9498 = vmatpush3.xpose.msk.msra.mxu1 %vm453_vm4, %v858_v2  ;;  %v8768_v2 = vld [vmem:[%s12816_s7 + $0xc0] sm:$0xff] }
 0x825   :  { %9502 = vmatprep.subr.mxu1 %v12823_v26  ;;  %v11510_v11 = vpack.c.bf16 %v8769_v7, %v8768_v2 }
 0x827   :  { %9500 = vmatmul.mubr.msk.f32.vlgmr.msra.gmra.mrb[16].mxu1 %vm453_vm4, %v775_v20  ;;  %v8770_v20 = vld [vmem:[%s12816_s7 + $0xd0] sm:$0xff] }
 0x828   :  { %9503 = vmatpush3.msk.msra.mxu1 %vm546_vm5, %v941_v27  ;;  %9504 = vmatprep.mubr.msk.f32.mxu1 %vm10949_vm2, %v12823_v26  ;;  %v8771_v27 = vld [vmem:[%s12816_s7 + $0xd8] sm:$0xff] }
 0x829   :  { %9507 = vmatprep.subr.mxu1 %v12823_v26 }
 0x8fa   :  { %v1016_v29 = vpop.f32.mrb[16].mxu1 }
 0x8fb   :  { %v9501_v35 = vpop.f32.mrb[17].mxu1  ;;  %v1020_v40 = vsel %vm530_vm6, %v1016_v29, -inf }
 0x8fc   :  { %1021 = vmax.xlane.f32.xlu0 %v1020_v40  ;;  %v11520_v40 = vpack.c.bf16 %v8771_v27, %v8770_v20 }
 0x989   :  { %v1022_v42 = vpop.xlane.xlu0 %1021 }
 0x98a   :  { %v1023_v46 = vsub.f32 %v1016_v29, %v1022_v42  ;;  %v8773_v42 = vld [vmem:[%s12815_s6 + $0x6] ss:$0 sm:$0xff] }
 0x98c   :  { %v1024_v48 = vmul.f32 1.442695, %v1023_v46 }
 0x98e   :  { %10793 = vpow2.f32 %v1024_v48  ;;  %v8766_v48 = vld [vmem:[%s12815_s6 + $0x2] ss:$0 sm:$0xff] }
 0x998   :  { %v10794_v55 = vpop.eup %10793 }
 0x999   :  { %v1026_v41 = vsel %vm530_vm6, %v10794_v55, 0.0 }
 0x99a   :  { %1027 = vadd.xlane.f32.xlu1 %v1026_v41 }
 0xa27   :  { %v1028_v58 = vpop.xlane.xlu1 %1027 }
 0xa28   :  { %10795 = vrcp.f32 %v1028_v58  ;;  %v8780_v58 = vld [vmem:[%s12815_s6 + $0xa] ss:$0 sm:$0xff] }
 0xa32   :  { %v10796_v59 = vpop.eup %10795 }
 0xa33   :  { %v1030_v61 = vmul.f32 %v10796_v59, %v10794_v55  ;;  %v1263_v59 = vadd.f32 %v8766_v48, %v11394_v49  ;;  %v8786_v48 = vld [vmem:[%s12817_s8 + $0x10] sm:$0xff] }
 0xa35   :  { %9505 = vmatmul.mubr.msk.f32.vlgmr.msra.gmra.mrb[18].mxu1 %vm542_vm7, %v1030_v61  ;;  %v1429_v61 = vadd.f32 %v8780_v58, %v11407_v5 }
 0xa36   :  { %9508 = vmatpush3.msra.mxu1 %v8759_v1  ;;  %9509 = vmatprep.mubr.msk.f32.mxu1 %vm10949_vm2, %v12823_v26 }
 0xa37   :  { %10393 = vmatprep.subr.bf16.mxu1 %v12829_v3 }
 0xb08   :  { %v1103_v29 = vpop.f32.mrb[18].mxu1 }
 0xb09   :  { %v9506_v35 = vpop.f32.mrb[19].mxu1  ;;  %9510 = vmatmul.mubr.msk.f32.vlgmr.msra.gmra.mrb[10].mxu1 %vm453_vm4, %v1103_v29 }
 0xb0a   :  { %10395 = vmatpush3.bf16.msra.mxu1 %v11510_v11  ;;  %9531 = vmatprep.mubr.msk.f32.mxu1 %vm10949_vm2, %v12823_v26 }
 0xb0b   :  { %10396 = vmatprep.subr.bf16.mxu1 %v12829_v3 }
 0xb0e   :  { %10398 = vmatpush3.bf16.msra.mxu1 %v11520_v40 }
 0xb0f   :  { %9545 = vmatprep.subr.mxu1 %v12823_v26 }
 0xb11   :  { %9532 = vmatmul.mubr.msk.f32.vlgmr.msra.gmra.mrb[20].mxu1 %vm213_vm3, %v11254_v47 }
 0xb12   :  { %9547 = vmatprep.mubr.msk.f32.mxu1 %vm10949_vm2, %v12823_v26 }
 0xbe4   :  { %v1345_v46 = vpop.f32.mrb[20].mxu1 }
 0xbe5   :  { %v1346_v55 = vadd.f32 %v8773_v42, %v1345_v46  ;;  %v9533_v41 = vpop.f32.mrb[21].mxu1 }
 0xbe6   :  { %v8796_v41 = vld [vmem:[%s12816_s7 + $0xe8] sm:$0xff] }
 0xbe7   :  { %9546 = vmatpush3.xpose.msk.msra.mxu1 %vm453_vm4, %v1346_v55  ;;  %v8795_v55 = vld [vmem:[%s12816_s7 + $0xe0] sm:$0xff] }
 0xbe8   :  { %9550 = vmatprep.subr.mxu1 %v12823_v26  ;;  %v11564_v58 = vpack.c.bf16 %v8796_v41, %v8795_v55 }
 0xbea   :  { %9548 = vmatmul.mubr.msk.f32.vlgmr.msra.gmra.mrb[22].mxu1 %vm453_vm4, %v1263_v59  ;;  %v8797_v59 = vld [vmem:[%s12816_s7 + $0xf0] sm:$0xff] }
 0xbeb   :  { %9551 = vmatpush3.msk.msra.mxu1 %vm546_vm5, %v1429_v61  ;;  %9552 = vmatprep.mubr.msk.f32.mxu1 %vm10949_vm2, %v12823_v26  ;;  %v8798_v61 = vld [vmem:[%s12816_s7 + $0xf8] sm:$0xff] }
 0xbec   :  { %9555 = vmatprep.subr.mxu1 %v12823_v26 }
 0xcbd   :  { %v1504_v1 = vpop.f32.mrb[22].mxu1 }
 0xcbe   :  { %v9549_v2 = vpop.f32.mrb[23].mxu1  ;;  %v1508_v7 = vsel %vm530_vm6, %v1504_v1, -inf }
 0xcbf   :  { %1509 = vmax.xlane.f32.xlu0 %v1508_v7  ;;  %v11574_v7 = vpack.c.bf16 %v8798_v61, %v8797_v59 }
 0xd4c   :  { %v1510_v20 = vpop.xlane.xlu0 %1509 }
 0xd4d   :  { %v1511_v49 = vsub.f32 %v1504_v1, %v1510_v20  ;;  %v8800_v20 = vld [vmem:[%s12815_s6 + $0x7] ss:$0 sm:$0xff] }
 0xd4f   :  { %v1512_v27 = vmul.f32 1.442695, %v1511_v49 }
 0xd51   :  { %10797 = vpow2.f32 %v1512_v27  ;;  %v8793_v27 = vld [vmem:[%s12815_s6 + $0x3] ss:$0 sm:$0xff] }
 0xd5b   :  { %v10798_v29 = vpop.eup %10797 }
 0xd5c   :  { %v1514_v5 = vsel %vm530_vm6, %v10798_v29, 0.0 }
 0xd5d   :  { %1515 = vadd.xlane.f32.xlu1 %v1514_v5 }
 0xdea   :  { %v1516_v35 = vpop.xlane.xlu1 %1515 }
 0xdeb   :  { %10799 = vrcp.f32 %v1516_v35  ;;  %v1751_v35 = vadd.f32 %v8793_v27, %v11411_v18  ;;  %v8813_v18 = vld [vmem:[%s12817_s8 + $0x18] sm:$0xff] }
 0xdf5   :  { %v10800_v42 = vpop.eup %10799 }
 0xdf6   :  { %v1518_v46 = vmul.f32 %v10800_v42, %v10798_v29 }
 0xdf8   :  { %9553 = vmatmul.mubr.msk.f32.vlgmr.msra.gmra.mrb[24].mxu1 %vm542_vm7, %v1518_v46 }
 0xdf9   :  { %9556 = vmatpush3.msra.mxu1 %v8786_v48  ;;  %9557 = vmatprep.mubr.msk.f32.mxu1 %vm10949_vm2, %v12823_v26 }
 0xdfa   :  { %10411 = vmatprep.subr.bf16.mxu1 %v12829_v3 }
 0xecb   :  { %v1591_v1 = vpop.f32.mrb[24].mxu1 }
 0xecc   :  { %v9554_v2 = vpop.f32.mrb[25].mxu1  ;;  %9558 = vmatmul.mubr.msk.f32.vlgmr.msra.gmra.mrb[10].mxu1 %vm453_vm4, %v1591_v1 }
 0xecd   :  { %10413 = vmatpush3.bf16.msra.mxu1 %v11564_v58  ;;  %9579 = vmatprep.mubr.msk.f32.mxu1 %vm10949_vm2, %v12823_v26 }
 0xece   :  { %10414 = vmatprep.subr.bf16.mxu1 %v12829_v3 }
 0xed1   :  { %10416 = vmatpush3.bf16.msra.mxu1 %v11574_v7 }
 0xed2   :  { %9593 = vmatprep.subr.mxu1 %v12823_v26 }
 0xed4   :  { %9580 = vmatmul.mubr.msk.f32.vlgmr.msra.gmra.mrb[26].mxu1 %vm213_vm3, %v11254_v47 }
 0xed5   :  { %9595 = vmatprep.mubr.msk.f32.mxu1 %vm10949_vm2, %v12823_v26 }
 0xfa7   :  { %v1833_v49 = vpop.f32.mrb[26].mxu1 }
 0xfa8   :  { %v1834_v29 = vadd.f32 %v8800_v20, %v1833_v49  ;;  %v9581_v5 = vpop.f32.mrb[27].mxu1 }
 0xfaa   :  { %9594 = vmatpush3.xpose.msk.msra.mxu1 %vm453_vm4, %v1834_v29  ;;  %v12822_v29 = vsub.s32 4, %v11151_v53 }
 0xfab   :  { %9603 = vmatprep.subr.mxu1 %v12823_v26 }
 0xfac   :  { %v11613_v5 = vrot.slane %v11223_v32, %v12822_v29 }
 0xfad   :  { %9596 = vmatmul.mubr.msk.f32.vlgmr.msra.gmra.mrb[28].mxu1 %vm453_vm4, %v1751_v35 }
 0xfae   :  { %9605 = vmatprep.mubr.msk.f32.mxu1 %vm10949_vm2, %v12823_v26  ;;  %9604 = vmatpush3.msra.mxu1 %v8813_v18  ;;  %12860 = vst [vmem:[#allocation5_spill] sm:$0xff] %v11613_v5  ;;  %v201_v35 = vadd.f32 %v11613_v5, %v11170_v62  ;;  %v2182_v62 = vld [vmem:[%s12818_s9] sm:$0xff] }
 0xfaf   :  { %10429 = vmatprep.subr.bf16.mxu1 %v12829_v3 }
0x1080   :  { %v1992_v47 = vpop.f32.mrb[28].mxu1 }
0x1081   :  { %v9597_v42 = vpop.f32.mrb[29].mxu1  ;;  %v1996_v46 = vsel %vm530_vm6, %v1992_v47, -inf }
0x1082   :  { %1997 = vmax.xlane.f32.xlu0 %v1996_v46 }
0x110f   :  { %v1998_v48 = vpop.xlane.xlu0 %1997 }
0x1110   :  { %v1999_v55 = vsub.f32 %v1992_v47, %v1998_v48 }
0x1112   :  { %v2000_v41 = vmul.f32 1.442695, %v1999_v55 }
0x1114   :  { %10801 = vpow2.f32 %v2000_v41 }
0x111e   :  { %v10802_v59 = vpop.eup %10801 }
0x111f   :  { %v2002_v61 = vsel %vm530_vm6, %v10802_v59, 0.0 }
0x1120   :  { %2003 = vadd.xlane.f32.xlu1 %v2002_v61 }
0x11ad   :  { %v2004_v1 = vpop.xlane.xlu1 %2003 }
0x11ae   :  { %10803 = vrcp.f32 %v2004_v1  ;;  %v2183_v1 = vld [vmem:[%s12818_s9 + $0x8] sm:$0xff] }
0x11b8   :  { %v10804_v2 = vpop.eup %10803 }
0x11b9   :  { %v2006_v20 = vmul.f32 %v10804_v2, %v10802_v59  ;;  %v11629_v2 = vpack.c.bf16 %v2183_v1, %v2182_v62 }
0x11bb   :  { %9601 = vmatmul.mubr.msk.f32.vlgmr.msra.gmra.mrb[12].mxu0 %vm542_vm7, %v2006_v20  ;;  %v2184_v20 = vld [vmem:[%s12818_s9 + $0x10] sm:$0xff] }
0x11bc   :  { %9616 = vmatprep.mubr.msk.f32.mxu0 %vm10949_vm2, %v12823_v26  ;;  %10425 = vmatpush3.bf16.msra.mxu0 %v11629_v2 }
0x11bd   :  { %10426 = vmatprep.subr.bf16.mxu0 %v12829_v3 }
0x128e   :  { %v2079_v49 = vpop.f32.mrb[12].mxu0 }
0x128f   :  { %v9602_v27 = vpop.f32.mrb[13].mxu0  ;;  %9606 = vmatmul.mubr.msk.f32.vlgmr.msra.gmra.mrb[10].mxu1 %vm453_vm4, %v2079_v49  ;;  %v2185_v49 = vld [vmem:[%s12818_s9 + $0x18] sm:$0xff] }
0x1290   :  { %9635 = vmatprep.mubr.msk.f32.mxu1 %vm10949_vm2, %v12823_v26  ;;  %v11639_v27 = vpack.c.bf16 %v2185_v49, %v2184_v20  ;;  %v2274_v49 = vld [vmem:[%s12819_s10] sm:$0xff] }
0x1292   :  { %10428 = vmatpush3.bf16.msra.mxu0 %v11639_v27 }
0x1293   :  { %10441 = vmatprep.subr.bf16.mxu0 %v12829_v3 }
0x1362   :  { %v2154_v47 = vpop.f32.mrb[10].mxu1 }
0x1363   :  { %v11617_v42 = vadd.f32 %v2154_v47, %v201_v35  ;;  %v9607_v46 = vpop.f32.mrb[11].mxu1 }
0x1365   :  { %v2159_v48 = vsel %vm148_vm1, %v11617_v42, 0.0 }
0x1366   :  { %2160 = vadd.xlane.f32.xlu0 %v2159_v48  ;;  %v11644_v48 = vsub.s32 2, %v11151_v53 }
0x13f3   :  { %v2161_v55 = vpop.xlane.xlu0 %2160 }
0x13f4   :  { %v2162_v41 = vmul.f32 0.03125, %v2161_v55  ;;  %v11647_v55 = vsub.s32 3, %v11151_v53 }
0x13f6   :  { %v2163_v59 = vsub.f32 %v11617_v42, %v2162_v41  ;;  %v11651_v41 = vrot.slane %v11223_v32, %v11644_v48  ;;  %v11655_v62 = vrot.slane %v11223_v32, %v11647_v55 }
0x13f8   :  { %v2164_v61 = vmul.f32 %v2163_v59, %v2163_v59  ;;  %12861 = vst [vmem:[#allocation6_spill] sm:$0xff] %v11651_v41  ;;  %12862 = vst [vmem:[#allocation7_spill] sm:$0xff] %v11655_v62 }
0x13fa   :  { %v2165_v18 = vsel %vm148_vm1, %v2164_v61, 0.0 }
0x13fb   :  { %2166 = vadd.xlane.f32.xlu1 %v2165_v18 }
0x1488   :  { %v2167_v35 = vpop.xlane.xlu1 %2166 }
0x1489   :  { %v2168_v47 = vmul.f32 0.03125, %v2167_v35 }
0x148b   :  { %v2169_v46 = vadd.f32 1e-05, %v2168_v47  ;;  %v2276_v47 = vld [vmem:[%s12819_s10 + $0x10] sm:$0xff] }
0x148d   :  { %10805 = vrsqrt.f32 %v2169_v46  ;;  %v2277_v46 = vld [vmem:[%s12819_s10 + $0x18] sm:$0xff] }
0x1497   :  { %v10806_v61 = vpop.eup %10805 }
0x1498   :  { %v2171_v18 = vmul.f32 %v10806_v61, %v2163_v59  ;;  %v2275_v59 = vld [vmem:[%s12819_s10 + $0x8] sm:$0xff]  ;;  %v11678_v61 = vpack.c.bf16 %v2277_v46, %v2276_v47  ;;  %v8815_v46 = vld [vmem:[%s12814_s5] ss:$0 sm:$0xff] }
0x1499   :  { %v11668_v35 = vpack.c.bf16 %v2275_v59, %v2274_v49  ;;  %v2280_v49 = vld [vmem:[%s12819_s10 + $0x30] sm:$0xff]  ;;  %v2281_v59 = vld [vmem:[%s12819_s10 + $0x38] sm:$0xff] }
0x149a   :  { %v2176_v1 = vmul.f32 %v11651_v41, %v2171_v18  ;;  %12863 = vst [vmem:[#allocation8_spill] sm:$0xff] %v11678_v61  ;;  %v2278_v18 = vld [vmem:[%s12819_s10 + $0x20] sm:$0xff]  ;;  %v11698_v47 = vpack.c.bf16 %v2281_v59, %v2280_v49  ;;  %v12866_v59 = vmov 0.0  }
0x149b   :  { %10431 = vmatpush3.bf16.msra.mxu1 %v11668_v35 }
0x149c   :  { %v2181_v20 = vadd.f32 %v11655_v62, %v2176_v1  ;;  %10432 = vmatprep.subr.bf16.mxu1 %v12829_v3  ;;  %v2279_v1 = vld [vmem:[%s12819_s10 + $0x28] sm:$0xff]  ;;  %12865 = vst [vmem:[#allocation10_spill] sm:$0xff] %v11698_v47 }
0x149e   :  { %9617 = vmatmul.mubr.msk.f32.vlgmr.msra.gmra.mrb[14].mxu0 %vm213_vm3, %v2181_v20  ;;  %v11688_v20 = vpack.c.bf16 %v2279_v1, %v2278_v18 }
0x149f   :  { %9646 = vmatprep.mubr.msk.f32.mxu0 %vm10949_vm2, %v12823_v26  ;;  %10434 = vmatpush3.bf16.msra.mxu1 %v11678_v61 }
0x14a0   :  { %10435 = vmatprep.subr.bf16.mxu1 %v12829_v3  ;;  %12864 = vst [vmem:[#allocation9_spill] sm:$0xff] %v11688_v20 }
0x14a3   :  { %10437 = vmatpush3.bf16.msra.mxu1 %v11688_v20 }
0x14a4   :  { %10438 = vmatprep.subr.bf16.mxu1 %v12829_v3 }
0x14a7   :  { %10440 = vmatpush3.bf16.msra.mxu1 %v11698_v47 }
0x14a8   :  { %10453 = vmatprep.subr.bf16.mxu1 %v12829_v3  ;;  %v12832_v3 = vsub.s32 5, %v11151_v53 }
0x1571   :  { %v2262_v18 = vpop.f32.mrb[14].mxu0 }
0x1572   :  { %v2263_v1 = vadd.f32 %v8815_v46, %v2262_v18  ;;  %v9618_v29 = vpop.f32.mrb[15].mxu0  ;;  %v11712_v46 = vrot.slane %v11223_v32, %v12832_v3  ;;  %v8820_v32 = vld [vmem:[%s12816_s7 + $0x180] sm:$0xff]  ;;  %v11765_v3 = vld [vmem:[%s12813_s4 + $0x8] sm:$0x3f] }
0x1574   :  { %v8817_v26 = vmul.f32 -1.702, %v2263_v1  ;;  %12867 = vst [vmem:[#allocation11_spill] sm:$0xff] %v11712_v46 }
0x1576   :  { %v2268_v62 = vmul.f32 1.442695, %v8817_v26 }
0x1578   :  { %10807 = vpow2.f32 %v2268_v62 }
0x1582   :  { %v10808_v41 = vpop.eup %10807 }
0x1583   :  { %v2270_v5 = vadd.f32 1.0, %v10808_v41 }
0x1585   :  { %10809 = vrcp.f32 %v2270_v5 }
0x158f   :  { %v10810_v20 = vpop.eup %10809 }
0x1590   :  { %v2273_v49 = vmul.f32 %v10810_v20, %v2263_v1 }
0x1592   :  { %9636 = vmatmul.mubr.msk.f32.vlgmr.msra.gmra.mrb[30].mxu1 %vm74_vm0, %v2273_v49 }
0x1593   :  { %9668 = vmatprep.mubr.msk.f32.mxu1 %vm10949_vm2, %v12866_v59 }
0x1665   :  { %v2355_v29 = vpop.f32.mrb[30].mxu1 }
0x1666   :  { %v2356_v26 = vadd.f32 %v2355_v29, %v11712_v46  ;;  %v9637_v62 = vpop.f32.mrb[31].mxu1  ;;  %v11773_v46 = vrot.slane %v11765_v3, %v11160_v56  ;;  %v8829_v56 = vld [vmem:[%s12816_s7 + $0x210] sm:$0xff] }
0x1667   :  { %v8835_v62 = vld [vmem:[%s12816_s7 + $0x288] sm:$0xff] }
0x1668   :  { %v11716_v5 = vadd.f32 %v11617_v42, %v2356_v26  ;;  %v8821_v42 = vld [vmem:[%s12816_s7 + $0x188] sm:$0xff]  ;;  %v8834_v26 = vld [vmem:[%s12816_s7 + $0x280] sm:$0xff]  ;;  %12874 = vst [vmem:[#allocation17_spill] sm:$0xff] %v11773_v46 }
0x1669   :  { %v11728_v29 = vpack.c.bf16 %v8821_v42, %v8820_v32  ;;  %v8836_v32 = vld [vmem:[%s12816_s7 + $0x290] sm:$0xff]  ;;  %v8837_v42 = vld [vmem:[%s12816_s7 + $0x298] sm:$0xff] }
0x166a   :  { %v2362_v41 = vsel %vm148_vm1, %v11716_v5, 0.0 }
0x166b   :  { %2363 = vadd.xlane.f32.xlu0 %v2362_v41  ;;  %12868 = vst [vmem:[#allocation12_spill] sm:$0xff] %v11728_v29  ;;  %v11736_v41 = vpack.c.bf16 %v8835_v62, %v8834_v26  ;;  %10443 = vmatpush3.bf16.msra.mxu0 %v11728_v29  ;;  %v11756_v26 = vpack.c.bf16 %v8837_v42, %v8836_v32 }
0x166c   :  { %v11769_v32 = vrot.slane %v11765_v3, %v11154_v54 }
0x166d   :  { %12869 = vst [vmem:[#allocation13_spill] sm:$0xff] %v11736_v41  ;;  %10455 = vmatpush3.bf16.msra.mxu1 %v11736_v41  ;;  %12872 = vst [vmem:[#allocation15_spill] sm:$0xff] %v11756_v26 }
0x166e   :  { %12873 = vst [vmem:[#allocation16_spill] sm:$0xff] %v11769_v32 }
0x16f8   :  { %v2364_v20 = vpop.xlane.xlu0 %2363 }
0x16f9   :  { %v2365_v18 = vmul.f32 0.03125, %v2364_v20  ;;  %v8822_v20 = vld [vmem:[%s12816_s7 + $0x190] sm:$0xff] }
0x16fb   :  { %v2366_v1 = vsub.f32 %v11716_v5, %v2365_v18  ;;  %v8823_v18 = vld [vmem:[%s12816_s7 + $0x198] sm:$0xff] }
0x16fd   :  { %v2367_v49 = vmul.f32 %v2366_v1, %v2366_v1 }
0x16ff   :  { %v2368_v47 = vsel %vm148_vm1, %v2367_v49, 0.0  ;;  %v11747_v49 = vpack.c.bf16 %v8823_v18, %v8822_v20 }
0x1700   :  { %2369 = vadd.xlane.f32.xlu1 %v2368_v47  ;;  %v12870_v47 = vmov 0.0|0.0  }
0x1701   :  { %10444 = vmatprep.subr.bf16.mxu0 %v12870_v47  ;;  %12871 = vst [vmem:[#allocation14_spill] sm:$0xff] %v11747_v49  ;;  %10456 = vmatprep.subr.bf16.mxu1 %v12870_v47 }
0x1702   :  { %10446 = vmatpush3.bf16.msra.mxu0 %v11747_v49  ;;  %10458 = vmatpush3.bf16.msra.mxu1 %v11756_v26 }
0x1703   :  { %10447 = vmatprep.subr.bf16.mxu0 %v12870_v47  ;;  %9676 = vmatprep.subr.mxu1 %v12866_v59 }
0x178d   :  { %v2370_v62 = vpop.xlane.xlu1 %2369 }
0x178e   :  { %v2371_v20 = vmul.f32 0.03125, %v2370_v62  ;;  %v8827_v62 = vld [vmem:[%s12816_s7 + $0x200] sm:$0xff] }
0x1790   :  { %v2372_v18 = vadd.f32 1e-05, %v2371_v20  ;;  %v8828_v20 = vld [vmem:[%s12816_s7 + $0x208] sm:$0xff] }
0x1791   :  { %v11782_v41 = vpack.c.bf16 %v8828_v20, %v8827_v62 }
0x1792   :  { %10811 = vrsqrt.f32 %v2372_v18 }
0x1793   :  { %12875 = vst [vmem:[#allocation18_spill] sm:$0xff] %v11782_v41 }
0x179c   :  { %v10812_v42 = vpop.eup %10811 }
0x179d   :  { %v2374_v26 = vmul.f32 %v10812_v42, %v2366_v1  ;;  %v8830_v1 = vld [vmem:[%s12816_s7 + $0x218] sm:$0xff]  ;;  %v8839_v42 = vld [vmem:[%s12815_s6 + $0x14] ss:$0 sm:$0xff] }
0x179f   :  { %v2379_v18 = vmul.f32 %v11769_v32, %v2374_v26  ;;  %v11798_v26 = vpack.c.bf16 %v8830_v1, %v8829_v56 }
0x17a1   :  { %v11785_v54 = vadd.f32 %v11773_v46, %v2379_v18  ;;  %12876 = vst [vmem:[#allocation19_spill] sm:$0xff] %v11798_v26  ;;  %v8825_v46 = vld [vmem:[%s12815_s6 + $0xc] ss:$0 sm:$0xff] }
0x17a3   :  { %9647 = vmatmul.mubr.msk.f32.vlgmr.msra.gmra.mrb[16].mxu0 %vm213_vm3, %v11785_v54  ;;  %9669 = vmatmul.mubr.msk.f32.vlgmr.msra.gmra.mrb[32].mxu1 %vm213_vm3, %v11785_v54 }
0x17a4   :  { %10449 = vmatpush3.bf16.msra.mxu0 %v11782_v41  ;;  %9657 = vmatprep.mubr.msk.f32.mxu0 %vm10949_vm2, %v12866_v59 }
0x17a5   :  { %10450 = vmatprep.subr.bf16.mxu0 %v12870_v47  ;;  %9678 = vmatprep.mubr.msk.f32.mxu1 %vm10949_vm2, %v12866_v59 }
0x17a8   :  { %10452 = vmatpush3.bf16.msra.mxu0 %v11798_v26  ;;  %v8832_v26 = vld [vmem:[%s12815_s6 + $0x10] ss:$0 sm:$0xff] }
0x17a9   :  { %9671 = vmatprep.subr.mxu0 %v12866_v59 }
0x17ab   :  { %9658 = vmatmul.mubr.msk.f32.vlgmr.msra.gmra.mrb[18].mxu0 %vm213_vm3, %v11785_v54 }
0x17ac   :  { %9673 = vmatprep.mubr.msk.f32.mxu0 %vm10949_vm2, %v12866_v59 }
0x1876   :  { %v2472_v62 = vpop.f32.mrb[16].mxu0  ;;  %v2638_v20 = vpop.f32.mrb[32].mxu1 }
0x1877   :  { %v2639_v18 = vadd.f32 %v8839_v42, %v2638_v20  ;;  %v9648_v56 = vpop.f32.mrb[17].mxu0  ;;  %v9670_v1 = vpop.f32.mrb[33].mxu1  ;;  %v2473_v42 = vadd.f32 %v8825_v46, %v2472_v62  ;;  %v8845_v46 = vld [vmem:[%s12817_s8 + $0x20] sm:$0xff] }
0x1879   :  { %9677 = vmatpush3.msk.msra.mxu1 %vm546_vm5, %v2639_v18 }
0x187a   :  { %10459 = vmatprep.subr.bf16.mxu1 %v12870_v47 }
0x187e   :  { %v2555_v41 = vpop.f32.mrb[18].mxu0 }
0x187f   :  { %v2556_v32 = vadd.f32 %v8832_v26, %v2555_v41  ;;  %v9659_v49 = vpop.f32.mrb[19].mxu0  ;;  %v8847_v26 = vld [vmem:[%s12816_s7 + $0x1a0] sm:$0xff] }
0x1881   :  { %9672 = vmatpush3.xpose.msk.msra.mxu0 %vm453_vm4, %v2556_v32 }
0x1882   :  { %9681 = vmatprep.subr.mxu0 %v12866_v59 }
0x1884   :  { %9674 = vmatmul.mubr.msk.f32.vlgmr.msra.gmra.mrb[20].mxu0 %vm453_vm4, %v2473_v42 }
0x1885   :  { %9683 = vmatprep.mubr.msk.f32.mxu0 %vm10949_vm2, %v12866_v59  ;;  %9682 = vmatpush3.msra.mxu0 %v8845_v46  ;;  %v8863_v46 = vld [vmem:[%s12816_s7 + $0x2b0] sm:$0xff] }
0x1886   :  { %10465 = vmatprep.subr.bf16.mxu0 %v12870_v47 }
0x1957   :  { %v2714_v20 = vpop.f32.mrb[20].mxu0 }
0x1958   :  { %v9675_v18 = vpop.f32.mrb[21].mxu0  ;;  %v2718_v56 = vsel %vm530_vm6, %v2714_v20, -inf }
0x1959   :  { %2719 = vmax.xlane.f32.xlu0 %v2718_v56  ;;  %v8850_v18 = vld [vmem:[%s12816_s7 + $0x1b8] sm:$0xff] }
0x19e6   :  { %v2720_v1 = vpop.xlane.xlu0 %2719 }
0x19e7   :  { %v2721_v29 = vsub.f32 %v2714_v20, %v2720_v1  ;;  %v8849_v20 = vld [vmem:[%s12816_s7 + $0x1b0] sm:$0xff]  ;;  %v8861_v1 = vld [vmem:[%s12816_s7 + $0x2a0] sm:$0xff] }
0x19e8   :  { %v11849_v56 = vpack.c.bf16 %v8850_v18, %v8849_v20  ;;  %v8876_v20 = vld [vmem:[%s12816_s7 + $0x1d0] sm:$0xff]  ;;  %v8877_v18 = vld [vmem:[%s12816_s7 + $0x1d8] sm:$0xff] }
0x19e9   :  { %v2722_v61 = vmul.f32 1.442695, %v2721_v29 }
0x19ea   :  { %12878 = vst [vmem:[#allocation21_spill] sm:$0xff] %v11849_v56 }
0x19eb   :  { %10813 = vpow2.f32 %v2722_v61  ;;  %v8848_v61 = vld [vmem:[%s12816_s7 + $0x1a8] sm:$0xff] }
0x19ec   :  { %v11839_v62 = vpack.c.bf16 %v8848_v61, %v8847_v26  ;;  %v8874_v61 = vld [vmem:[%s12816_s7 + $0x1c0] sm:$0xff] }
0x19ee   :  { %12877 = vst [vmem:[#allocation20_spill] sm:$0xff] %v11839_v62 }
0x19f5   :  { %v10814_v41 = vpop.eup %10813 }
0x19f6   :  { %v2724_v49 = vsel %vm530_vm6, %v10814_v41, 0.0 }
0x19f7   :  { %2725 = vadd.xlane.f32.xlu1 %v2724_v49 }
0x1a84   :  { %v2726_v32 = vpop.xlane.xlu1 %2725 }
0x1a85   :  { %10815 = vrcp.f32 %v2726_v32  ;;  %v8864_v32 = vld [vmem:[%s12816_s7 + $0x2b8] sm:$0xff] }
0x1a86   :  { %v11873_v26 = vpack.c.bf16 %v8864_v32, %v8863_v46  ;;  %v8889_v46 = vld [vmem:[%s12816_s7 + $0x2c8] sm:$0xff] }
0x1a88   :  { %12880 = vst [vmem:[#allocation23_spill] sm:$0xff] %v11873_v26 }
0x1a8f   :  { %v10816_v29 = vpop.eup %10815 }
0x1a90   :  { %v2728_v42 = vmul.f32 %v10816_v29, %v10814_v41  ;;  %v8862_v41 = vld [vmem:[%s12816_s7 + $0x2a8] sm:$0xff] }
0x1a91   :  { %v11861_v49 = vpack.c.bf16 %v8862_v41, %v8861_v1  ;;  %v8875_v29 = vld [vmem:[%s12816_s7 + $0x1c8] sm:$0xff]  ;;  %v11897_v1 = vpack.c.bf16 %v8877_v18, %v8876_v20  ;;  %v8888_v41 = vld [vmem:[%s12816_s7 + $0x2c0] sm:$0xff] }
0x1a92   :  { %9679 = vmatmul.mubr.msk.f32.vlgmr.msra.gmra.mrb[34].mxu1 %vm542_vm7, %v2728_v42  ;;  %v11885_v42 = vpack.c.bf16 %v8875_v29, %v8874_v61  ;;  %v11909_v32 = vpack.c.bf16 %v8889_v46, %v8888_v41  ;;  %v8890_v61 = vld [vmem:[%s12816_s7 + $0x2d0] sm:$0xff]  ;;  %v8891_v29 = vld [vmem:[%s12816_s7 + $0x2d8] sm:$0xff]  ;;  %v8854_v18 = vld [vmem:[%s12816_s7 + $0x220] sm:$0xff] }
0x1a93   :  { %10461 = vmatpush3.bf16.msra.mxu1 %v11839_v62  ;;  %9694 = vmatprep.mubr.msk.f32.mxu1 %vm10949_vm2, %v12866_v59  ;;  %12879 = vst [vmem:[#allocation22_spill] sm:$0xff] %v11861_v49  ;;  %12882 = vst [vmem:[#allocation25_spill] sm:$0xff] %v11897_v1  ;;  %v11921_v20 = vpack.c.bf16 %v8891_v29, %v8890_v61  ;;  %v8855_v41 = vld [vmem:[%s12816_s7 + $0x228] sm:$0xff]  ;;  %v8856_v61 = vld [vmem:[%s12816_s7 + $0x230] sm:$0xff] }
0x1a94   :  { %10462 = vmatprep.subr.bf16.mxu1 %v12870_v47  ;;  %12881 = vst [vmem:[#allocation24_spill] sm:$0xff] %v11885_v42  ;;  %12883 = vst [vmem:[#allocation26_spill] sm:$0xff] %v11909_v32  ;;  %v11938_v46 = vpack.c.bf16 %v8855_v41, %v8854_v18  ;;  %v8857_v29 = vld [vmem:[%s12816_s7 + $0x238] sm:$0xff]  ;;  %v8872_v62 = vld [vmem:[%s12817_s8 + $0x28] sm:$0xff] }
0x1a95   :  { %12884 = vst [vmem:[#allocation27_spill] sm:$0xff] %v11921_v20 }
0x1a96   :  { %12885 = vst [vmem:[#allocation28_spill] sm:$0xff] %v11938_v46 }
0x1a97   :  { %10464 = vmatpush3.bf16.msra.mxu1 %v11849_v56 }
0x1a98   :  { %10471 = vmatprep.subr.bf16.mxu1 %v12870_v47 }
0x1a9a   :  { %9695 = vmatmul.mubr.msk.f32.vlgmr.msra.gmra.mrb[36].mxu1 %vm213_vm3, %v11785_v54 }
0x1a9b   :  { %10473 = vmatpush3.bf16.msra.mxu1 %v11861_v49  ;;  %9716 = vmatprep.mubr.msk.f32.mxu1 %vm10949_vm2, %v12866_v59 }
0x1a9c   :  { %10474 = vmatprep.subr.bf16.mxu1 %v12870_v47 }
0x1a9f   :  { %10476 = vmatpush3.bf16.msra.mxu1 %v11873_v26 }
0x1aa0   :  { %10477 = vmatprep.subr.bf16.mxu1 %v12870_v47 }
0x1aa2   :  { %9717 = vmatmul.mubr.msk.f32.vlgmr.msra.gmra.mrb[38].mxu1 %vm213_vm3, %v11785_v54 }
0x1aa3   :  { %10479 = vmatpush3.bf16.msra.mxu1 %v11885_v42  ;;  %9742 = vmatprep.mubr.msk.f32.mxu1 %vm10949_vm2, %v12866_v59 }
0x1aa4   :  { %10480 = vmatprep.subr.bf16.mxu1 %v12870_v47 }
0x1aa7   :  { %10482 = vmatpush3.bf16.msra.mxu1 %v11897_v1  ;;  %v11948_v1 = vpack.c.bf16 %v8857_v29, %v8856_v61 }
0x1aa8   :  { %10489 = vmatprep.subr.bf16.mxu1 %v12870_v47 }
0x1aa9   :  { %12886 = vst [vmem:[#allocation29_spill] sm:$0xff] %v11948_v1 }
0x1aaa   :  { %9743 = vmatmul.mubr.msk.f32.vlgmr.msra.gmra.mrb[40].mxu1 %vm213_vm3, %v11785_v54 }
0x1aab   :  { %10491 = vmatpush3.bf16.msra.mxu1 %v11909_v32  ;;  %9764 = vmatprep.mubr.msk.f32.mxu1 %vm10949_vm2, %v12866_v59 }
0x1aac   :  { %10492 = vmatprep.subr.bf16.mxu1 %v12870_v47 }
0x1aaf   :  { %10494 = vmatpush3.bf16.msra.mxu1 %v11921_v20 }
0x1ab0   :  { %9772 = vmatprep.subr.mxu1 %v12866_v59 }
0x1ab2   :  { %9765 = vmatmul.mubr.msk.f32.vlgmr.msra.gmra.mrb[42].mxu1 %vm213_vm3, %v11785_v54 }
0x1ab3   :  { %9774 = vmatprep.mubr.msk.f32.mxu1 %vm10949_vm2, %v12866_v59 }
0x1b65   :  { %v2801_v20 = vpop.f32.mrb[34].mxu1 }
0x1b66   :  { %v9680_v32 = vpop.f32.mrb[35].mxu1  ;;  %9684 = vmatmul.mubr.msk.f32.vlgmr.msra.gmra.mrb[22].mxu0 %vm453_vm4, %v2801_v20 }
0x1b67   :  { %10467 = vmatpush3.bf16.msra.mxu0 %v11938_v46  ;;  %9705 = vmatprep.mubr.msk.f32.mxu0 %vm10949_vm2, %v12866_v59  ;;  %v8893_v46 = vld [vmem:[%s12815_s6 + $0x16] ss:$0 sm:$0xff] }
0x1b68   :  { %10468 = vmatprep.subr.bf16.mxu0 %v12870_v47 }
0x1b6b   :  { %10470 = vmatpush3.bf16.msra.mxu0 %v11948_v1 }
0x1b6c   :  { %9719 = vmatprep.subr.mxu0 %v12866_v59 }
0x1b6d   :  { %v2960_v18 = vpop.f32.mrb[36].mxu1 }
0x1b6e   :  { %v9696_v41 = vpop.f32.mrb[37].mxu1  ;;  %9706 = vmatmul.mubr.msk.f32.vlgmr.msra.gmra.mrb[24].mxu0 %vm213_vm3, %v11785_v54 }
0x1b6f   :  { %9721 = vmatprep.mubr.msk.f32.mxu0 %vm10949_vm2, %v12866_v59  ;;  %v8859_v41 = vld [vmem:[%s12815_s6 + $0x11] ss:$0 sm:$0xff] }
0x1b75   :  { %v3126_v32 = vpop.f32.mrb[38].mxu1 }
0x1b76   :  { %v9718_v20 = vpop.f32.mrb[39].mxu1 }
0x1b77   :  { %v8852_v20 = vld [vmem:[%s12815_s6 + $0xd] ss:$0 sm:$0xff] }
0x1b7d   :  { %v11959_v61 = vpop.f32.mrb[40].mxu1 }
0x1b7e   :  { %v9744_v29 = vpop.f32.mrb[41].mxu1 }
0x1b85   :  { %v3614_v1 = vpop.f32.mrb[42].mxu1 }
0x1b86   :  { %v3615_v42 = vadd.f32 %v8893_v46, %v3614_v1  ;;  %v9766_v26 = vpop.f32.mrb[43].mxu1  ;;  %v8866_v1 = vld [vmem:[%s12815_s6 + $0x15] ss:$0 sm:$0xff] }
0x1b87   :  { %v2961_v26 = vadd.f32 %v8852_v20, %v2960_v18 }
0x1b88   :  { %9773 = vmatpush3.msk.msra.mxu1 %vm546_vm5, %v3615_v42  ;;  %v3127_v42 = vadd.f32 %v8866_v1, %v3126_v32 }
0x1b89   :  { %10495 = vmatprep.subr.bf16.mxu1 %v12870_v47 }
0x1c41   :  { %v3043_v49 = vpop.f32.mrb[24].mxu0 }
0x1c42   :  { %v3044_v29 = vadd.f32 %v8859_v41, %v3043_v49  ;;  %v9707_v56 = vpop.f32.mrb[25].mxu0 }
0x1c44   :  { %9720 = vmatpush3.xpose.msk.msra.mxu0 %vm453_vm4, %v3044_v29 }
0x1c45   :  { %9724 = vmatprep.subr.mxu0 %v12866_v59 }
0x1c47   :  { %9722 = vmatmul.mubr.msk.f32.vlgmr.msra.gmra.mrb[26].mxu0 %vm453_vm4, %v2961_v26 }
0x1c48   :  { %9725 = vmatpush3.msk.msra.mxu0 %vm546_vm5, %v3127_v42  ;;  %9726 = vmatprep.mubr.msk.f32.mxu0 %vm10949_vm2, %v12866_v59 }
0x1c49   :  { %9729 = vmatprep.subr.mxu0 %v12866_v59 }
0x1d1a   :  { %v3202_v56 = vpop.f32.mrb[26].mxu0 }
0x1d1b   :  { %v9723_v49 = vpop.f32.mrb[27].mxu0  ;;  %v3206_v46 = vsel %vm530_vm6, %v3202_v56, -inf }
0x1d1c   :  { %3207 = vmax.xlane.f32.xlu0 %v3206_v46  ;;  %v8882_v49 = vld [vmem:[%s12816_s7 + $0x248] sm:$0xff] }
0x1da9   :  { %v3208_v41 = vpop.xlane.xlu0 %3207 }
0x1daa   :  { %v3209_v29 = vsub.f32 %v3202_v56, %v3208_v41  ;;  %v8881_v56 = vld [vmem:[%s12816_s7 + $0x240] sm:$0xff]  ;;  %v8883_v41 = vld [vmem:[%s12816_s7 + $0x250] sm:$0xff] }
0x1dab   :  { %v11997_v46 = vpack.c.bf16 %v8882_v49, %v8881_v56 }
0x1dac   :  { %v3210_v18 = vmul.f32 1.442695, %v3209_v29 }
0x1dae   :  { %10817 = vpow2.f32 %v3210_v18 }
0x1db8   :  { %v10818_v20 = vpop.eup %10817 }
0x1db9   :  { %v3212_v32 = vsel %vm530_vm6, %v10818_v20, 0.0 }
0x1dba   :  { %3213 = vadd.xlane.f32.xlu1 %v3212_v32  ;;  %v8886_v32 = vld [vmem:[%s12815_s6 + $0x12] ss:$0 sm:$0xff] }
0x1e47   :  { %v3214_v1 = vpop.xlane.xlu1 %3213 }
0x1e48   :  { %10819 = vrcp.f32 %v3214_v1 }
0x1e52   :  { %v10820_v26 = vpop.eup %10819 }
0x1e53   :  { %v3216_v42 = vmul.f32 %v10820_v26, %v10818_v20  ;;  %v8879_v26 = vld [vmem:[%s12815_s6 + $0xe] ss:$0 sm:$0xff] }
0x1e54   :  { %v3449_v49 = vadd.f32 %v8879_v26, %v11959_v61  ;;  %v8899_v61 = vld [vmem:[%s12817_s8 + $0x30] sm:$0xff] }
0x1e55   :  { %9727 = vmatmul.mubr.msk.f32.vlgmr.msra.gmra.mrb[28].mxu0 %vm542_vm7, %v3216_v42 }
0x1e56   :  { %9730 = vmatpush3.msra.mxu0 %v8872_v62  ;;  %9731 = vmatprep.mubr.msk.f32.mxu0 %vm10949_vm2, %v12866_v59  ;;  %v8884_v62 = vld [vmem:[%s12816_s7 + $0x258] sm:$0xff] }
0x1e57   :  { %10483 = vmatprep.subr.bf16.mxu0 %v12870_v47  ;;  %v12007_v20 = vpack.c.bf16 %v8884_v62, %v8883_v41 }
0x1e59   :  { %12887 = vst [vmem:[#allocation30_spill] sm:$0xff] %v12007_v20 }
0x1f28   :  { %v3289_v29 = vpop.f32.mrb[28].mxu0 }
0x1f29   :  { %v9728_v18 = vpop.f32.mrb[29].mxu0  ;;  %9732 = vmatmul.mubr.msk.f32.vlgmr.msra.gmra.mrb[22].mxu0 %vm453_vm4, %v3289_v29 }
0x1f2a   :  { %10485 = vmatpush3.bf16.msra.mxu0 %v11997_v46  ;;  %9753 = vmatprep.mubr.msk.f32.mxu0 %vm10949_vm2, %v12866_v59 }
0x1f2b   :  { %10486 = vmatprep.subr.bf16.mxu0 %v12870_v47 }
0x1f2e   :  { %10488 = vmatpush3.bf16.msra.mxu0 %v12007_v20 }
0x1f2f   :  { %9767 = vmatprep.subr.mxu0 %v12866_v59 }
0x1f31   :  { %9754 = vmatmul.mubr.msk.f32.vlgmr.msra.gmra.mrb[30].mxu0 %vm213_vm3, %v11785_v54 }
0x1f32   :  { %9769 = vmatprep.mubr.msk.f32.mxu0 %vm10949_vm2, %v12866_v59 }
0x2004   :  { %v3531_v1 = vpop.f32.mrb[30].mxu0 }
0x2005   :  { %v3532_v42 = vadd.f32 %v8886_v32, %v3531_v1  ;;  %v9755_v56 = vpop.f32.mrb[31].mxu0 }
0x2006   :  { %v8901_v56 = vld [vmem:[%s12816_s7 + $0x1e0] sm:$0xff] }
0x2007   :  { %9768 = vmatpush3.xpose.msk.msra.mxu0 %vm453_vm4, %v3532_v42 }
0x2008   :  { %9777 = vmatprep.subr.mxu0 %v12866_v59 }
0x200a   :  { %9770 = vmatmul.mubr.msk.f32.vlgmr.msra.gmra.mrb[32].mxu0 %vm453_vm4, %v3449_v49 }
0x200b   :  { %9779 = vmatprep.mubr.msk.f32.mxu0 %vm10949_vm2, %v12866_v59  ;;  %9778 = vmatpush3.msra.mxu0 %v8899_v61 }
0x200c   :  { %10501 = vmatprep.subr.bf16.mxu0 %v12870_v47 }
0x20dd   :  { %v3690_v41 = vpop.f32.mrb[32].mxu0 }
0x20de   :  { %v9771_v62 = vpop.f32.mrb[33].mxu0  ;;  %v3694_v29 = vsel %vm530_vm6, %v3690_v41, -inf }
0x20df   :  { %3695 = vmax.xlane.f32.xlu0 %v3694_v29  ;;  %v8903_v29 = vld [vmem:[%s12816_s7 + $0x1f0] sm:$0xff] }
0x216c   :  { %v3696_v18 = vpop.xlane.xlu0 %3695 }
0x216d   :  { %v3697_v20 = vsub.f32 %v3690_v41, %v3696_v18  ;;  %v8904_v18 = vld [vmem:[%s12816_s7 + $0x1f8] sm:$0xff] }
0x216f   :  { %v3698_v32 = vmul.f32 1.442695, %v3697_v20  ;;  %v8902_v20 = vld [vmem:[%s12816_s7 + $0x1e8] sm:$0xff] }
0x2170   :  { %v12042_v41 = vpack.c.bf16 %v8902_v20, %v8901_v56  ;;  %v8918_v56 = vld [vmem:[%s12816_s7 + $0x2f8] sm:$0xff] }
0x2171   :  { %10821 = vpow2.f32 %v3698_v32  ;;  %v12052_v32 = vpack.c.bf16 %v8904_v18, %v8903_v29  ;;  %v8910_v18 = vld [vmem:[%s12816_s7 + $0x270] sm:$0xff] }
0x2173   :  { %12888 = vst [vmem:[#allocation31_spill] sm:$0xff] %v12052_v32 }
0x217b   :  { %v10822_v1 = vpop.eup %10821 }
0x217c   :  { %v3700_v42 = vsel %vm530_vm6, %v10822_v1, 0.0 }
0x217d   :  { %3701 = vadd.xlane.f32.xlu1 %v3700_v42  ;;  %v8916_v42 = vld [vmem:[%s12816_s7 + $0x2e8] sm:$0xff] }
0x220a   :  { %v3702_v26 = vpop.xlane.xlu1 %3701 }
0x220b   :  { %10823 = vrcp.f32 %v3702_v26  ;;  %v8917_v26 = vld [vmem:[%s12816_s7 + $0x2f0] sm:$0xff] }
0x220c   :  { %v12076_v20 = vpack.c.bf16 %v8918_v56, %v8917_v26 }
0x220e   :  { %12890 = vst [vmem:[#allocation33_spill] sm:$0xff] %v12076_v20 }
0x2215   :  { %v10824_v49 = vpop.eup %10823 }
0x2216   :  { %v3704_v62 = vmul.f32 %v10824_v49, %v10822_v1  ;;  %v8915_v1 = vld [vmem:[%s12816_s7 + $0x2e0] sm:$0xff] }
0x2217   :  { %v12064_v61 = vpack.c.bf16 %v8916_v42, %v8915_v1  ;;  %v8908_v49 = vld [vmem:[%s12816_s7 + $0x260] sm:$0xff]  ;;  %v8911_v1 = vld [vmem:[%s12816_s7 + $0x278] sm:$0xff] }
0x2218   :  { %9775 = vmatmul.mubr.msk.f32.vlgmr.msra.gmra.mrb[44].mxu1 %vm542_vm7, %v3704_v62  ;;  %v8909_v62 = vld [vmem:[%s12816_s7 + $0x268] sm:$0xff]  ;;  %v12103_v56 = vpack.c.bf16 %v8911_v1, %v8910_v18  ;;  %v8913_v1 = vld [vmem:[%s12815_s6 + $0x13] ss:$0 sm:$0xff] }
0x2219   :  { %10497 = vmatpush3.bf16.msra.mxu1 %v12042_v41  ;;  %9790 = vmatprep.mubr.msk.f32.mxu1 %vm10949_vm2, %v12866_v59  ;;  %12889 = vst [vmem:[#allocation32_spill] sm:$0xff] %v12064_v61  ;;  %v12093_v29 = vpack.c.bf16 %v8909_v62, %v8908_v49 }
0x221a   :  { %10498 = vmatprep.subr.bf16.mxu1 %v12870_v47  ;;  %12892 = vst [vmem:[#allocation35_spill] sm:$0xff] %v12103_v56 }
0x221b   :  { %12891 = vst [vmem:[#allocation34_spill] sm:$0xff] %v12093_v29 }
0x221d   :  { %10500 = vmatpush3.bf16.msra.mxu1 %v12052_v32  ;;  %v8926_v32 = vld [vmem:[%s12817_s8 + $0x38] sm:$0xff] }
0x221e   :  { %10507 = vmatprep.subr.bf16.mxu1 %v12870_v47 }
0x2220   :  { %9791 = vmatmul.mubr.msk.f32.vlgmr.msra.gmra.mrb[46].mxu1 %vm213_vm3, %v11785_v54 }
0x2221   :  { %10509 = vmatpush3.bf16.msra.mxu1 %v12064_v61  ;;  %9812 = vmatprep.mubr.msk.f32.mxu1 %vm10949_vm2, %v12866_v59 }
0x2222   :  { %10510 = vmatprep.subr.bf16.mxu1 %v12870_v47 }
0x2225   :  { %10512 = vmatpush3.bf16.msra.mxu1 %v12076_v20 }
0x2226   :  { %10513 = vmatprep.subr.bf16.mxu1 %v12870_v47 }
0x2228   :  { %9813 = vmatmul.mubr.msk.f32.vlgmr.msra.gmra.mrb[48].mxu1 %vm213_vm3, %v11785_v54 }
0x2229   :  { %9838 = vmatprep.mubr.msk.f32.mxu1 %vm10949_vm2, %v12866_v59 }
0x22eb   :  { %v3777_v42 = vpop.f32.mrb[44].mxu1 }
0x22ec   :  { %v9776_v26 = vpop.f32.mrb[45].mxu1  ;;  %9780 = vmatmul.mubr.msk.f32.vlgmr.msra.gmra.mrb[22].mxu0 %vm453_vm4, %v3777_v42 }
0x22ed   :  { %10503 = vmatpush3.bf16.msra.mxu0 %v12093_v29  ;;  %9801 = vmatprep.mubr.msk.f32.mxu0 %vm10949_vm2, %v12866_v59 }
0x22ee   :  { %10504 = vmatprep.subr.bf16.mxu0 %v12870_v47 }
0x22f1   :  { %10506 = vmatpush3.bf16.msra.mxu0 %v12103_v56  ;;  %v8906_v56 = vld [vmem:[%s12815_s6 + $0xf] ss:$0 sm:$0xff] }
0x22f2   :  { %9815 = vmatprep.subr.mxu0 %v12866_v59 }
0x22f3   :  { %v3936_v49 = vpop.f32.mrb[46].mxu1 }
0x22f4   :  { %v9792_v62 = vpop.f32.mrb[47].mxu1  ;;  %9802 = vmatmul.mubr.msk.f32.vlgmr.msra.gmra.mrb[34].mxu0 %vm213_vm3, %v11785_v54  ;;  %v8920_v54 = vld [vmem:[%s12815_s6 + $0x17] ss:$0 sm:$0xff] }
0x22f5   :  { %9817 = vmatprep.mubr.msk.f32.mxu0 %vm10949_vm2, %v12866_v59  ;;  %v3937_v62 = vadd.f32 %v8906_v56, %v3936_v49 }
0x22fb   :  { %v4102_v42 = vpop.f32.mrb[48].mxu1 }
0x22fc   :  { %v9814_v18 = vpop.f32.mrb[49].mxu1 }
0x22fd   :  { %v4103_v18 = vadd.f32 %v8920_v54, %v4102_v42 }
0x23c7   :  { %v4019_v26 = vpop.f32.mrb[34].mxu0 }
0x23c8   :  { %v4020_v29 = vadd.f32 %v8913_v1, %v4019_v26  ;;  %v9803_v20 = vpop.f32.mrb[35].mxu0 }
0x23ca   :  { %9816 = vmatpush3.xpose.msk.msra.mxu0 %vm453_vm4, %v4020_v29 }
0x23cb   :  { %9820 = vmatprep.subr.mxu0 %v12866_v59 }
0x23cd   :  { %9818 = vmatmul.mubr.msk.f32.vlgmr.msra.gmra.mrb[36].mxu0 %vm453_vm4, %v3937_v62 }
0x23ce   :  { %9821 = vmatpush3.msk.msra.mxu0 %vm546_vm5, %v4103_v18  ;;  %9822 = vmatprep.mubr.msk.f32.mxu0 %vm10949_vm2, %v12866_v59 }
0x23cf   :  { %9825 = vmatprep.subr.mxu0 %v12866_v59 }
0x24a0   :  { %v4178_v20 = vpop.f32.mrb[36].mxu0 }
0x24a1   :  { %v9819_v1 = vpop.f32.mrb[37].mxu0  ;;  %v4182_v26 = vsel %vm530_vm6, %v4178_v20, -inf }
0x24a2   :  { %4183 = vmax.xlane.f32.xlu0 %v4182_v26  ;;  %v12893_v1 = vsub.s32 4, %v11151_v53 }
0x24a4   :  { %v12145_v26 = vrot.slane %v11765_v3, %v12893_v1  ;;  %v8929_v1 = vld [vmem:[%s12818_s9 + $0x28] sm:$0xff] }
0x252f   :  { %v4184_v61 = vpop.xlane.xlu0 %4183 }
0x2530   :  { %v4185_v29 = vsub.f32 %v4178_v20, %v4184_v61 }
0x2532   :  { %v4186_v56 = vmul.f32 1.442695, %v4185_v29 }
0x2534   :  { %10825 = vpow2.f32 %v4186_v56 }
0x253e   :  { %v10826_v49 = vpop.eup %10825 }
0x253f   :  { %v4188_v42 = vsel %vm530_vm6, %v10826_v49, 0.0 }
0x2540   :  { %4189 = vadd.xlane.f32.xlu1 %v4188_v42 }
0x25cd   :  { %v4190_v54 = vpop.xlane.xlu1 %4189 }
0x25ce   :  { %10827 = vrcp.f32 %v4190_v54 }
0x25d8   :  { %v10828_v62 = vpop.eup %10827 }
0x25d9   :  { %v4192_v18 = vmul.f32 %v10828_v62, %v10826_v49 }
0x25db   :  { %9823 = vmatmul.mubr.msk.f32.vlgmr.msra.gmra.mrb[38].mxu0 %vm542_vm7, %v4192_v18 }
0x25dc   :  { %9826 = vmatpush3.msra.mxu0 %v8926_v32  ;;  %9827 = vmatprep.mubr.msk.f32.mxu0 %vm10949_vm2, %v12866_v59  ;;  %v2389_v32 = vadd.f32 %v12145_v26, %v11716_v5  ;;  %v8928_v5 = vld [vmem:[%s12818_s9 + $0x20] sm:$0xff] }
0x25dd   :  { %10519 = vmatprep.subr.bf16.mxu0 %v12870_v47 }
0x26ae   :  { %v4265_v61 = vpop.f32.mrb[38].mxu0 }
0x26af   :  { %v9824_v20 = vpop.f32.mrb[39].mxu0  ;;  %9828 = vmatmul.mubr.msk.f32.vlgmr.msra.gmra.mrb[22].mxu0 %vm453_vm4, %v4265_v61 }
0x26b0   :  { %9857 = vmatprep.mubr.msk.f32.mxu0 %vm10949_vm2, %v12866_v59 }
0x2782   :  { %v4340_v29 = vpop.f32.mrb[22].mxu0 }
0x2783   :  { %v12149_v56 = vadd.f32 %v4340_v29, %v2389_v32  ;;  %v9829_v49 = vpop.f32.mrb[23].mxu0  ;;  %v12161_v32 = vpack.c.bf16 %v8929_v1, %v8928_v5  ;;  %v8930_v29 = vld [vmem:[%s12818_s9 + $0x30] sm:$0xff] }
0x2784   :  { %v8931_v49 = vld [vmem:[%s12818_s9 + $0x38] sm:$0xff] }
0x2785   :  { %12894 = vst [vmem:[#allocation36_spill] sm:$0xff] %v12149_v56  ;;  %v4345_v42 = vsel %vm148_vm1, %v12149_v56, 0.0  ;;  %10515 = vmatpush3.bf16.msra.mxu1 %v12161_v32 }
0x2786   :  { %4346 = vadd.xlane.f32.xlu0 %v4345_v42  ;;  %10516 = vmatprep.subr.bf16.mxu1 %v12870_v47  ;;  %v12171_v42 = vpack.c.bf16 %v8931_v49, %v8930_v29 }
0x2789   :  { %10518 = vmatpush3.bf16.msra.mxu1 %v12171_v42 }
0x278a   :  { %10531 = vmatprep.subr.bf16.mxu1 %v12870_v47 }
0x2813   :  { %v4347_v54 = vpop.xlane.xlu0 %4346 }
0x2814   :  { %v4348_v62 = vmul.f32 0.03125, %v4347_v54 }
0x2816   :  { %v4349_v18 = vsub.f32 %v12149_v56, %v4348_v62  ;;  %v12181_v56 = vrot.slane %v11765_v3, %v11647_v55 }
0x2818   :  { %v4350_v61 = vmul.f32 %v4349_v18, %v4349_v18 }
0x281a   :  { %v4351_v20 = vsel %vm148_vm1, %v4350_v61, 0.0 }
0x281b   :  { %4352 = vadd.xlane.f32.xlu1 %v4351_v20  ;;  %v12177_v20 = vrot.slane %v11765_v3, %v11644_v48  ;;  %v8945_v3 = vld [vmem:[%s12809_s0 + $0x10] sm:$0x1f] }
0x28a8   :  { %v4353_v54 = vpop.xlane.xlu1 %4352 }
0x28a9   :  { %v4354_v62 = vmul.f32 0.03125, %v4353_v54  ;;  %v8946_v54 = vld [vmem:[%s12809_s0 + $0x18] sm:$0x1f] }
0x28ab   :  { %v4355_v61 = vadd.f32 1e-05, %v4354_v62 }
0x28ad   :  { %10829 = vrsqrt.f32 %v4355_v61 }
0x28b7   :  { %v10830_v5 = vpop.eup %10829 }
0x28b8   :  { %v4357_v1 = vmul.f32 %v10830_v5, %v4349_v18 }
0x28ba   :  { %v4362_v29 = vmul.f32 %v12177_v20, %v4357_v1 }
0x28bc   :  { %v4367_v49 = vadd.f32 %v12181_v56, %v4362_v29 }
0x28be   :  { %9839 = vmatmul.mubr.msk.f32.vlgmr.msra.gmra.mrb[50].mxu1 %vm213_vm3, %v4367_v49 }
0x28bf   :  { %10533 = vmatpush1.bf16.msra.mxu1 %v11027_v4  ;;  %8947 = vmatprep.mubr.msk.f32.mxu1 %vm74_vm0, %v8946_v54  ;;  %v8936_v4 = vld [vmem:[%s12819_s10 + $0x40] sm:$0xff] }
0x28c0   :  { %10534 = vmatprep.subr.bf16.mxu1 %v12870_v47 }
0x28c3   :  { %10536 = vmatpush1.bf16.msra.mxu1 %v11034_v6  ;;  %v8937_v6 = vld [vmem:[%s12819_s10 + $0x48] sm:$0xff] }
0x28c4   :  { %10537 = vmatprep.subr.bf16.mxu1 %v12870_v47 }
0x28c7   :  { %10539 = vmatpush1.bf16.msra.mxu1 %v11044_v9  ;;  %v12229_v9 = vpack.c.bf16 %v8937_v6, %v8936_v4  ;;  %v10887_v4 = vld [vmem:[%s12811_s2] sm:$0x1f] }
0x28c8   :  { %10540 = vmatprep.subr.bf16.mxu1 %v12870_v47 }
0x28c9   :  { %10521 = vmatpush3.bf16.msra.mxu0 %v12229_v9 }
0x28ca   :  { %10522 = vmatprep.subr.bf16.mxu0 %v12870_v47 }
0x28cb   :  { %10542 = vmatpush1.bf16.msra.mxu1 %v11058_v13  ;;  %v8938_v13 = vld [vmem:[%s12819_s10 + $0x50] sm:$0xff] }
0x28cc   :  { %10543 = vmatprep.subr.bf16.mxu1 %v12870_v47 }
0x28cf   :  { %10545 = vmatpush1.bf16.msra.mxu1 %v11068_v16  ;;  %v8939_v16 = vld [vmem:[%s12819_s10 + $0x58] sm:$0xff] }
0x28d0   :  { %10546 = vmatprep.subr.bf16.mxu1 %v12870_v47 }
0x28d3   :  { %10548 = vmatpush1.bf16.msra.mxu1 %v11078_v19  ;;  %v12239_v19 = vpack.c.bf16 %v8939_v16, %v8938_v13 }
0x28d4   :  { %10549 = vmatprep.subr.bf16.mxu1 %v12870_v47 }
0x28d5   :  { %10524 = vmatpush3.bf16.msra.mxu0 %v12239_v19 }
0x28d6   :  { %10525 = vmatprep.subr.bf16.mxu0 %v12870_v47 }
0x28d7   :  { %10551 = vmatpush1.bf16.msra.mxu1 %v11088_v22  ;;  %v8940_v22 = vld [vmem:[%s12819_s10 + $0x60] sm:$0xff] }
0x28d8   :  { %10552 = vmatprep.subr.bf16.mxu1 %v12870_v47 }
0x28db   :  { %10554 = vmatpush1.bf16.msra.mxu1 %v11098_v25  ;;  %v8941_v25 = vld [vmem:[%s12819_s10 + $0x68] sm:$0xff] }
0x28dc   :  { %10555 = vmatprep.subr.bf16.mxu1 %v12870_v47 }
0x28df   :  { %10557 = vmatpush1.bf16.msra.mxu1 %v11108_v28  ;;  %v12249_v28 = vpack.c.bf16 %v8941_v25, %v8940_v22 }
0x28e0   :  { %10558 = vmatprep.subr.bf16.mxu1 %v12870_v47 }
0x28e1   :  { %10527 = vmatpush3.bf16.msra.mxu0 %v12249_v28 }
0x28e2   :  { %10528 = vmatprep.subr.bf16.mxu0 %v12870_v47 }
0x28e3   :  { %10560 = vmatpush1.bf16.msra.mxu1 %v11118_v31  ;;  %v8942_v31 = vld [vmem:[%s12819_s10 + $0x70] sm:$0xff] }
0x28e4   :  { %10561 = vmatprep.subr.bf16.mxu1 %v12870_v47 }
0x28e7   :  { %10563 = vmatpush1.bf16.msra.mxu1 %v11128_v34  ;;  %v8943_v34 = vld [vmem:[%s12819_s10 + $0x78] sm:$0xff] }
0x28e8   :  { %10564 = vmatprep.subr.bf16.mxu1 %v12870_v47 }
0x28eb   :  { %10566 = vmatpush1.bf16.msra.mxu1 %v11138_v37  ;;  %v12259_v37 = vpack.c.bf16 %v8943_v34, %v8942_v31 }
0x28ec   :  { %10585 = vmatprep.subr.bf16.mxu1 %v12870_v47 }
0x28ed   :  { %10530 = vmatpush3.bf16.msra.mxu0 %v12259_v37 }
0x28ee   :  { %4620 = vmatmul.mubr.f32.vlgmr.msra.gmra.mrb[52].mxu1 %v8945_v3  ;;  %10567 = vmatprep.subr.bf16.mxu0 %v12870_v47 }
0x28ef   :  { %10587 = vmatpush3.bf16.msra.mxu1 %v11433_v14  ;;  %9916 = vmatprep.mubr.msk.f32.mxu1 %vm10949_vm2, %v12866_v59  ;;  %v8933_v14 = vld [vmem:[%s12814_s5 + $0x1] ss:$0 sm:$0xff] }
0x28f0   :  { %10588 = vmatprep.subr.bf16.mxu1 %v12870_v47 }
0x28f3   :  { %10590 = vmatpush3.bf16.msra.mxu1 %v11443_v36 }
0x28f4   :  { %10597 = vmatprep.subr.bf16.mxu1 %v12870_v47 }
0x2991   :  { %v4450_v36 = vpop.f32.mrb[50].mxu1 }
0x2992   :  { %v4451_v18 = vadd.f32 %v8933_v14, %v4450_v36  ;;  %v9840_v62 = vpop.f32.mrb[51].mxu1 }
0x2994   :  { %v8935_v61 = vmul.f32 -1.702, %v4451_v18 }
0x2996   :  { %v4456_v5 = vmul.f32 1.442695, %v8935_v61 }
0x2998   :  { %10831 = vpow2.f32 %v4456_v5 }
0x29a2   :  { %v10832_v1 = vpop.eup %10831 }
0x29a3   :  { %v4458_v29 = vadd.f32 1.0, %v10832_v1 }
0x29a5   :  { %10833 = vrcp.f32 %v4458_v29 }
0x29af   :  { %v10834_v49 = vpop.eup %10833 }
0x29b0   :  { %v4461_v54 = vmul.f32 %v10834_v49, %v4451_v18 }
0x29b2   :  { %9858 = vmatmul.mubr.msk.f32.vlgmr.msra.gmra.mrb[40].mxu0 %vm74_vm0, %v4461_v54 }
0x29b3   :  { %10569 = vmatpush3.bf16.msra.mxu0 %v11185_v12  ;;  %9868 = vmatprep.mubr.msk.f32.mxu0 %vm10949_vm2, %v12866_v59 }
0x29b4   :  { %10570 = vmatprep.subr.bf16.mxu0 %v12870_v47 }
0x29b7   :  { %10572 = vmatpush3.bf16.msra.mxu0 %v11205_v21 }
0x29b8   :  { %10573 = vmatprep.subr.bf16.mxu0 %v12870_v47 }
0x29c1   :  { %v4621_v3 = vpop.f32.mrb[52].mxu1 }
0x29c2   :  { %v4622_v6 = vadd.f32 %v10887_v4, %v4621_v3  ;;  %v4623_v13 = vpop.f32.mrb[53].mxu1 }
0x29c4   :  { %v4625_v16 = vsel %vm148_vm1, %v4622_v6, 0.0 }
0x29c5   :  { %4626 = vadd.xlane.f32.xlu0 %v4625_v16 }
0x2a52   :  { %v4627_v12 = vpop.xlane.xlu0 %4626 }
0x2a53   :  { %v4628_v22 = vmul.f32 0.03125, %v4627_v12 }
0x2a55   :  { %v4629_v25 = vsub.f32 %v4622_v6, %v4628_v22 }
0x2a57   :  { %v4630_v31 = vmul.f32 %v4629_v25, %v4629_v25 }
0x2a59   :  { %v4631_v34 = vsel %vm148_vm1, %v4630_v31, 0.0 }
0x2a5a   :  { %4632 = vadd.xlane.f32.xlu1 %v4631_v34 }
0x2a85   :  { %v12278_v21 = vpop.f32.mrb[40].mxu0 }
0x2a86   :  { %v9859_v14 = vpop.f32.mrb[41].mxu0 }
0x2ae7   :  { %v4633_v36 = vpop.xlane.xlu1 %4632 }
0x2ae8   :  { %v4634_v18 = vmul.f32 0.03125, %v4633_v36  ;;  %v10890_v36 = vld [vmem:[%s12815_s6 + $0x8] ss:$0 sm:$0xff] }
0x2aea   :  { %v4635_v62 = vadd.f32 1e-05, %v4634_v18 }
0x2aec   :  { %10835 = vrsqrt.f32 %v4635_v62 }
0x2af6   :  { %v10836_v61 = vpop.eup %10835 }
0x2af7   :  { %v4637_v5 = vmul.f32 %v10836_v61, %v4629_v25 }
0x2af9   :  { %v4638_v1 = vmul.f32 %v4637_v5, %v11163_v57 }
0x2afb   :  { %v12282_v29 = vadd.f32 %v4638_v1, %v11166_v60  ;;  %v10891_v1 = vld [vmem:[%s12815_s6 + $0xa] ss:$0 sm:$0xff] }
0x2afd   :  { %v4640_v49 = vsel %vm148_vm1, %v12282_v29, 0.0 }
0x2afe   :  { %4641 = vadd.xlane.f32.xlu0 %v4640_v49 }
0x2b8b   :  { %v4642_v54 = vpop.xlane.xlu0 %4641 }
0x2b8c   :  { %v4643_v3 = vmul.f32 0.03125, %v4642_v54 }
0x2b8e   :  { %v4644_v4 = vsub.f32 %v12282_v29, %v4643_v3 }
0x2b90   :  { %v4645_v6 = vmul.f32 %v4644_v4, %v4644_v4 }
0x2b92   :  { %v4646_v13 = vsel %vm148_vm1, %v4645_v6, 0.0 }
0x2b93   :  { %4647 = vadd.xlane.f32.xlu1 %v4646_v13 }
0x2c20   :  { %v4648_v16 = vpop.xlane.xlu1 %4647 }
0x2c21   :  { %v4649_v12 = vmul.f32 0.03125, %v4648_v16 }
0x2c23   :  { %v4650_v22 = vadd.f32 1e-05, %v4649_v12 }
0x2c25   :  { %10837 = vrsqrt.f32 %v4650_v22 }
0x2c2f   :  { %v10838_v57 = vpop.eup %10837 }
0x2c30   :  { %v4652_v25 = vmul.f32 %v10838_v57, %v4644_v4 }
0x2c32   :  { %v4653_v60 = vmul.f32 %v4652_v25, %v11227_v33 }
0x2c34   :  { %v12290_v31 = vadd.f32 %v4653_v60, %v11234_v38 }
0x2c36   :  { %9869 = vmatmul.mubr.msk.f32.vlgmr.msra.gmra.mrb[42].mxu0 %vm213_vm3, %v12290_v31  ;;  %9917 = vmatmul.mubr.msk.f32.vlgmr.msra.gmra.mrb[54].mxu1 %vm213_vm3, %v12290_v31 }
0x2c37   :  { %10575 = vmatpush3.bf16.msra.mxu0 %v11246_v44  ;;  %10599 = vmatpush3.bf16.msra.mxu1 %v11190_v15 }
0x2c38   :  { %10576 = vmatprep.subr.bf16.mxu0 %v12870_v47  ;;  %10600 = vmatprep.subr.bf16.mxu1 %v12870_v47 }
0x2c39   :  { %9879 = vmatprep.mubr.msk.f32.mxu0 %vm10949_vm2, %v12866_v59  ;;  %9938 = vmatprep.mubr.msk.f32.mxu1 %vm10949_vm2, %v12866_v59 }
0x2c3b   :  { %10578 = vmatpush3.bf16.msra.mxu0 %v11271_v51  ;;  %10602 = vmatpush3.bf16.msra.mxu1 %v11210_v24  ;;  %v10888_v51 = vld [vmem:[%s12815_s6 + $0x4] ss:$0 sm:$0xff] }
0x2c3c   :  { %10579 = vmatprep.subr.bf16.mxu0 %v12870_v47  ;;  %10603 = vmatprep.subr.bf16.mxu1 %v12870_v47 }
0x2c3e   :  { %9880 = vmatmul.mubr.msk.f32.vlgmr.msra.gmra.mrb[44].mxu0 %vm213_vm3, %v12290_v31  ;;  %9939 = vmatmul.mubr.msk.f32.vlgmr.msra.gmra.mrb[56].mxu1 %vm213_vm3, %v12290_v31 }
0x2c3f   :  { %10581 = vmatpush3.bf16.msra.mxu0 %v11295_v63  ;;  %10605 = vmatpush3.bf16.msra.mxu1 %v11248_v45 }
0x2c40   :  { %10582 = vmatprep.subr.bf16.mxu0 %v12870_v47  ;;  %10606 = vmatprep.subr.bf16.mxu1 %v12870_v47 }
0x2c41   :  { %9890 = vmatprep.mubr.msk.f32.mxu0 %vm10949_vm2, %v12866_v59  ;;  %9964 = vmatprep.mubr.msk.f32.mxu1 %vm10949_vm2, %v12866_v59 }
0x2c43   :  { %10584 = vmatpush3.bf16.msra.mxu0 %v11319_v8  ;;  %10608 = vmatpush3.bf16.msra.mxu1 %v11273_v52  ;;  %v10889_v8 = vld [vmem:[%s12815_s6] ss:$0 sm:$0xff] }
0x2c44   :  { %10615 = vmatprep.subr.bf16.mxu1 %v12870_v47  ;;  %9893 = vmatprep.subr.mxu0 %v12866_v59 }
0x2c46   :  { %9891 = vmatmul.mubr.msk.f32.vlgmr.msra.gmra.mrb[46].mxu0 %vm213_vm3, %v12290_v31  ;;  %9965 = vmatmul.mubr.msk.f32.vlgmr.msra.gmra.mrb[58].mxu1 %vm213_vm3, %v12290_v31 }
0x2c47   :  { %10617 = vmatpush3.bf16.msra.mxu1 %v11297_v0  ;;  %9986 = vmatprep.mubr.msk.f32.mxu1 %vm10949_vm2, %v12866_v59 }
0x2c48   :  { %10618 = vmatprep.subr.bf16.mxu1 %v12870_v47  ;;  %9895 = vmatprep.mubr.msk.f32.mxu0 %vm10949_vm2, %v12866_v59 }
0x2c4b   :  { %10620 = vmatpush3.bf16.msra.mxu1 %v11321_v10 }
0x2c4c   :  { %9994 = vmatprep.subr.mxu1 %v12866_v59 }
0x2c4e   :  { %9987 = vmatmul.mubr.msk.f32.vlgmr.msra.gmra.mrb[60].mxu1 %vm213_vm3, %v12290_v31 }
0x2c4f   :  { %9996 = vmatprep.mubr.msk.f32.mxu1 %vm10949_vm2, %v12866_v59 }
0x2d09   :  { %v4725_v15 = vpop.f32.mrb[42].mxu0  ;;  %v12340_v24 = vpop.f32.mrb[54].mxu1 }
0x2d0a   :  { %v9870_v33 = vpop.f32.mrb[43].mxu0  ;;  %v9918_v38 = vpop.f32.mrb[55].mxu1  ;;  %v4726_v10 = vadd.f32 %v10889_v8, %v4725_v15  ;;  %v10895_v8 = vld [vmem:[%s12815_s6 + $0x9] ss:$0 sm:$0xff] }
0x2d0b   :  { %v10892_v33 = vld [vmem:[%s12817_s8] sm:$0xff] }
0x2d11   :  { %v4795_v44 = vpop.f32.mrb[44].mxu0  ;;  %v12342_v45 = vpop.f32.mrb[56].mxu1 }
0x2d12   :  { %v4796_v52 = vadd.f32 %v10888_v51, %v4795_v44  ;;  %v9881_v63 = vpop.f32.mrb[45].mxu0  ;;  %v9940_v0 = vpop.f32.mrb[57].mxu1 }
0x2d14   :  { %9894 = vmatpush3.xpose.msk.msra.mxu0 %vm453_vm4, %v4796_v52 }
0x2d15   :  { %9898 = vmatprep.subr.mxu0 %v12866_v59 }
0x2d17   :  { %9896 = vmatmul.mubr.msk.f32.vlgmr.msra.gmra.mrb[48].mxu0 %vm453_vm4, %v4726_v10  ;;  %v5313_v10 = vadd.f32 %v10895_v8, %v12342_v45 }
0x2d18   :  { %9900 = vmatprep.mubr.msk.f32.mxu0 %vm10949_vm2, %v12866_v59 }
0x2d19   :  { %v4865_v34 = vpop.f32.mrb[46].mxu0  ;;  %v12355_v14 = vpop.f32.mrb[58].mxu1 }
0x2d1a   :  { %v4866_v18 = vadd.f32 %v10890_v36, %v4865_v34  ;;  %v9892_v62 = vpop.f32.mrb[47].mxu0  ;;  %v9966_v61 = vpop.f32.mrb[59].mxu1 }
0x2d1c   :  { %9899 = vmatpush3.msk.msra.mxu0 %vm546_vm5, %v4866_v18 }
0x2d1d   :  { %9903 = vmatprep.subr.mxu0 %v12866_v59 }
0x2d21   :  { %v5759_v5 = vpop.f32.mrb[60].mxu1 }
0x2d22   :  { %v5760_v49 = vadd.f32 %v10891_v1, %v5759_v5  ;;  %v9988_v54 = vpop.f32.mrb[61].mxu1 }
0x2d24   :  { %9995 = vmatpush3.msk.msra.mxu1 %vm546_vm5, %v5760_v49 }
0x2d25   :  { %10621 = vmatprep.subr.bf16.mxu1 %v12870_v47 }
0x2dea   :  { %v4941_v3 = vpop.f32.mrb[48].mxu0 }
0x2deb   :  { %v9897_v4 = vpop.f32.mrb[49].mxu0  ;;  %v4945_v6 = vsel %vm530_vm6, %v4941_v3, -inf }
0x2dec   :  { %4946 = vmax.xlane.f32.xlu0 %v4945_v6 }
0x2e79   :  { %v4947_v13 = vpop.xlane.xlu0 %4946 }
0x2e7a   :  { %v4948_v16 = vsub.f32 %v4941_v3, %v4947_v13  ;;  %v10896_v3 = vld [vmem:[%s12817_s8 + $0x8] sm:$0xff] }
0x2e7c   :  { %v4949_v12 = vmul.f32 1.442695, %v4948_v16 }
0x2e7e   :  { %10839 = vpow2.f32 %v4949_v12 }
0x2e88   :  { %v10840_v22 = vpop.eup %10839 }
0x2e89   :  { %v4951_v57 = vsel %vm530_vm6, %v10840_v22, 0.0 }
0x2e8a   :  { %4952 = vadd.xlane.f32.xlu1 %v4951_v57  ;;  %v10899_v57 = vld [vmem:[%s12817_s8 + $0x10] sm:$0xff] }
0x2f17   :  { %v4953_v25 = vpop.xlane.xlu1 %4952 }
0x2f18   :  { %10841 = vrcp.f32 %v4953_v25 }
0x2f22   :  { %v10842_v60 = vpop.eup %10841 }
0x2f23   :  { %v4955_v15 = vmul.f32 %v10842_v60, %v10840_v22 }
0x2f25   :  { %9901 = vmatmul.mubr.msk.f32.vlgmr.msra.gmra.mrb[50].mxu0 %vm542_vm7, %v4955_v15 }
0x2f26   :  { %9904 = vmatpush3.msra.mxu0 %v10892_v33  ;;  %9905 = vmatprep.mubr.msk.f32.mxu0 %vm10949_vm2, %v12866_v59 }
0x2f27   :  { %10591 = vmatprep.subr.bf16.mxu0 %v12870_v47 }
0x2ff8   :  { %v5028_v38 = vpop.f32.mrb[50].mxu0 }
0x2ff9   :  { %v9902_v44 = vpop.f32.mrb[51].mxu0  ;;  %9906 = vmatmul.mubr.msk.f32.vlgmr.msra.gmra.mrb[52].mxu0 %vm453_vm4, %v5028_v38 }
0x2ffa   :  { %10593 = vmatpush3.bf16.msra.mxu0 %v11455_v43  ;;  %9927 = vmatprep.mubr.msk.f32.mxu0 %vm10949_vm2, %v12866_v59  ;;  %v10893_v43 = vld [vmem:[%s12815_s6 + $0x5] ss:$0 sm:$0xff] }
0x2ffb   :  { %10594 = vmatprep.subr.bf16.mxu0 %v12870_v47 }
0x2ffe   :  { %10596 = vmatpush3.bf16.msra.mxu0 %v11467_v50  ;;  %v10894_v50 = vld [vmem:[%s12815_s6 + $0x1] ss:$0 sm:$0xff] }
0x2fff   :  { %9941 = vmatprep.subr.mxu0 %v12866_v59  ;;  %v5173_v0 = vadd.f32 %v10894_v50, %v12340_v24  ;;  %v10900_v50 = vld [vmem:[%s12815_s6 + $0x7] ss:$0 sm:$0xff] }
0x3001   :  { %9928 = vmatmul.mubr.msk.f32.vlgmr.msra.gmra.mrb[54].mxu0 %vm213_vm3, %v12290_v31 }
0x3002   :  { %9943 = vmatprep.mubr.msk.f32.mxu0 %vm10949_vm2, %v12866_v59 }
0x30d4   :  { %v5242_v51 = vpop.f32.mrb[54].mxu0 }
0x30d5   :  { %v5243_v52 = vadd.f32 %v10893_v43, %v5242_v51  ;;  %v9929_v63 = vpop.f32.mrb[55].mxu0 }
0x30d7   :  { %9942 = vmatpush3.xpose.msk.msra.mxu0 %vm453_vm4, %v5243_v52 }
0x30d8   :  { %9946 = vmatprep.subr.mxu0 %v12866_v59 }
0x30da   :  { %9944 = vmatmul.mubr.msk.f32.vlgmr.msra.gmra.mrb[56].mxu0 %vm453_vm4, %v5173_v0 }
0x30db   :  { %9947 = vmatpush3.msk.msra.mxu0 %vm546_vm5, %v5313_v10  ;;  %9948 = vmatprep.mubr.msk.f32.mxu0 %vm10949_vm2, %v12866_v59 }
0x30dc   :  { %9951 = vmatprep.subr.mxu0 %v12866_v59 }
0x31ad   :  { %v5388_v34 = vpop.f32.mrb[56].mxu0 }
0x31ae   :  { %v9945_v36 = vpop.f32.mrb[57].mxu0  ;;  %v5392_v24 = vsel %vm530_vm6, %v5388_v34, -inf }
0x31af   :  { %5393 = vmax.xlane.f32.xlu0 %v5392_v24 }
0x323c   :  { %v5394_v18 = vpop.xlane.xlu0 %5393 }
0x323d   :  { %v5395_v62 = vsub.f32 %v5388_v34, %v5394_v18 }
0x323f   :  { %v5396_v61 = vmul.f32 1.442695, %v5395_v62 }
0x3241   :  { %10843 = vpow2.f32 %v5396_v61 }
0x324b   :  { %v10844_v5 = vpop.eup %10843 }
0x324c   :  { %v5398_v45 = vsel %vm530_vm6, %v10844_v5, 0.0 }
0x324d   :  { %5399 = vadd.xlane.f32.xlu1 %v5398_v45 }
0x32da   :  { %v5400_v1 = vpop.xlane.xlu1 %5399 }
0x32db   :  { %10845 = vrcp.f32 %v5400_v1 }
0x32e5   :  { %v10846_v49 = vpop.eup %10845 }
0x32e6   :  { %v5402_v54 = vmul.f32 %v10846_v49, %v10844_v5 }
0x32e8   :  { %9949 = vmatmul.mubr.msk.f32.vlgmr.msra.gmra.mrb[58].mxu0 %vm542_vm7, %v5402_v54 }
0x32e9   :  { %9952 = vmatpush3.msra.mxu0 %v10896_v3  ;;  %9953 = vmatprep.mubr.msk.f32.mxu0 %vm10949_vm2, %v12866_v59 }
0x32ea   :  { %10609 = vmatprep.subr.bf16.mxu0 %v12870_v47 }
0x33bb   :  { %v5475_v4 = vpop.f32.mrb[58].mxu0 }
0x33bc   :  { %v9950_v6 = vpop.f32.mrb[59].mxu0  ;;  %9954 = vmatmul.mubr.msk.f32.vlgmr.msra.gmra.mrb[52].mxu0 %vm453_vm4, %v5475_v4  ;;  %v10903_v4 = vld [vmem:[%s12817_s8 + $0x18] sm:$0xff] }
0x33bd   :  { %10611 = vmatpush3.bf16.msra.mxu0 %v11510_v11  ;;  %9975 = vmatprep.mubr.msk.f32.mxu0 %vm10949_vm2, %v12866_v59  ;;  %v10897_v11 = vld [vmem:[%s12815_s6 + $0x6] ss:$0 sm:$0xff] }
0x33be   :  { %10612 = vmatprep.subr.bf16.mxu0 %v12870_v47 }
0x33c1   :  { %10614 = vmatpush3.bf16.msra.mxu0 %v11520_v40  ;;  %v10898_v40 = vld [vmem:[%s12815_s6 + $0x2] ss:$0 sm:$0xff] }
0x33c2   :  { %9989 = vmatprep.subr.mxu0 %v12866_v59  ;;  %v5620_v22 = vadd.f32 %v10898_v40, %v12355_v14  ;;  %v12898_v40 = vld [vmem:[#allocation5_spill] sm:$0xff] }
0x33c4   :  { %9976 = vmatmul.mubr.msk.f32.vlgmr.msra.gmra.mrb[60].mxu0 %vm213_vm3, %v12290_v31 }
0x33c5   :  { %9991 = vmatprep.mubr.msk.f32.mxu0 %vm10949_vm2, %v12866_v59 }
0x3497   :  { %v5689_v13 = vpop.f32.mrb[60].mxu0 }
0x3498   :  { %v5690_v16 = vadd.f32 %v10897_v11, %v5689_v13  ;;  %v9977_v12 = vpop.f32.mrb[61].mxu0  ;;  %v12895_v11 = vld [vmem:[#allocation8_spill] sm:$0xff] }
0x3499   :  { %v12897_v12 = vld [vmem:[#allocation10_spill] sm:$0xff] }
0x349a   :  { %9990 = vmatpush3.xpose.msk.msra.mxu0 %vm453_vm4, %v5690_v16  ;;  %v12896_v16 = vld [vmem:[#allocation9_spill] sm:$0xff] }
0x349b   :  { %9999 = vmatprep.subr.mxu0 %v12866_v59 }
0x349d   :  { %9992 = vmatmul.mubr.msk.f32.vlgmr.msra.gmra.mrb[62].mxu0 %vm453_vm4, %v5620_v22 }
0x349e   :  { %10000 = vmatpush3.msra.mxu0 %v10899_v57  ;;  %10001 = vmatprep.mubr.msk.f32.mxu0 %vm10949_vm2, %v12866_v59 }
0x349f   :  { %10627 = vmatprep.subr.bf16.mxu0 %v12870_v47 }
0x3570   :  { %v5835_v25 = vpop.f32.mrb[62].mxu0 }
0x3571   :  { %v9993_v60 = vpop.f32.mrb[63].mxu0  ;;  %v5839_v15 = vsel %vm530_vm6, %v5835_v25, -inf }
0x3572   :  { %5840 = vmax.xlane.f32.xlu0 %v5839_v15 }
0x35ff   :  { %v5841_v14 = vpop.xlane.xlu0 %5840 }
0x3600   :  { %v5842_v33 = vsub.f32 %v5835_v25, %v5841_v14 }
0x3602   :  { %v5843_v38 = vmul.f32 1.442695, %v5842_v33 }
0x3604   :  { %10847 = vpow2.f32 %v5843_v38 }
0x360e   :  { %v10848_v44 = vpop.eup %10847 }
0x360f   :  { %v5845_v51 = vsel %vm530_vm6, %v10848_v44, 0.0 }
0x3610   :  { %5846 = vadd.xlane.f32.xlu1 %v5845_v51 }
0x369d   :  { %v5847_v43 = vpop.xlane.xlu1 %5846 }
0x369e   :  { %10849 = vrcp.f32 %v5847_v43 }
0x36a8   :  { %v10850_v52 = vpop.eup %10849 }
0x36a9   :  { %v5849_v63 = vmul.f32 %v10850_v52, %v10848_v44 }
0x36ab   :  { %9997 = vmatmul.mubr.msk.f32.vlgmr.msra.gmra.mrb[62].mxu1 %vm542_vm7, %v5849_v63 }
0x36ac   :  { %10623 = vmatpush3.bf16.msra.mxu1 %v11337_v17  ;;  %10012 = vmatprep.mubr.msk.f32.mxu1 %vm10949_vm2, %v12866_v59 }
0x36ad   :  { %10624 = vmatprep.subr.bf16.mxu1 %v12870_v47 }
0x36b0   :  { %10626 = vmatpush3.bf16.msra.mxu1 %v11352_v23 }
0x36b1   :  { %10633 = vmatprep.subr.bf16.mxu1 %v12870_v47 }
0x36b3   :  { %10013 = vmatmul.mubr.msk.f32.vlgmr.msra.gmra.mrb[64].mxu1 %vm213_vm3, %v12290_v31 }
0x36b4   :  { %10635 = vmatpush3.bf16.msra.mxu1 %v11366_v30  ;;  %10034 = vmatprep.mubr.msk.f32.mxu1 %vm10949_vm2, %v12866_v59 }
0x36b5   :  { %10636 = vmatprep.subr.bf16.mxu1 %v12870_v47 }
0x36b8   :  { %10638 = vmatpush3.bf16.msra.mxu1 %v11378_v39 }
0x36b9   :  { %10639 = vmatprep.subr.bf16.mxu1 %v12870_v47 }
0x36bb   :  { %10035 = vmatmul.mubr.msk.f32.vlgmr.msra.gmra.mrb[66].mxu1 %vm213_vm3, %v12290_v31 }
0x36bc   :  { %10641 = vmatpush3.bf16.msra.mxu1 %v11629_v2  ;;  %10060 = vmatprep.mubr.msk.f32.mxu1 %vm10949_vm2, %v12866_v59 }
0x36bd   :  { %10642 = vmatprep.subr.bf16.mxu1 %v12870_v47 }
0x36c0   :  { %10644 = vmatpush3.bf16.msra.mxu1 %v11639_v27 }
0x36c1   :  { %10657 = vmatprep.subr.bf16.mxu1 %v12870_v47 }
0x377e   :  { %v5922_v17 = vpop.f32.mrb[62].mxu1 }
0x377f   :  { %v9998_v23 = vpop.f32.mrb[63].mxu1  ;;  %10002 = vmatmul.mubr.msk.f32.vlgmr.msra.gmra.mrb[52].mxu0 %vm453_vm4, %v5922_v17 }
0x3780   :  { %10629 = vmatpush3.bf16.msra.mxu0 %v11564_v58  ;;  %10023 = vmatprep.mubr.msk.f32.mxu0 %vm10949_vm2, %v12866_v59 }
0x3781   :  { %10630 = vmatprep.subr.bf16.mxu0 %v12870_v47 }
0x3784   :  { %10632 = vmatpush3.bf16.msra.mxu0 %v11574_v7  ;;  %v10901_v7 = vld [vmem:[%s12815_s6 + $0x3] ss:$0 sm:$0xff] }
0x3785   :  { %10037 = vmatprep.subr.mxu0 %v12866_v59 }
0x3786   :  { %v6066_v30 = vpop.f32.mrb[64].mxu1 }
0x3787   :  { %v10014_v39 = vpop.f32.mrb[65].mxu1  ;;  %10024 = vmatmul.mubr.msk.f32.vlgmr.msra.gmra.mrb[64].mxu0 %vm213_vm3, %v12290_v31  ;;  %v6067_v10 = vadd.f32 %v10901_v7, %v6066_v30  ;;  %v10902_v31 = vld [vmem:[%s12815_s6 + $0xb] ss:$0 sm:$0xff]  ;;  %v12900_v30 = vld [vmem:[#allocation7_spill] sm:$0xff] }
0x3788   :  { %10039 = vmatprep.mubr.msk.f32.mxu0 %vm10949_vm2, %v12866_v59 }
0x378e   :  { %v6206_v2 = vpop.f32.mrb[66].mxu1 }
0x378f   :  { %v10036_v27 = vpop.f32.mrb[67].mxu1  ;;  %v6207_v34 = vadd.f32 %v10902_v31, %v6206_v2  ;;  %v12901_v2 = vld [vmem:[#allocation12_spill] sm:$0xff] }
0x3790   :  { %v12902_v27 = vld [vmem:[#allocation14_spill] sm:$0xff] }
0x385a   :  { %v6136_v58 = vpop.f32.mrb[64].mxu0 }
0x385b   :  { %v6137_v0 = vadd.f32 %v10900_v50, %v6136_v58  ;;  %v10025_v8 = vpop.f32.mrb[65].mxu0  ;;  %v10904_v50 = vld [vmem:[%s12814_s5] ss:$0 sm:$0xff] }
0x385d   :  { %10038 = vmatpush3.xpose.msk.msra.mxu0 %vm453_vm4, %v6137_v0 }
0x385e   :  { %10042 = vmatprep.subr.mxu0 %v12866_v59 }
0x3860   :  { %10040 = vmatmul.mubr.msk.f32.vlgmr.msra.gmra.mrb[66].mxu0 %vm453_vm4, %v6067_v10 }
0x3861   :  { %10043 = vmatpush3.msk.msra.mxu0 %vm546_vm5, %v6207_v34  ;;  %10044 = vmatprep.mubr.msk.f32.mxu0 %vm10949_vm2, %v12866_v59 }
0x3862   :  { %10047 = vmatprep.subr.mxu0 %v12866_v59 }
0x3933   :  { %v6282_v36 = vpop.f32.mrb[66].mxu0 }
0x3934   :  { %v10041_v24 = vpop.f32.mrb[67].mxu0  ;;  %v6286_v18 = vsel %vm530_vm6, %v6282_v36, -inf }
0x3935   :  { %6287 = vmax.xlane.f32.xlu0 %v6286_v18  ;;  %v12903_v18 = vld [vmem:[#allocation13_spill] sm:$0xff] }
0x39c2   :  { %v6288_v62 = vpop.xlane.xlu0 %6287 }
0x39c3   :  { %v6289_v61 = vsub.f32 %v6282_v36, %v6288_v62  ;;  %v12904_v62 = vld [vmem:[#allocation15_spill] sm:$0xff] }
0x39c5   :  { %v6290_v5 = vmul.f32 1.442695, %v6289_v61 }
0x39c7   :  { %10851 = vpow2.f32 %v6290_v5  ;;  %v12905_v5 = vld [vmem:[#allocation11_spill] sm:$0xff] }
0x39d1   :  { %v10852_v45 = vpop.eup %10851 }
0x39d2   :  { %v6292_v1 = vsel %vm530_vm6, %v10852_v45, 0.0 }
0x39d3   :  { %6293 = vadd.xlane.f32.xlu1 %v6292_v1 }
0x3a60   :  { %v6294_v49 = vpop.xlane.xlu1 %6293 }
0x3a61   :  { %10853 = vrcp.f32 %v6294_v49 }
0x3a6b   :  { %v10854_v54 = vpop.eup %10853 }
0x3a6c   :  { %v6296_v3 = vmul.f32 %v10854_v54, %v10852_v45 }
0x3a6e   :  { %10045 = vmatmul.mubr.msk.f32.vlgmr.msra.gmra.mrb[68].mxu0 %vm542_vm7, %v6296_v3 }
0x3a6f   :  { %10048 = vmatpush3.msra.mxu0 %v10903_v4  ;;  %10049 = vmatprep.mubr.msk.f32.mxu0 %vm10949_vm2, %v12866_v59 }
0x3a70   :  { %10645 = vmatprep.subr.bf16.mxu0 %v12870_v47 }
0x3b41   :  { %v6369_v6 = vpop.f32.mrb[68].mxu0 }
0x3b42   :  { %v10046_v13 = vpop.f32.mrb[69].mxu0  ;;  %10050 = vmatmul.mubr.msk.f32.vlgmr.msra.gmra.mrb[52].mxu0 %vm453_vm4, %v6369_v6 }
0x3b43   :  { %10647 = vmatpush3.bf16.msra.mxu0 %v11668_v35  ;;  %10079 = vmatprep.mubr.msk.f32.mxu0 %vm10949_vm2, %v12866_v59  ;;  %v4655_v35 = vadd.f32 %v12282_v29, %v12898_v40  ;;  %v12899_v29 = vld [vmem:[#allocation6_spill] sm:$0xff] }
0x3b44   :  { %10648 = vmatprep.subr.bf16.mxu0 %v12870_v47 }
0x3b47   :  { %10650 = vmatpush3.bf16.msra.mxu0 %v12895_v11 }
0x3b48   :  { %10651 = vmatprep.subr.bf16.mxu0 %v12870_v47 }
0x3b4b   :  { %10653 = vmatpush3.bf16.msra.mxu0 %v12896_v16 }
0x3b4c   :  { %10654 = vmatprep.subr.bf16.mxu0 %v12870_v47 }
0x3b4f   :  { %10656 = vmatpush3.bf16.msra.mxu0 %v12897_v12 }
0x3b50   :  { %10669 = vmatprep.subr.bf16.mxu0 %v12870_v47 }
0x3c15   :  { %v6442_v22 = vpop.f32.mrb[52].mxu0 }
0x3c16   :  { %v10755_v57 = vadd.f32 %v6442_v22, %v4655_v35  ;;  %v10051_v25 = vpop.f32.mrb[53].mxu0 }
0x3c18   :  { %v6447_v60 = vsel %vm148_vm1, %v10755_v57, 0.0 }
0x3c19   :  { %6448 = vadd.xlane.f32.xlu0 %v6447_v60  ;;  %v12907_v60 = vld [vmem:[#allocation17_spill] sm:$0xff] }
0x3ca6   :  { %v6449_v15 = vpop.xlane.xlu0 %6448 }
0x3ca7   :  { %v6450_v14 = vmul.f32 0.03125, %v6449_v15 }
0x3ca9   :  { %v6451_v33 = vsub.f32 %v10755_v57, %v6450_v14  ;;  %v12908_v14 = vld [vmem:[#allocation18_spill] sm:$0xff] }
0x3cab   :  { %v6452_v38 = vmul.f32 %v6451_v33, %v6451_v33 }
0x3cad   :  { %v6453_v44 = vsel %vm148_vm1, %v6452_v38, 0.0  ;;  %v12909_v38 = vld [vmem:[#allocation19_spill] sm:$0xff] }
0x3cae   :  { %6454 = vadd.xlane.f32.xlu1 %v6453_v44 }
0x3d3b   :  { %v6455_v51 = vpop.xlane.xlu1 %6454 }
0x3d3c   :  { %v6456_v43 = vmul.f32 0.03125, %v6455_v51 }
0x3d3e   :  { %v6457_v52 = vadd.f32 1e-05, %v6456_v43 }
0x3d40   :  { %10855 = vrsqrt.f32 %v6457_v52 }
0x3d4a   :  { %v10856_v63 = vpop.eup %10855 }
0x3d4b   :  { %v6459_v17 = vmul.f32 %v10856_v63, %v6451_v33  ;;  %v10905_v33 = vld [vmem:[%s12817_s8 + $0x20] sm:$0xff] }
0x3d4d   :  { %v6460_v23 = vmul.f32 %v6459_v17, %v12899_v29  ;;  %v10906_v17 = vld [vmem:[%s12815_s6 + $0x10] ss:$0 sm:$0xff] }
0x3d4f   :  { %v6461_v39 = vadd.f32 %v6460_v23, %v12900_v30  ;;  %v10907_v30 = vld [vmem:[%s12815_s6 + $0xc] ss:$0 sm:$0xff] }
0x3d51   :  { %10061 = vmatmul.mubr.msk.f32.vlgmr.msra.gmra.mrb[68].mxu1 %vm213_vm3, %v6461_v39 }
0x3d52   :  { %10659 = vmatpush3.bf16.msra.mxu1 %v12901_v2  ;;  %10090 = vmatprep.mubr.msk.f32.mxu1 %vm10949_vm2, %v12866_v59  ;;  %v10908_v2 = vld [vmem:[%s12815_s6 + $0x14] ss:$0 sm:$0xff] }
0x3d53   :  { %10660 = vmatprep.subr.bf16.mxu1 %v12870_v47 }
0x3d56   :  { %10662 = vmatpush3.bf16.msra.mxu1 %v12902_v27 }
0x3d57   :  { %10663 = vmatprep.subr.bf16.mxu1 %v12870_v47 }
0x3e24   :  { %v6531_v58 = vpop.f32.mrb[68].mxu1 }
0x3e25   :  { %v6532_v0 = vadd.f32 %v10904_v50, %v6531_v58  ;;  %v10062_v8 = vpop.f32.mrb[69].mxu1 }
0x3e27   :  { %v8981_v7 = vmul.f32 -1.702, %v6532_v0 }
0x3e29   :  { %v6537_v10 = vmul.f32 1.442695, %v8981_v7 }
0x3e2b   :  { %10857 = vpow2.f32 %v6537_v10 }
0x3e35   :  { %v10858_v31 = vpop.eup %10857 }
0x3e36   :  { %v6539_v34 = vadd.f32 1.0, %v10858_v31 }
0x3e38   :  { %10859 = vrcp.f32 %v6539_v34 }
0x3e42   :  { %v10860_v36 = vpop.eup %10859 }
0x3e43   :  { %v6542_v24 = vmul.f32 %v10860_v36, %v6532_v0 }
0x3e45   :  { %10080 = vmatmul.mubr.msk.f32.vlgmr.msra.gmra.mrb[70].mxu0 %vm74_vm0, %v6542_v24 }
0x3e46   :  { %10671 = vmatpush3.bf16.msra.mxu0 %v12903_v18  ;;  %10112 = vmatprep.mubr.msk.f32.mxu0 %vm10949_vm2, %v12866_v59 }
0x3e47   :  { %10672 = vmatprep.subr.bf16.mxu0 %v12870_v47 }
0x3e4a   :  { %10674 = vmatpush3.bf16.msra.mxu0 %v12904_v62  ;;  %v12910_v62 = vld [vmem:[#allocation20_spill] sm:$0xff] }
0x3e4b   :  { %10125 = vmatprep.subr.mxu0 %v12866_v59 }
0x3f18   :  { %v6612_v61 = vpop.f32.mrb[70].mxu0 }
0x3f19   :  { %v6613_v45 = vadd.f32 %v6612_v61, %v12905_v5  ;;  %v10081_v1 = vpop.f32.mrb[71].mxu0  ;;  %v12911_v61 = vld [vmem:[#allocation21_spill] sm:$0xff]  ;;  %v12912_v5 = vld [vmem:[#allocation22_spill] sm:$0xff] }
0x3f1a   :  { %v12914_v1 = vld [vmem:[#allocation24_spill] sm:$0xff] }
0x3f1b   :  { %v12537_v49 = vadd.f32 %v10755_v57, %v6613_v45  ;;  %v12906_v57 = vld [vmem:[#allocation16_spill] sm:$0xff]  ;;  %v12913_v45 = vld [vmem:[#allocation23_spill] sm:$0xff] }
0x3f1d   :  { %v6617_v54 = vsel %vm148_vm1, %v12537_v49, 0.0 }
0x3f1e   :  { %6618 = vadd.xlane.f32.xlu0 %v6617_v54  ;;  %v12915_v54 = vld [vmem:[#allocation25_spill] sm:$0xff] }
0x3fab   :  { %v6619_v3 = vpop.xlane.xlu0 %6618 }
0x3fac   :  { %v6620_v4 = vmul.f32 0.03125, %v6619_v3  ;;  %v12916_v3 = vld [vmem:[#allocation26_spill] sm:$0xff] }
0x3fae   :  { %v6621_v6 = vsub.f32 %v12537_v49, %v6620_v4  ;;  %v12917_v4 = vld [vmem:[#allocation27_spill] sm:$0xff] }
0x3fb0   :  { %v6622_v13 = vmul.f32 %v6621_v6, %v6621_v6 }
0x3fb2   :  { %v6623_v11 = vsel %vm148_vm1, %v6622_v13, 0.0 }
0x3fb3   :  { %6624 = vadd.xlane.f32.xlu1 %v6623_v11  ;;  %v12918_v11 = vld [vmem:[#allocation28_spill] sm:$0xff] }
0x4040   :  { %v6625_v16 = vpop.xlane.xlu1 %6624 }
0x4041   :  { %v6626_v12 = vmul.f32 0.03125, %v6625_v16  ;;  %v12919_v16 = vld [vmem:[#allocation29_spill] sm:$0xff] }
0x4043   :  { %v6627_v40 = vadd.f32 1e-05, %v6626_v12 }
0x4045   :  { %10861 = vrsqrt.f32 %v6627_v40 }
0x404f   :  { %v10862_v35 = vpop.eup %10861 }
0x4050   :  { %v6629_v22 = vmul.f32 %v10862_v35, %v6621_v6 }
0x4052   :  { %v6630_v25 = vmul.f32 %v6629_v22, %v12906_v57 }
0x4054   :  { %v12545_v15 = vadd.f32 %v6630_v25, %v12907_v60 }
0x4056   :  { %10091 = vmatmul.mubr.msk.f32.vlgmr.msra.gmra.mrb[70].mxu1 %vm213_vm3, %v12545_v15  ;;  %10113 = vmatmul.mubr.msk.f32.vlgmr.msra.gmra.mrb[72].mxu0 %vm213_vm3, %v12545_v15 }
0x4057   :  { %10665 = vmatpush3.bf16.msra.mxu1 %v12908_v14  ;;  %10101 = vmatprep.mubr.msk.f32.mxu1 %vm10949_vm2, %v12866_v59  ;;  %v10909_v14 = vld [vmem:[%s12815_s6 + $0x16] ss:$0 sm:$0xff] }
0x4058   :  { %10666 = vmatprep.subr.bf16.mxu1 %v12870_v47  ;;  %10126 = vmatpush3.msra.mxu0 %v10905_v33 }
0x4059   :  { %10127 = vmatprep.mubr.msk.f32.mxu0 %vm10949_vm2, %v12866_v59  ;;  %10681 = vmatprep.subr.bf16.mxu0 %v12870_v47 }
0x405b   :  { %10668 = vmatpush3.bf16.msra.mxu1 %v12909_v38 }
0x405c   :  { %10115 = vmatprep.subr.mxu1 %v12866_v59 }
0x405e   :  { %10102 = vmatmul.mubr.msk.f32.vlgmr.msra.gmra.mrb[72].mxu1 %vm213_vm3, %v12545_v15 }
0x405f   :  { %10117 = vmatprep.mubr.msk.f32.mxu1 %vm10949_vm2, %v12866_v59 }
0x4129   :  { %v6702_v44 = vpop.f32.mrb[70].mxu1  ;;  %v6842_v51 = vpop.f32.mrb[72].mxu0 }
0x412a   :  { %v10092_v43 = vpop.f32.mrb[71].mxu1  ;;  %v10114_v52 = vpop.f32.mrb[73].mxu0  ;;  %v6703_v39 = vadd.f32 %v10907_v30, %v6702_v44  ;;  %v6843_v27 = vadd.f32 %v10908_v2, %v6842_v51  ;;  %v10910_v51 = vld [vmem:[%s12815_s6 + $0x11] ss:$0 sm:$0xff] }
0x4131   :  { %v6772_v63 = vpop.f32.mrb[72].mxu1 }
0x4132   :  { %v6773_v29 = vadd.f32 %v10906_v17, %v6772_v63  ;;  %v10103_v23 = vpop.f32.mrb[73].mxu1  ;;  %v10911_v63 = vld [vmem:[%s12815_s6 + $0xd] ss:$0 sm:$0xff] }
0x4134   :  { %10116 = vmatpush3.xpose.msk.msra.mxu1 %vm453_vm4, %v6773_v29  ;;  %v10912_v29 = vld [vmem:[%s12815_s6 + $0x15] ss:$0 sm:$0xff] }
0x4135   :  { %10120 = vmatprep.subr.mxu1 %v12866_v59 }
0x4137   :  { %10118 = vmatmul.mubr.msk.f32.vlgmr.msra.gmra.mrb[74].mxu1 %vm453_vm4, %v6703_v39 }
0x4138   :  { %10121 = vmatpush3.msk.msra.mxu1 %vm546_vm5, %v6843_v27  ;;  %10122 = vmatprep.mubr.msk.f32.mxu1 %vm10949_vm2, %v12866_v59 }
0x4139   :  { %10675 = vmatprep.subr.bf16.mxu1 %v12870_v47 }
0x420a   :  { %v6918_v58 = vpop.f32.mrb[74].mxu1 }
0x420b   :  { %v10119_v50 = vpop.f32.mrb[75].mxu1  ;;  %v6922_v0 = vsel %vm530_vm6, %v6918_v58, -inf }
0x420c   :  { %6923 = vmax.xlane.f32.xlu0 %v6922_v0 }
0x4299   :  { %v6924_v8 = vpop.xlane.xlu0 %6923 }
0x429a   :  { %v6925_v7 = vsub.f32 %v6918_v58, %v6924_v8 }
0x429c   :  { %v6926_v10 = vmul.f32 1.442695, %v6925_v7 }
0x429e   :  { %10863 = vpow2.f32 %v6926_v10 }
0x42a8   :  { %v10864_v31 = vpop.eup %10863 }
0x42a9   :  { %v6928_v34 = vsel %vm530_vm6, %v10864_v31, 0.0 }
0x42aa   :  { %6929 = vadd.xlane.f32.xlu1 %v6928_v34  ;;  %v10913_v34 = vld [vmem:[%s12817_s8 + $0x28] sm:$0xff] }
0x4337   :  { %v6930_v36 = vpop.xlane.xlu1 %6929 }
0x4338   :  { %10865 = vrcp.f32 %v6930_v36 }
0x4342   :  { %v10866_v24 = vpop.eup %10865 }
0x4343   :  { %v6932_v18 = vmul.f32 %v10866_v24, %v10864_v31 }
0x4345   :  { %10123 = vmatmul.mubr.msk.f32.vlgmr.msra.gmra.mrb[76].mxu1 %vm542_vm7, %v6932_v18  ;;  %v12920_v18 = vld [vmem:[#allocation30_spill] sm:$0xff] }
0x4346   :  { %10677 = vmatpush3.bf16.msra.mxu1 %v12910_v62  ;;  %10138 = vmatprep.mubr.msk.f32.mxu1 %vm10949_vm2, %v12866_v59 }
0x4347   :  { %10678 = vmatprep.subr.bf16.mxu1 %v12870_v47 }
0x434a   :  { %10680 = vmatpush3.bf16.msra.mxu1 %v12911_v61 }
0x434b   :  { %10687 = vmatprep.subr.bf16.mxu1 %v12870_v47 }
0x434d   :  { %10139 = vmatmul.mubr.msk.f32.vlgmr.msra.gmra.mrb[78].mxu1 %vm213_vm3, %v12545_v15 }
0x434e   :  { %10689 = vmatpush3.bf16.msra.mxu1 %v12912_v5  ;;  %10160 = vmatprep.mubr.msk.f32.mxu1 %vm10949_vm2, %v12866_v59 }
0x434f   :  { %10690 = vmatprep.subr.bf16.mxu1 %v12870_v47 }
0x4352   :  { %10692 = vmatpush3.bf16.msra.mxu1 %v12913_v45  ;;  %v10915_v45 = vld [vmem:[%s12815_s6 + $0xe] ss:$0 sm:$0xff] }
0x4353   :  { %10693 = vmatprep.subr.bf16.mxu1 %v12870_v47 }
0x4355   :  { %10161 = vmatmul.mubr.msk.f32.vlgmr.msra.gmra.mrb[80].mxu1 %vm213_vm3, %v12545_v15 }
0x4356   :  { %10695 = vmatpush3.bf16.msra.mxu1 %v12914_v1  ;;  %10186 = vmatprep.mubr.msk.f32.mxu1 %vm10949_vm2, %v12866_v59 }
0x4357   :  { %10696 = vmatprep.subr.bf16.mxu1 %v12870_v47 }
0x435a   :  { %10698 = vmatpush3.bf16.msra.mxu1 %v12915_v54  ;;  %v10916_v54 = vld [vmem:[%s12817_s8 + $0x30] sm:$0xff] }
0x435b   :  { %10705 = vmatprep.subr.bf16.mxu1 %v12870_v47 }
0x435d   :  { %10187 = vmatmul.mubr.msk.f32.vlgmr.msra.gmra.mrb[82].mxu1 %vm213_vm3, %v12545_v15 }
0x435e   :  { %10707 = vmatpush3.bf16.msra.mxu1 %v12916_v3  ;;  %10208 = vmatprep.mubr.msk.f32.mxu1 %vm10949_vm2, %v12866_v59 }
0x435f   :  { %10708 = vmatprep.subr.bf16.mxu1 %v12870_v47 }
0x4362   :  { %10710 = vmatpush3.bf16.msra.mxu1 %v12917_v4 }
0x4363   :  { %10216 = vmatprep.subr.mxu1 %v12866_v59 }
0x4365   :  { %10209 = vmatmul.mubr.msk.f32.vlgmr.msra.gmra.mrb[84].mxu1 %vm213_vm3, %v12545_v15 }
0x4366   :  { %10218 = vmatprep.mubr.msk.f32.mxu1 %vm10949_vm2, %v12866_v59 }
0x4418   :  { %v7005_v6 = vpop.f32.mrb[76].mxu1 }
0x4419   :  { %v10124_v13 = vpop.f32.mrb[77].mxu1  ;;  %10128 = vmatmul.mubr.msk.f32.vlgmr.msra.gmra.mrb[74].mxu0 %vm453_vm4, %v7005_v6 }
0x441a   :  { %10683 = vmatpush3.bf16.msra.mxu0 %v12918_v11  ;;  %10149 = vmatprep.mubr.msk.f32.mxu0 %vm10949_vm2, %v12866_v59 }
0x441b   :  { %10684 = vmatprep.subr.bf16.mxu0 %v12870_v47 }
0x441e   :  { %10686 = vmatpush3.bf16.msra.mxu0 %v12919_v16 }
0x441f   :  { %10163 = vmatprep.subr.mxu0 %v12866_v59 }
0x4420   :  { %v7149_v12 = vpop.f32.mrb[78].mxu1 }
0x4421   :  { %v10140_v40 = vpop.f32.mrb[79].mxu1  ;;  %10150 = vmatmul.mubr.msk.f32.vlgmr.msra.gmra.mrb[76].mxu0 %vm213_vm3, %v12545_v15  ;;  %v7150_v17 = vadd.f32 %v10911_v63, %v7149_v12  ;;  %v10917_v63 = vld [vmem:[%s12815_s6 + $0x13] ss:$0 sm:$0xff] }
0x4422   :  { %10165 = vmatprep.mubr.msk.f32.mxu0 %vm10949_vm2, %v12866_v59 }
0x4428   :  { %v7289_v35 = vpop.f32.mrb[80].mxu1 }
0x4429   :  { %v10162_v22 = vpop.f32.mrb[81].mxu1  ;;  %v7290_v23 = vadd.f32 %v10912_v29, %v7289_v35 }
0x4430   :  { %v7596_v57 = vpop.f32.mrb[82].mxu1 }
0x4431   :  { %v10188_v25 = vpop.f32.mrb[83].mxu1  ;;  %v7597_v1 = vadd.f32 %v10915_v45, %v7596_v57 }
0x4432   :  { %v12921_v25 = vld [vmem:[#allocation31_spill] sm:$0xff] }
0x4438   :  { %v7736_v60 = vpop.f32.mrb[84].mxu1 }
0x4439   :  { %v7737_v33 = vadd.f32 %v10909_v14, %v7736_v60  ;;  %v10210_v38 = vpop.f32.mrb[85].mxu1  ;;  %v12922_v60 = vld [vmem:[#allocation32_spill] sm:$0xff] }
0x443a   :  { %v12924_v38 = vld [vmem:[#allocation34_spill] sm:$0xff] }
0x443b   :  { %10217 = vmatpush3.msk.msra.mxu1 %vm546_vm5, %v7737_v33 }
0x443c   :  { %10711 = vmatprep.subr.bf16.mxu1 %v12870_v47 }
0x44f4   :  { %v7219_v44 = vpop.f32.mrb[76].mxu0 }
0x44f5   :  { %v7220_v43 = vadd.f32 %v10910_v51, %v7219_v44  ;;  %v10151_v52 = vpop.f32.mrb[77].mxu0 }
0x44f7   :  { %10164 = vmatpush3.xpose.msk.msra.mxu0 %vm453_vm4, %v7220_v43 }
0x44f8   :  { %10168 = vmatprep.subr.mxu0 %v12866_v59 }
0x44fa   :  { %10166 = vmatmul.mubr.msk.f32.vlgmr.msra.gmra.mrb[78].mxu0 %vm453_vm4, %v7150_v17 }
0x44fb   :  { %10169 = vmatpush3.msk.msra.mxu0 %vm546_vm5, %v7290_v23  ;;  %10170 = vmatprep.mubr.msk.f32.mxu0 %vm10949_vm2, %v12866_v59  ;;  %v10918_v23 = vld [vmem:[%s12815_s6 + $0xf] ss:$0 sm:$0xff] }
0x44fc   :  { %10173 = vmatprep.subr.mxu0 %v12866_v59 }
0x45cd   :  { %v7365_v30 = vpop.f32.mrb[78].mxu0 }
0x45ce   :  { %v10167_v39 = vpop.f32.mrb[79].mxu0  ;;  %v7369_v2 = vsel %vm530_vm6, %v7365_v30, -inf }
0x45cf   :  { %7370 = vmax.xlane.f32.xlu0 %v7369_v2 }
0x465c   :  { %v7371_v27 = vpop.xlane.xlu0 %7370 }
0x465d   :  { %v7372_v58 = vsub.f32 %v7365_v30, %v7371_v27 }
0x465f   :  { %v7373_v50 = vmul.f32 1.442695, %v7372_v58 }
0x4661   :  { %10867 = vpow2.f32 %v7373_v50 }
0x466b   :  { %v10868_v0 = vpop.eup %10867 }
0x466c   :  { %v7375_v8 = vsel %vm530_vm6, %v10868_v0, 0.0 }
0x466d   :  { %7376 = vadd.xlane.f32.xlu1 %v7375_v8 }
0x46fa   :  { %v7377_v7 = vpop.xlane.xlu1 %7376 }
0x46fb   :  { %10869 = vrcp.f32 %v7377_v7 }
0x4705   :  { %v10870_v10 = vpop.eup %10869 }
0x4706   :  { %v7379_v31 = vmul.f32 %v10870_v10, %v10868_v0 }
0x4708   :  { %10171 = vmatmul.mubr.msk.f32.vlgmr.msra.gmra.mrb[80].mxu0 %vm542_vm7, %v7379_v31 }
0x4709   :  { %10174 = vmatpush3.msra.mxu0 %v10913_v34  ;;  %10175 = vmatprep.mubr.msk.f32.mxu0 %vm10949_vm2, %v12866_v59 }
0x470a   :  { %10699 = vmatprep.subr.bf16.mxu0 %v12870_v47 }
0x47db   :  { %v7452_v36 = vpop.f32.mrb[80].mxu0 }
0x47dc   :  { %v10172_v24 = vpop.f32.mrb[81].mxu0  ;;  %10176 = vmatmul.mubr.msk.f32.vlgmr.msra.gmra.mrb[74].mxu0 %vm453_vm4, %v7452_v36 }
0x47dd   :  { %10701 = vmatpush3.bf16.msra.mxu0 %v11997_v46  ;;  %10197 = vmatprep.mubr.msk.f32.mxu0 %vm10949_vm2, %v12866_v59  ;;  %v10914_v46 = vld [vmem:[%s12815_s6 + $0x12] ss:$0 sm:$0xff]  ;;  %v10920_v24 = vld [vmem:[%s12817_s8 + $0x38] sm:$0xff] }
0x47de   :  { %10702 = vmatprep.subr.bf16.mxu0 %v12870_v47 }
0x47e1   :  { %10704 = vmatpush3.bf16.msra.mxu0 %v12920_v18 }
0x47e2   :  { %10211 = vmatprep.subr.mxu0 %v12866_v59 }
0x47e4   :  { %10198 = vmatmul.mubr.msk.f32.vlgmr.msra.gmra.mrb[82].mxu0 %vm213_vm3, %v12545_v15 }
0x47e5   :  { %10213 = vmatprep.mubr.msk.f32.mxu0 %vm10949_vm2, %v12866_v59 }
0x48b7   :  { %v7666_v62 = vpop.f32.mrb[82].mxu0 }
0x48b8   :  { %v7667_v61 = vadd.f32 %v10914_v46, %v7666_v62  ;;  %v10199_v5 = vpop.f32.mrb[83].mxu0  ;;  %v6632_v46 = vadd.f32 %v12537_v49, %v12145_v26 }
0x48ba   :  { %10212 = vmatpush3.xpose.msk.msra.mxu0 %vm453_vm4, %v7667_v61 }
0x48bb   :  { %10221 = vmatprep.subr.mxu0 %v12866_v59 }
0x48bd   :  { %10214 = vmatmul.mubr.msk.f32.vlgmr.msra.gmra.mrb[84].mxu0 %vm453_vm4, %v7597_v1 }
0x48be   :  { %10222 = vmatpush3.msra.mxu0 %v10916_v54  ;;  %10223 = vmatprep.mubr.msk.f32.mxu0 %vm10949_vm2, %v12866_v59 }
0x48bf   :  { %10717 = vmatprep.subr.bf16.mxu0 %v12870_v47 }
0x4990   :  { %v7812_v3 = vpop.f32.mrb[84].mxu0 }
0x4991   :  { %v10215_v4 = vpop.f32.mrb[85].mxu0  ;;  %v7816_v6 = vsel %vm530_vm6, %v7812_v3, -inf }
0x4992   :  { %7817 = vmax.xlane.f32.xlu0 %v7816_v6 }
0x4a1f   :  { %v7818_v13 = vpop.xlane.xlu0 %7817 }
0x4a20   :  { %v7819_v11 = vsub.f32 %v7812_v3, %v7818_v13 }
0x4a22   :  { %v7820_v16 = vmul.f32 1.442695, %v7819_v11 }
0x4a24   :  { %10871 = vpow2.f32 %v7820_v16 }
0x4a2e   :  { %v10872_v12 = vpop.eup %10871 }
0x4a2f   :  { %v7822_v40 = vsel %vm530_vm6, %v10872_v12, 0.0 }
0x4a30   :  { %7823 = vadd.xlane.f32.xlu1 %v7822_v40 }
0x4abd   :  { %v7824_v35 = vpop.xlane.xlu1 %7823 }
0x4abe   :  { %10873 = vrcp.f32 %v7824_v35 }
0x4ac8   :  { %v10874_v22 = vpop.eup %10873 }
0x4ac9   :  { %v7826_v57 = vmul.f32 %v10874_v22, %v10872_v12  ;;  %v10921_v12 = vld [vmem:[%s12814_s5 + $0x1] ss:$0 sm:$0xff] }
0x4acb   :  { %10219 = vmatmul.mubr.msk.f32.vlgmr.msra.gmra.mrb[86].mxu1 %vm542_vm7, %v7826_v57 }
0x4acc   :  { %10713 = vmatpush3.bf16.msra.mxu1 %v12042_v41  ;;  %10234 = vmatprep.mubr.msk.f32.mxu1 %vm10949_vm2, %v12866_v59  ;;  %v12923_v41 = vld [vmem:[#allocation33_spill] sm:$0xff] }
0x4acd   :  { %10714 = vmatprep.subr.bf16.mxu1 %v12870_v47 }
0x4ad0   :  { %10716 = vmatpush3.bf16.msra.mxu1 %v12921_v25 }
0x4ad1   :  { %10723 = vmatprep.subr.bf16.mxu1 %v12870_v47 }
0x4ad3   :  { %10235 = vmatmul.mubr.msk.f32.vlgmr.msra.gmra.mrb[88].mxu1 %vm213_vm3, %v12545_v15 }
0x4ad4   :  { %10725 = vmatpush3.bf16.msra.mxu1 %v12922_v60  ;;  %10256 = vmatprep.mubr.msk.f32.mxu1 %vm10949_vm2, %v12866_v59 }
0x4ad5   :  { %10726 = vmatprep.subr.bf16.mxu1 %v12870_v47 }
0x4ad8   :  { %10728 = vmatpush3.bf16.msra.mxu1 %v12923_v41  ;;  %v12926_v41 = vsub.s32 5, %v11151_v53 }
0x4ad9   :  { %10729 = vmatprep.subr.bf16.mxu1 %v12870_v47 }
0x4adb   :  { %10257 = vmatmul.mubr.msk.f32.vlgmr.msra.gmra.mrb[90].mxu1 %vm213_vm3, %v12545_v15 }
0x4adc   :  { %10731 = vmatpush3.bf16.msra.mxu1 %v12161_v32  ;;  %10282 = vmatprep.mubr.msk.f32.mxu1 %vm10949_vm2, %v12866_v59  ;;  %v12925_v32 = vld [vmem:[#allocation35_spill] sm:$0xff] }
0x4add   :  { %10732 = vmatprep.subr.bf16.mxu1 %v12870_v47 }
0x4ae0   :  { %10734 = vmatpush3.bf16.msra.mxu1 %v12171_v42 }
0x4ae1   :  { %10747 = vmatprep.subr.bf16.mxu1 %v12870_v47 }
0x4b9e   :  { %v7899_v14 = vpop.f32.mrb[86].mxu1 }
0x4b9f   :  { %v10220_v33 = vpop.f32.mrb[87].mxu1  ;;  %10224 = vmatmul.mubr.msk.f32.vlgmr.msra.gmra.mrb[74].mxu0 %vm453_vm4, %v7899_v14 }
0x4ba0   :  { %10719 = vmatpush3.bf16.msra.mxu0 %v12924_v38  ;;  %10245 = vmatprep.mubr.msk.f32.mxu0 %vm10949_vm2, %v12866_v59 }
0x4ba1   :  { %10720 = vmatprep.subr.bf16.mxu0 %v12870_v47 }
0x4ba4   :  { %10722 = vmatpush3.bf16.msra.mxu0 %v12925_v32 }
0x4ba5   :  { %10259 = vmatprep.subr.mxu0 %v12866_v59 }
0x4ba6   :  { %v8043_v44 = vpop.f32.mrb[88].mxu1 }
0x4ba7   :  { %v10236_v51 = vpop.f32.mrb[89].mxu1  ;;  %10246 = vmatmul.mubr.msk.f32.vlgmr.msra.gmra.mrb[86].mxu0 %vm213_vm3, %v12545_v15  ;;  %v8044_v30 = vadd.f32 %v10918_v23, %v8043_v44  ;;  %v10919_v15 = vld [vmem:[%s12815_s6 + $0x17] ss:$0 sm:$0xff] }
0x4ba8   :  { %10261 = vmatprep.mubr.msk.f32.mxu0 %vm10949_vm2, %v12866_v59 }
0x4bae   :  { %v8183_v42 = vpop.f32.mrb[90].mxu1 }
0x4baf   :  { %v10258_v43 = vpop.f32.mrb[91].mxu1  ;;  %v8184_v39 = vadd.f32 %v10919_v15, %v8183_v42  ;;  %v12927_v42 = vld [vmem:[#allocation36_spill] sm:$0xff] }
0x4c7a   :  { %v8113_v52 = vpop.f32.mrb[86].mxu0 }
0x4c7b   :  { %v8114_v17 = vadd.f32 %v10917_v63, %v8113_v52  ;;  %v10247_v29 = vpop.f32.mrb[87].mxu0 }
0x4c7d   :  { %10260 = vmatpush3.xpose.msk.msra.mxu0 %vm453_vm4, %v8114_v17 }
0x4c7e   :  { %10264 = vmatprep.subr.mxu0 %v12866_v59 }
0x4c80   :  { %10262 = vmatmul.mubr.msk.f32.vlgmr.msra.gmra.mrb[88].mxu0 %vm453_vm4, %v8044_v30 }
0x4c81   :  { %10265 = vmatpush3.msk.msra.mxu0 %vm546_vm5, %v8184_v39  ;;  %10266 = vmatprep.mubr.msk.f32.mxu0 %vm10949_vm2, %v12866_v59  ;;  %v69_v39 = vld [vmem:[%s12820_s11 + $0x8] sm:$0xff] }
0x4c82   :  { %10269 = vmatprep.subr.mxu0 %v12866_v59 }
0x4d53   :  { %v8259_v2 = vpop.f32.mrb[88].mxu0 }
0x4d54   :  { %v10263_v27 = vpop.f32.mrb[89].mxu0  ;;  %v8263_v58 = vsel %vm530_vm6, %v8259_v2, -inf }
0x4d55   :  { %8264 = vmax.xlane.f32.xlu0 %v8263_v58  ;;  %v70_v27 = vld [vmem:[%s12820_s11 + $0x10] sm:$0xff]  ;;  %v71_v58 = vld [vmem:[%s12820_s11 + $0x18] sm:$0xff] }
0x4de2   :  { %v8265_v50 = vpop.xlane.xlu0 %8264 }
0x4de3   :  { %v8266_v0 = vsub.f32 %v8259_v2, %v8265_v50  ;;  %v10751_v50 = vpack.c.bf16 %v71_v58, %v70_v27 }
0x4de5   :  { %v8267_v8 = vmul.f32 1.442695, %v8266_v0 }
0x4de7   :  { %10875 = vpow2.f32 %v8267_v8 }
0x4df1   :  { %v10876_v7 = vpop.eup %10875 }
0x4df2   :  { %v8269_v10 = vsel %vm530_vm6, %v10876_v7, 0.0 }
0x4df3   :  { %8270 = vadd.xlane.f32.xlu1 %v8269_v10  ;;  %v10923_v10 = vld [vmem:[%s12812_s3] sm:$0xf] }
0x4e80   :  { %v8271_v31 = vpop.xlane.xlu1 %8270 }
0x4e81   :  { %10877 = vrcp.f32 %v8271_v31 }
0x4e8b   :  { %v10878_v34 = vpop.eup %10877 }
0x4e8c   :  { %v8273_v36 = vmul.f32 %v10878_v34, %v10876_v7 }
0x4e8e   :  { %10267 = vmatmul.mubr.msk.f32.vlgmr.msra.gmra.mrb[90].mxu0 %vm542_vm7, %v8273_v36  ;;  %v8621_v36 = vrot.slane %v10923_v10, %v11647_v55 }
0x4e8f   :  { %10270 = vmatpush3.msra.mxu0 %v10920_v24  ;;  %10271 = vmatprep.mubr.msk.f32.mxu0 %vm10949_vm2, %v12866_v59 }
0x4e90   :  { %10735 = vmatprep.subr.bf16.mxu0 %v12870_v47 }
0x4f61   :  { %v8346_v18 = vpop.f32.mrb[90].mxu0 }
0x4f62   :  { %v10268_v62 = vpop.f32.mrb[91].mxu0  ;;  %10272 = vmatmul.mubr.msk.f32.vlgmr.msra.gmra.mrb[74].mxu0 %vm453_vm4, %v8346_v18 }
0x4f63   :  { %10737 = vmatpush3.bf16.msra.mxu0 %v12229_v9  ;;  %10301 = vmatprep.mubr.msk.f32.mxu0 %vm10949_vm2, %v12866_v59 }
0x4f64   :  { %10738 = vmatprep.subr.bf16.mxu0 %v12870_v47 }
0x4f67   :  { %10740 = vmatpush3.bf16.msra.mxu0 %v12239_v19 }
0x4f68   :  { %10741 = vmatprep.subr.bf16.mxu0 %v12870_v47 }
0x4f6b   :  { %10743 = vmatpush3.bf16.msra.mxu0 %v12249_v28 }
0x4f6c   :  { %10744 = vmatprep.subr.bf16.mxu0 %v12870_v47 }
0x4f6f   :  { %10746 = vmatpush3.bf16.msra.mxu0 %v12259_v37 }
0x5035   :  { %v8419_v61 = vpop.f32.mrb[74].mxu0 }
0x5036   :  { %v10756_v9 = vadd.f32 %v8419_v61, %v6632_v46  ;;  %v10273_v5 = vpop.f32.mrb[75].mxu0 }
0x5038   :  { %v8424_v45 = vsel %vm148_vm1, %v10756_v9, 0.0 }
0x5039   :  { %8425 = vadd.xlane.f32.xlu0 %v8424_v45 }
0x50c6   :  { %v8426_v1 = vpop.xlane.xlu0 %8425 }
0x50c7   :  { %v8427_v54 = vmul.f32 0.03125, %v8426_v1 }
0x50c9   :  { %v8428_v19 = vsub.f32 %v10756_v9, %v8427_v54 }
0x50cb   :  { %v8429_v3 = vmul.f32 %v8428_v19, %v8428_v19 }
0x50cd   :  { %v8430_v4 = vsel %vm148_vm1, %v8429_v3, 0.0 }
0x50ce   :  { %8431 = vadd.xlane.f32.xlu1 %v8430_v4 }
0x515b   :  { %v8432_v28 = vpop.xlane.xlu1 %8431 }
0x515c   :  { %v8433_v6 = vmul.f32 0.03125, %v8432_v28 }
0x515e   :  { %v8434_v13 = vadd.f32 1e-05, %v8433_v6 }
0x5160   :  { %10879 = vrsqrt.f32 %v8434_v13 }
0x516a   :  { %v10880_v37 = vpop.eup %10879 }
0x516b   :  { %v8436_v11 = vmul.f32 %v10880_v37, %v8428_v19 }
0x516d   :  { %v8437_v26 = vmul.f32 %v8436_v11, %v12177_v20 }
0x516f   :  { %v8438_v49 = vadd.f32 %v8437_v26, %v12181_v56 }
0x5171   :  { %10283 = vmatmul.mubr.msk.f32.vlgmr.msra.gmra.mrb[92].mxu1 %vm213_vm3, %v8438_v49 }
0x5172   :  { %10312 = vmatprep.mubr.msk.f32.mxu1 %vm10949_vm2, %v12866_v59  ;;  %v10922_v59 = vld [vmem:[%s12813_s4 + $0x8] sm:$0x3f] }
0x5173   :  { %v4474_v14 = vrot.slane %v10922_v59, %v12926_v41 }
0x5175   :  { %v4545_v38 = vadd.f32 %v12278_v21, %v4474_v14  ;;  %v68_v21 = vld [vmem:[%s12820_s11] sm:$0xff]  ;;  %s10951_s11 = smov [#allocation2]  }
0x5176   :  { %v10748_v2 = vpack.c.bf16 %v69_v39, %v68_v21  ;;  %s8704_s15 = sshll.u32 %s10951_s11, 4  ;;  %s8705_s15 = int_to_ptr.vmem [resolvable:$true] %s8704_s15 }
0x5177   :  { %v4548_v43 = vadd.f32 %v12927_v42, %v4545_v38  ;;  %s10924_s7 = scalar_lea.vmem %s8705_s15, 32  ;;  %p10929_p1 = scmp.lt.s32.totalorder %s8705_s15, %s8705_s15 }
0x5178   :  { %10749 = vmatpush3.bf16.msra.mxu1 %v10748_v2  ;;  %p10925_p0 = scmp.ne.s32.totalorder %s8705_s15, %s10924_s7  ;;  %p10930_p2 = scmp.lt.s32.totalorder %s10924_s7, %s10924_s7 }
0x5179   :  { %10750 = vmatprep.subr.bf16.mxu1 %v12870_v47  ;;  %v8616_v47 = vrot.slane %v10923_v10, %v11644_v48 }
0x517a   :  { %p10931_p3 = por %p10930_p2, %p10929_p1 }
0x517c   :  { %10752 = vmatpush3.bf16.msra.mxu1 %v10751_v50  ;;  %p10932_p4 = pnand %p10931_p3, %p10925_p0 }
0x5244   :  { %v8508_v16 = vpop.f32.mrb[92].mxu1 }
0x5245   :  { %v8509_v40 = vadd.f32 %v10921_v12, %v8508_v16  ;;  %v10284_v35 = vpop.f32.mrb[93].mxu1 }
0x5247   :  { %v9016_v22 = vmul.f32 -1.702, %v8509_v40 }
0x5249   :  { %v8514_v57 = vmul.f32 1.442695, %v9016_v22 }
0x524b   :  { %10881 = vpow2.f32 %v8514_v57 }
0x5255   :  { %v10882_v25 = vpop.eup %10881 }
0x5256   :  { %v8516_v60 = vadd.f32 1.0, %v10882_v25 }
0x5258   :  { %10883 = vrcp.f32 %v8516_v60 }
0x5262   :  { %v10884_v20 = vpop.eup %10883 }
0x5263   :  { %v8519_v56 = vmul.f32 %v10884_v20, %v8509_v40 }
0x5265   :  { %10302 = vmatmul.mubr.msk.f32.vlgmr.msra.gmra.mrb[92].mxu0 %vm74_vm0, %v8519_v56 }
0x5338   :  { %v8589_v33 = vpop.f32.mrb[92].mxu0 }
0x5339   :  { %v8590_v32 = vadd.f32 %v8589_v33, %v4474_v14  ;;  %v10303_v44 = vpop.f32.mrb[93].mxu0 }
0x533b   :  { %v8593_v51 = vadd.f32 %v10756_v9, %v8590_v32 }
0x533d   :  { %v8595_v52 = vrot.slane %v8593_v51, 7 }
0x533f   :  { %v8598_v63 = vsel %vm8597_vm8, %v4548_v43, %v8595_v52 }
0x5340   :  { %v8600_v17 = vsel %vm8599_vm9, %v8598_v63, 0.0 }
0x5341   :  { %8601 = vadd.xlane.f32.xlu0 %v8600_v17 }
0x53ce   :  { %v8602_v29 = vpop.xlane.xlu0 %8601 }
0x53cf   :  { %v8603_v23 = vmul.f32 0.03125, %v8602_v29 }
0x53d1   :  { %v8604_v30 = vsub.f32 %v8598_v63, %v8603_v23 }
0x53d3   :  { %v8605_v15 = vmul.f32 %v8604_v30, %v8604_v30 }
0x53d5   :  { %v8606_v53 = vsel %vm8599_vm9, %v8605_v15, 0.0 }
0x53d6   :  { %8607 = vadd.xlane.f32.xlu1 %v8606_v53 }
0x5463   :  { %v8608_v0 = vpop.xlane.xlu1 %8607 }
0x5464   :  { %v8609_v8 = vmul.f32 0.03125, %v8608_v0 }
0x5466   :  { %v8610_v7 = vadd.f32 1e-05, %v8609_v8 }
0x5468   :  { %10885 = vrsqrt.f32 %v8610_v7 }
0x5472   :  { %v10886_v31 = vpop.eup %10885 }
0x5473   :  { %v8612_v34 = vmul.f32 %v10886_v31, %v8604_v30 }
0x5475   :  { %v8617_v24 = vmul.f32 %v8616_v47, %v8612_v34 }
0x5477   :  { %v8622_v18 = vadd.f32 %v8621_v36, %v8617_v24 }
0x5479   :  { %10313 = vmatmul.mubr.msk.f32.vlgmr.msra.gmra.mrb[94].mxu1 %vm213_vm3, %v8622_v18 }
0x554c   :  { %v8692_v62 = vpop.f32.mrb[94].mxu1 }
0x554d   :  { %8697 = vst.msk [vmem:[#allocation2] sm:$0x3] %vm8696_vm10, %v8692_v62  ;;  %v10314_v46 = vpop.f32.mrb[95].mxu1 }
0x554e   :  { %10935 = shalt.err (!%p10932_p4)
}
0x554f   :  { %s10936_s0 = scalar_lea.hbm %s12821_s12, 32 }
0x5550   :  { %p10937_p5 = scmp.ne.s32.totalorder %s12821_s12, %s10936_s0  ;;  %p10940_p6 = scmp.lt.u32.totalorder %s10936_s0, %s12821_s12 }
0x5552   :  { %p10942_p7 = pnand %p10940_p6, %p10937_p5 }
0x5554   :  { %10945 = shalt.err (!%p10942_p7)
}
0x5555   :  { %8707 = dma.vmem_to_hbm [thread:$0]  %s8705_s15, 32, %s12821_s12, [#allocation3]  }
0x5556   :  { %10946 = dma.done.wait [#allocation3], 32  }
0x5557   :  { %10947 = vsyncadd [#allocation3], 4294967264 }
0x5558   :  { %8711 = vsyncpa [#allocation3], 1 }

</bundles_post_ra>
